<compile_context>
chip_gen: v6e
topology: v6e:2x2x1
jax: 0.10.0
libtpu: 0.0.40
codegen_flags: <defaults>
</compile_context>

<pallas_src>
import functools

import jax
import jax.numpy as jnp
from jax import lax
from jax.experimental import pallas as pl
from jax.experimental.pallas import tpu as pltpu


# ----------------------------------------------------------------------------
# Pallas kernels
# ----------------------------------------------------------------------------
def _bilstm_kernel(x_ref, wih_ref, whh_f_ref, whh_b_ref, b_ref,
                   y_ref, hf_ref, cf_ref, hb_ref, cb_ref,
                   *, hidden, seq_len, batch):
    """Fused bidirectional single-layer LSTM.

    x_ref   : (T*B, D_in)   time-major, flattened
    wih_ref : (D_in, 8H)    [fwd | bwd] input weights, gate order i,f,o,g
    whh_*   : (H, 4H)       per-direction recurrent weights, gate order i,f,o,g
    b_ref   : (1, 8H)       [fwd | bwd] folded biases
    y_ref   : (T*B, 2H)     fwd half in lanes [:H], bwd half in lanes [H:]
    h*/c*   : (B, H)        final states per direction
    """
    H, T, B = hidden, seq_len, batch

    # Hoisted input projection for BOTH directions in one matmul.
    gx = (jnp.dot(x_ref[...], wih_ref[...], preferred_element_type=jnp.float32)
          + b_ref[...])                                           # (T*B, 8H)

    whh_f = whh_f_ref[...]
    whh_b = whh_b_ref[...]

    hf = jnp.zeros((B, H), jnp.float32)
    cf = jnp.zeros((B, H), jnp.float32)
    hb = jnp.zeros((B, H), jnp.float32)
    cb = jnp.zeros((B, H), jnp.float32)

    def cell(gx_row, h, c, whh):
        gates = gx_row + jnp.dot(h, whh, preferred_element_type=jnp.float32)
        sig = jax.nn.sigmoid(gates[:, :3 * H])        # i | f | o  (one EUP group)
        g = jnp.tanh(gates[:, 3 * H:])                # g
        c_new = sig[:, H:2 * H] * c + sig[:, :H] * g
        h_new = sig[:, 2 * H:3 * H] * jnp.tanh(c_new)
        return h_new, c_new

    # Trace-time unrolled recurrence (T is small and static).
    for t in range(T):
        rt = T - 1 - t
        gx_f = gx[t * B:(t + 1) * B, 0:4 * H]
        gx_b = gx[rt * B:(rt + 1) * B, 4 * H:8 * H]
        hf, cf = cell(gx_f, hf, cf, whh_f)
        hb, cb = cell(gx_b, hb, cb, whh_b)
        y_ref[t * B:(t + 1) * B, 0:H] = hf
        y_ref[rt * B:(rt + 1) * B, H:2 * H] = hb

    hf_ref[...] = hf
    cf_ref[...] = cf
    hb_ref[...] = hb
    cb_ref[...] = cb


def _latent_kernel(states_ref, nw_ref, nb_ref, hcw_ref, hcb_ref,
                   neck_ref, hc_ref):
    """neck = relu(states @ Wn + bn); hc = relu(neck @ [Wh|Wc] + [bh|bc])."""
    neck = jnp.maximum(
        jnp.dot(states_ref[...], nw_ref[...], preferred_element_type=jnp.float32)
        + nb_ref[...], 0.0)
    neck_ref[...] = neck
    hc = jnp.maximum(
        jnp.dot(neck, hcw_ref[...], preferred_element_type=jnp.float32)
        + hcb_ref[...], 0.0)
    hc_ref[...] = hc


def _decoder_kernel(d_ref, wih1_ref, whh1_ref, b1_ref, w2_ref, b2_ref,
                    hc_ref, outw_ref, outb_ref,
                    out_ref, y2_sc, *, hidden, seq_len, batch):
    """Fused decoder: LSTM1 -> LSTM2 -> Linear -> LogSoftmax.

    d_ref  : (T*B, D_dec)            wih1 : (D_dec, 4H)   whh1 : (H, 4H)
    w2_ref : (2H, 4H)  = [W_ih2 ; W_hh2]                 b*   : (1, 4H)
    hc_ref : (B, 2H)   = [dec_h | dec_c]  (shared init for both LSTMs)
    outw   : (H, O)    outb : (1, O)     out_ref : (T*B, O)  (log-probs)
    """
    H, T, B = hidden, seq_len, batch

    # Hoisted input projection for decoder LSTM 1.
    gx1 = (jnp.dot(d_ref[...], wih1_ref[...], preferred_element_type=jnp.float32)
           + b1_ref[...])                                         # (T*B, 4H)

    whh1 = whh1_ref[...]
    w2 = w2_ref[...]
    b2 = b2_ref[...]

    h1 = hc_ref[:, 0:H]
    c1 = hc_ref[:, H:2 * H]
    h2 = hc_ref[:, 0:H]
    c2 = hc_ref[:, H:2 * H]

    def gates_to_hc(gates, c):
        sig = jax.nn.sigmoid(gates[:, :3 * H])        # i | f | o
        g = jnp.tanh(gates[:, 3 * H:])                # g
        c_new = sig[:, H:2 * H] * c + sig[:, :H] * g
        h_new = sig[:, 2 * H:3 * H] * jnp.tanh(c_new)
        return h_new, c_new

    for t in range(T):
        # LSTM 1 step (input projection already hoisted).
        g1 = (gx1[t * B:(t + 1) * B, :]
              + jnp.dot(h1, whh1, preferred_element_type=jnp.float32))
        h1, c1 = gates_to_hc(g1, c1)
        # LSTM 2 step: input and recurrent matmuls merged into one.
        g2 = (jnp.dot(jnp.concatenate([h1, h2], axis=1), w2,
                      preferred_element_type=jnp.float32) + b2)
        h2, c2 = gates_to_hc(g2, c2)
        y2_sc[t * B:(t + 1) * B, :] = h2

    # Epilogue: one big matmul + log-softmax over the whole sequence.
    logits = (jnp.dot(y2_sc[...], outw_ref[...], preferred_element_type=jnp.float32)
              + outb_ref[...])
    m = jnp.max(logits, axis=-1, keepdims=True)
    z = logits - m
    out_ref[...] = z - jnp.log(jnp.sum(jnp.exp(z), axis=-1, keepdims=True))


# ----------------------------------------------------------------------------
# Wrappers (weight prep + pallas_call glue)
# ----------------------------------------------------------------------------
def _reorder_gates(w, h):
    """PyTorch gate order (i,f,g,o) -> kernel order (i,f,o,g) along last dim."""
    return jnp.concatenate(
        [w[..., :2 * h], w[..., 3 * h:4 * h], w[..., 2 * h:3 * h]], axis=-1)


_VMEM = pl.BlockSpec(memory_space=pltpu.MemorySpace.VMEM)


def bilstm_pallas(x_flat, fwd, bwd, hidden, seq_len, batch):
    (wif, whf, bf), (wib, whb, bb) = fwd, bwd
    H = hidden
    wih = jnp.concatenate([_reorder_gates(wif, H), _reorder_gates(wib, H)], axis=1)
    bias = jnp.concatenate([_reorder_gates(bf, H), _reorder_gates(bb, H)], axis=1)
    whh_f = _reorder_gates(whf, H)
    whh_b = _reorder_gates(whb, H)
    TB = seq_len * batch
    kernel = functools.partial(_bilstm_kernel, hidden=H,
                               seq_len=seq_len, batch=batch)
    return pl.pallas_call(
        kernel,
        out_shape=(jax.ShapeDtypeStruct((TB, 2 * H), jnp.float32),
                   jax.ShapeDtypeStruct((batch, H), jnp.float32),
                   jax.ShapeDtypeStruct((batch, H), jnp.float32),
                   jax.ShapeDtypeStruct((batch, H), jnp.float32),
                   jax.ShapeDtypeStruct((batch, H), jnp.float32)),
        in_specs=[_VMEM] * 5,
        out_specs=(_VMEM,) * 5,
    )(x_flat, wih, whh_f, whh_b, bias)


def latent_pallas(states, neck_w, neck_b, h_w, h_b, c_w, c_b):
    hcw = jnp.concatenate([h_w, c_w], axis=1)
    hcb = jnp.concatenate([h_b, c_b], axis=1)
    B = states.shape[0]
    code = neck_w.shape[1]
    L = h_w.shape[1]
    return pl.pallas_call(
        _latent_kernel,
        out_shape=(jax.ShapeDtypeStruct((B, code), jnp.float32),
                   jax.ShapeDtypeStruct((B, 2 * L), jnp.float32)),
        in_specs=[_VMEM] * 5,
        out_specs=(_VMEM,) * 2,
    )(states, neck_w, neck_b, hcw, hcb)


def decoder_pallas(d_flat, dec1, dec2, hc, out_w, out_b, hidden, seq_len, batch):
    (wi1, wh1, b1), (wi2, wh2, b2) = dec1, dec2
    H = hidden
    wi1r = _reorder_gates(wi1, H)
    wh1r = _reorder_gates(wh1, H)
    b1r = _reorder_gates(b1, H)
    w2 = jnp.concatenate([_reorder_gates(wi2, H), _reorder_gates(wh2, H)], axis=0)
    b2r = _reorder_gates(b2, H)
    O = out_w.shape[1]
    TB = seq_len * batch
    kernel = functools.partial(_decoder_kernel, hidden=H,
                               seq_len=seq_len, batch=batch)
    return pl.pallas_call(
        kernel,
        out_shape=jax.ShapeDtypeStruct((TB, O), jnp.float32),
        in_specs=[_VMEM] * 9,
        out_specs=_VMEM,
        scratch_shapes=[pltpu.VMEM((TB, H), jnp.float32)],
    )(d_flat, wi1r, wh1r, b1r, w2, b2r, hc, out_w, out_b)


# ----------------------------------------------------------------------------
# Full model forward (bn=False, td_dense_dim=0)
# ----------------------------------------------------------------------------
def model_forward(params, enc_in, dec_in):
    B, T_enc, D_enc = enc_in.shape
    _, T_dec, D_dec = dec_in.shape
    lstm_dim = params["h_w"].shape[1]
    half = lstm_dim // 2

    # ---- Encoder (time-major, flattened to (T*B, D)) ----
    x_flat = jnp.transpose(enc_in, (1, 0, 2)).reshape(T_enc * B, D_enc)
    y1, h1f, c1f, h1b, c1b = bilstm_pallas(
        x_flat, params["enc1_fwd"], params["enc1_bwd"], half, T_enc, B)
    _, h2f, c2f, h2b, c2b = bilstm_pallas(
        y1, params["enc2_fwd"], params["enc2_bwd"], half, T_enc, B)
    states = jnp.concatenate([h1f, c1f, h2f, c2f, h1b, c1b, h2b, c2b], axis=-1)

    # ---- Latent states (neck + h_state + c_state fused) ----
    neck, hc = latent_pallas(states, params["neck_w"], params["neck_b"],
                             params["h_w"], params["h_b"],
                             params["c_w"], params["c_b"])

    # ---- Decoder (dec1 + dec2 + Linear + LogSoftmax fused) ----
    d_flat = jnp.transpose(dec_in, (1, 0, 2)).reshape(T_dec * B, D_dec)
    out_flat = decoder_pallas(d_flat, params["dec1"], params["dec2"], hc,
                              params["out_w"], params["out_b"],
                              lstm_dim, T_dec, B)
    out = out_flat.reshape(T_dec, B, -1)
    decoder_output = jnp.transpose(out, (1, 2, 0))      # (B, output_dims, T_dec)
    return neck, decoder_output


# ----------------------------------------------------------------------------
# Pure-JAX reference (PyTorch gate order, un-reordered weights)
# ----------------------------------------------------------------------------
def lstm_ref(x_tbd, w_ih, w_hh, b, h0, c0, reverse=False):
    H = h0.shape[-1]

    def step(carry, x_t):
        h, c = carry
        gates = x_t @ w_ih + h @ w_hh + b
        i = jax.nn.sigmoid(gates[:, :H])
        f = jax.nn.sigmoid(gates[:, H:2 * H])
        g = jnp.tanh(gates[:, 2 * H:3 * H])
        o = jax.nn.sigmoid(gates[:, 3 * H:])
        c = f * c + i * g
        h = o * jnp.tanh(c)
        return (h, c), h

    xs = x_tbd[::-1] if reverse else x_tbd
    (hT, cT), ys = lax.scan(step, (h0, c0), xs)
    if reverse:
        ys = ys[::-1]
    return ys, hT, cT


def model_ref(params, enc_in, dec_in):
    B = enc_in.shape[0]
    lstm_dim = params["h_w"].shape[1]
    half = lstm_dim // 2
    z_half = jnp.zeros((B, half), jnp.float32)

    x_tm = jnp.transpose(enc_in, (1, 0, 2))
    y_f, h1_f, c1_f = lstm_ref(x_tm, *params["enc1_fwd"], z_half, z_half)
    y_b, h1_b, c1_b = lstm_ref(x_tm, *params["enc1_bwd"], z_half, z_half, reverse=True)
    x1 = jnp.concatenate([y_f, y_b], axis=-1)
    _, h2_f, c2_f = lstm_ref(x1, *params["enc2_fwd"], z_half, z_half)
    _, h2_b, c2_b = lstm_ref(x1, *params["enc2_bwd"], z_half, z_half, reverse=True)
    states = jnp.concatenate([h1_f, c1_f, h2_f, c2_f, h1_b, c1_b, h2_b, c2_b], axis=-1)
    neck = jnp.maximum(states @ params["neck_w"] + params["neck_b"], 0.0)
    dec_h = jnp.maximum(neck @ params["h_w"] + params["h_b"], 0.0)
    dec_c = jnp.maximum(neck @ params["c_w"] + params["c_b"], 0.0)
    d_tm = jnp.transpose(dec_in, (1, 0, 2))
    y1, _, _ = lstm_ref(d_tm, *params["dec1"], dec_h, dec_c)
    y2, _, _ = lstm_ref(y1, *params["dec2"], dec_h, dec_c)
    logits = y2 @ params["out_w"] + params["out_b"]
    out = jax.nn.log_softmax(logits, axis=-1)
    return neck, jnp.transpose(out, (1, 2, 0))


# ----------------------------------------------------------------------------
# Deterministic parameter init (PyTorch-style layout: gate order i,f,g,o)
# ----------------------------------------------------------------------------
def _uni(key, shape, scale=0.1):
    return jax.random.uniform(key, shape, jnp.float32, -scale, scale)


def make_lstm_params(key, d_in, hidden):
    k1, k2, k3 = jax.random.split(key, 3)
    w_ih = _uni(k1, (d_in, 4 * hidden))     # transposed vs PyTorch (4H, D_in)
    w_hh = _uni(k2, (hidden, 4 * hidden))
    b = _uni(k3, (1, 4 * hidden))           # b_ih + b_hh folded together
    return (w_ih, w_hh, b)


def make_params(key, d_enc, d_dec, lstm_dim, codelayer_dim, output_dims):
    half = lstm_dim // 2
    keys = jax.random.split(key, 16)
    return {
        "enc1_fwd": make_lstm_params(keys[0], d_enc, half),
        "enc1_bwd": make_lstm_params(keys[1], d_enc, half),
        "enc2_fwd": make_lstm_params(keys[2], lstm_dim, half),
        "enc2_bwd": make_lstm_params(keys[3], lstm_dim, half),
        "neck_w": _uni(keys[4], (4 * lstm_dim, codelayer_dim)),
        "neck_b": _uni(keys[5], (1, codelayer_dim)),
        "h_w": _uni(keys[6], (codelayer_dim, lstm_dim)),
        "h_b": _uni(keys[7], (1, lstm_dim)),
        "c_w": _uni(keys[8], (codelayer_dim, lstm_dim)),
        "c_b": _uni(keys[9], (1, lstm_dim)),
        "dec1": make_lstm_params(keys[10], d_dec, lstm_dim),
        "dec2": make_lstm_params(keys[11], lstm_dim, lstm_dim),
        "out_w": _uni(keys[12], (lstm_dim, output_dims)),
        "out_b": _uni(keys[13], (1, output_dims)),
    }


# ----------------------------------------------------------------------------
if __name__ == "__main__":
    B, T_ENC, D_ENC = 2, 8, 16
    T_DEC, D_DEC = 8, 20
    LSTM_DIM, CODE_DIM, OUT_DIM = 32, 24, 24
    # TODO(synk): BatchNorm1d branches and the CUDA gaussian-noise add are
    # configured off (bn=False), matching that forward path exactly.

    root = jax.random.PRNGKey(0)
    k_p, k_e, k_d = jax.random.split(root, 3)
    params = make_params(k_p, D_ENC, D_DEC, LSTM_DIM, CODE_DIM, OUT_DIM)
    enc_in = jax.random.normal(k_e, (B, T_ENC, D_ENC), jnp.float32)
    dec_in = jax.random.normal(k_d, (B, T_DEC, D_DEC), jnp.float32)

    fwd = jax.jit(model_forward)
    enc_out, dec_out = fwd(params, enc_in, dec_in)
    jax.block_until_ready((enc_out, dec_out))

    # Validate against a pure-JAX reference.
    enc_ref, dec_ref = jax.jit(model_ref)(params, enc_in, dec_in)
    assert enc_out.shape == (B, CODE_DIM)
    assert dec_out.shape == (B, OUT_DIM, T_DEC)
    assert jnp.allclose(enc_out, enc_ref, atol=2e-4, rtol=2e-4)
    assert jnp.allclose(dec_out, dec_ref, atol=2e-4, rtol=2e-4)

    print("KERNEL_OK")
</pallas_src>

<mosaic_0001>
module attributes {stable_mosaic.version = 11 : i64} {
  func.func @_bilstm_kernel(%arg0: memref<16x32xf32, #tpu.memory_space<vmem>>, %arg1: memref<32x128xf32, #tpu.memory_space<vmem>>, %arg2: memref<16x64xf32, #tpu.memory_space<vmem>>, %arg3: memref<16x64xf32, #tpu.memory_space<vmem>>, %arg4: memref<1x128xf32, #tpu.memory_space<vmem>>, %arg5: memref<16x32xf32, #tpu.memory_space<vmem>>, %arg6: memref<2x16xf32, #tpu.memory_space<vmem>>, %arg7: memref<2x16xf32, #tpu.memory_space<vmem>>, %arg8: memref<2x16xf32, #tpu.memory_space<vmem>>, %arg9: memref<2x16xf32, #tpu.memory_space<vmem>>) attributes {dimension_semantics = [], scalar_prefetch = 0 : i64, scratch_operands = 0 : i64, tpu.core_type = #tpu.core_type<tc>} {
    %c0 = arith.constant 0 : index
    %c0_0 = arith.constant 0 : index
    %0 = vector.load %arg0[%c0, %c0_0] : memref<16x32xf32, #tpu.memory_space<vmem>>, vector<16x32xf32>
    %c0_1 = arith.constant 0 : index
    %c0_2 = arith.constant 0 : index
    %1 = vector.load %arg1[%c0_1, %c0_2] : memref<32x128xf32, #tpu.memory_space<vmem>>, vector<32x128xf32>
    %cst = arith.constant dense<0.000000e+00> : vector<16x128xf32>
    %2 = tpu.matmul %0, %1, %cst {dimension_numbers = #tpu.dot_dimension_numbers<[1], [0], [0], [1], [0, 0, 1, 1], [], []>} : vector<16x32xf32>, vector<32x128xf32>, vector<16x128xf32> -> vector<16x128xf32>
    %c0_3 = arith.constant 0 : index
    %c0_4 = arith.constant 0 : index
    %3 = vector.load %arg4[%c0_3, %c0_4] : memref<1x128xf32, #tpu.memory_space<vmem>>, vector<1x128xf32>
    %4 = vector.broadcast %3 : vector<1x128xf32> to vector<16x128xf32>
    %5 = arith.addf %2, %4 : vector<16x128xf32>
    %c0_5 = arith.constant 0 : index
    %c0_6 = arith.constant 0 : index
    %6 = vector.load %arg2[%c0_5, %c0_6] : memref<16x64xf32, #tpu.memory_space<vmem>>, vector<16x64xf32>
    %c0_7 = arith.constant 0 : index
    %c0_8 = arith.constant 0 : index
    %7 = vector.load %arg3[%c0_7, %c0_8] : memref<16x64xf32, #tpu.memory_space<vmem>>, vector<16x64xf32>
    %cst_9 = arith.constant 0.000000e+00 : f32
    %8 = vector.broadcast %cst_9 : f32 to vector<2x16xf32>
    %cst_10 = arith.constant 0.000000e+00 : f32
    %9 = vector.broadcast %cst_10 : f32 to vector<2x16xf32>
    %cst_11 = arith.constant 0.000000e+00 : f32
    %10 = vector.broadcast %cst_11 : f32 to vector<2x16xf32>
    %cst_12 = arith.constant 0.000000e+00 : f32
    %11 = vector.broadcast %cst_12 : f32 to vector<2x16xf32>
    %12 = vector.extract_strided_slice %5 {offsets = [0, 0], sizes = [2, 64], strides = [1, 1]} : vector<16x128xf32> to vector<2x64xf32>
    %13 = vector.extract_strided_slice %5 {offsets = [14, 64], sizes = [2, 64], strides = [1, 1]} : vector<16x128xf32> to vector<2x64xf32>
    %cst_13 = arith.constant dense<0.000000e+00> : vector<2x64xf32>
    %14 = tpu.matmul %8, %6, %cst_13 {dimension_numbers = #tpu.dot_dimension_numbers<[1], [0], [0], [1], [0, 0, 1, 1], [], []>} : vector<2x16xf32>, vector<16x64xf32>, vector<2x64xf32> -> vector<2x64xf32>
    %15 = arith.addf %12, %14 : vector<2x64xf32>
    %16 = vector.extract_strided_slice %15 {offsets = [0, 0], sizes = [2, 48], strides = [1, 1]} : vector<2x64xf32> to vector<2x48xf32>
    %17 = arith.negf %16 : vector<2x48xf32>
    %18 = math.exp %17 : vector<2x48xf32>
    %cst_14 = arith.constant 1.000000e+00 : f32
    %19 = vector.broadcast %cst_14 : f32 to vector<2x48xf32>
    %20 = arith.addf %19, %18 : vector<2x48xf32>
    %21 = arith.divf %19, %20 : vector<2x48xf32>
    %22 = vector.extract_strided_slice %15 {offsets = [0, 48], sizes = [2, 16], strides = [1, 1]} : vector<2x64xf32> to vector<2x16xf32>
    %23 = math.tanh %22 : vector<2x16xf32>
    %24 = vector.extract_strided_slice %21 {offsets = [0, 16], sizes = [2, 16], strides = [1, 1]} : vector<2x48xf32> to vector<2x16xf32>
    %25 = arith.mulf %24, %9 : vector<2x16xf32>
    %26 = vector.extract_strided_slice %21 {offsets = [0, 0], sizes = [2, 16], strides = [1, 1]} : vector<2x48xf32> to vector<2x16xf32>
    %27 = arith.mulf %26, %23 : vector<2x16xf32>
    %28 = arith.addf %25, %27 : vector<2x16xf32>
    %29 = vector.extract_strided_slice %21 {offsets = [0, 32], sizes = [2, 16], strides = [1, 1]} : vector<2x48xf32> to vector<2x16xf32>
    %30 = math.tanh %28 : vector<2x16xf32>
    %31 = arith.mulf %29, %30 : vector<2x16xf32>
    %cst_15 = arith.constant dense<0.000000e+00> : vector<2x64xf32>
    %32 = tpu.matmul %10, %7, %cst_15 {dimension_numbers = #tpu.dot_dimension_numbers<[1], [0], [0], [1], [0, 0, 1, 1], [], []>} : vector<2x16xf32>, vector<16x64xf32>, vector<2x64xf32> -> vector<2x64xf32>
    %33 = arith.addf %13, %32 : vector<2x64xf32>
    %34 = vector.extract_strided_slice %33 {offsets = [0, 0], sizes = [2, 48], strides = [1, 1]} : vector<2x64xf32> to vector<2x48xf32>
    %35 = arith.negf %34 : vector<2x48xf32>
    %36 = math.exp %35 : vector<2x48xf32>
    %cst_16 = arith.constant 1.000000e+00 : f32
    %37 = vector.broadcast %cst_16 : f32 to vector<2x48xf32>
    %38 = arith.addf %37, %36 : vector<2x48xf32>
    %39 = arith.divf %37, %38 : vector<2x48xf32>
    %40 = vector.extract_strided_slice %33 {offsets = [0, 48], sizes = [2, 16], strides = [1, 1]} : vector<2x64xf32> to vector<2x16xf32>
    %41 = math.tanh %40 : vector<2x16xf32>
    %42 = vector.extract_strided_slice %39 {offsets = [0, 16], sizes = [2, 16], strides = [1, 1]} : vector<2x48xf32> to vector<2x16xf32>
    %43 = arith.mulf %42, %11 : vector<2x16xf32>
    %44 = vector.extract_strided_slice %39 {offsets = [0, 0], sizes = [2, 16], strides = [1, 1]} : vector<2x48xf32> to vector<2x16xf32>
    %45 = arith.mulf %44, %41 : vector<2x16xf32>
    %46 = arith.addf %43, %45 : vector<2x16xf32>
    %47 = vector.extract_strided_slice %39 {offsets = [0, 32], sizes = [2, 16], strides = [1, 1]} : vector<2x48xf32> to vector<2x16xf32>
    %48 = math.tanh %46 : vector<2x16xf32>
    %49 = arith.mulf %47, %48 : vector<2x16xf32>
    %c0_17 = arith.constant 0 : index
    %c0_18 = arith.constant 0 : index
    %50 = vector.load %arg5[%c0_17, %c0_18] : memref<16x32xf32, #tpu.memory_space<vmem>>, vector<2x16xf32>
    tpu.vector_store %arg5[%c0_17, %c0_18], %31 {strides = array<i32>} : memref<16x32xf32, #tpu.memory_space<vmem>>, vector<2x16xf32>,
    %c14 = arith.constant 14 : index
    %c16 = arith.constant 16 : index
    %51 = vector.load %arg5[%c14, %c16] : memref<16x32xf32, #tpu.memory_space<vmem>>, vector<2x16xf32>
    tpu.vector_store %arg5[%c14, %c16], %49 {strides = array<i32>} : memref<16x32xf32, #tpu.memory_space<vmem>>, vector<2x16xf32>,
    %52 = vector.extract_strided_slice %5 {offsets = [2, 0], sizes = [2, 64], strides = [1, 1]} : vector<16x128xf32> to vector<2x64xf32>
    %53 = vector.extract_strided_slice %5 {offsets = [12, 64], sizes = [2, 64], strides = [1, 1]} : vector<16x128xf32> to vector<2x64xf32>
    %cst_19 = arith.constant dense<0.000000e+00> : vector<2x64xf32>
    %54 = tpu.matmul %31, %6, %cst_19 {dimension_numbers = #tpu.dot_dimension_numbers<[1], [0], [0], [1], [0, 0, 1, 1], [], []>} : vector<2x16xf32>, vector<16x64xf32>, vector<2x64xf32> -> vector<2x64xf32>
    %55 = arith.addf %52, %54 : vector<2x64xf32>
    %56 = vector.extract_strided_slice %55 {offsets = [0, 0], sizes = [2, 48], strides = [1, 1]} : vector<2x64xf32> to vector<2x48xf32>
    %57 = arith.negf %56 : vector<2x48xf32>
    %58 = math.exp %57 : vector<2x48xf32>
    %cst_20 = arith.constant 1.000000e+00 : f32
    %59 = vector.broadcast %cst_20 : f32 to vector<2x48xf32>
    %60 = arith.addf %59, %58 : vector<2x48xf32>
    %61 = arith.divf %59, %60 : vector<2x48xf32>
    %62 = vector.extract_strided_slice %55 {offsets = [0, 48], sizes = [2, 16], strides = [1, 1]} : vector<2x64xf32> to vector<2x16xf32>
    %63 = math.tanh %62 : vector<2x16xf32>
    %64 = vector.extract_strided_slice %61 {offsets = [0, 16], sizes = [2, 16], strides = [1, 1]} : vector<2x48xf32> to vector<2x16xf32>
    %65 = arith.mulf %64, %28 : vector<2x16xf32>
    %66 = vector.extract_strided_slice %61 {offsets = [0, 0], sizes = [2, 16], strides = [1, 1]} : vector<2x48xf32> to vector<2x16xf32>
    %67 = arith.mulf %66, %63 : vector<2x16xf32>
    %68 = arith.addf %65, %67 : vector<2x16xf32>
    %69 = vector.extract_strided_slice %61 {offsets = [0, 32], sizes = [2, 16], strides = [1, 1]} : vector<2x48xf32> to vector<2x16xf32>
    %70 = math.tanh %68 : vector<2x16xf32>
    %71 = arith.mulf %69, %70 : vector<2x16xf32>
    %cst_21 = arith.constant dense<0.000000e+00> : vector<2x64xf32>
    %72 = tpu.matmul %49, %7, %cst_21 {dimension_numbers = #tpu.dot_dimension_numbers<[1], [0], [0], [1], [0, 0, 1, 1], [], []>} : vector<2x16xf32>, vector<16x64xf32>, vector<2x64xf32> -> vector<2x64xf32>
    %73 = arith.addf %53, %72 : vector<2x64xf32>
    %74 = vector.extract_strided_slice %73 {offsets = [0, 0], sizes = [2, 48], strides = [1, 1]} : vector<2x64xf32> to vector<2x48xf32>
    %75 = arith.negf %74 : vector<2x48xf32>
    %76 = math.exp %75 : vector<2x48xf32>
    %cst_22 = arith.constant 1.000000e+00 : f32
    %77 = vector.broadcast %cst_22 : f32 to vector<2x48xf32>
    %78 = arith.addf %77, %76 : vector<2x48xf32>
    %79 = arith.divf %77, %78 : vector<2x48xf32>
    %80 = vector.extract_strided_slice %73 {offsets = [0, 48], sizes = [2, 16], strides = [1, 1]} : vector<2x64xf32> to vector<2x16xf32>
    %81 = math.tanh %80 : vector<2x16xf32>
    %82 = vector.extract_strided_slice %79 {offsets = [0, 16], sizes = [2, 16], strides = [1, 1]} : vector<2x48xf32> to vector<2x16xf32>
    %83 = arith.mulf %82, %46 : vector<2x16xf32>
    %84 = vector.extract_strided_slice %79 {offsets = [0, 0], sizes = [2, 16], strides = [1, 1]} : vector<2x48xf32> to vector<2x16xf32>
    %85 = arith.mulf %84, %81 : vector<2x16xf32>
    %86 = arith.addf %83, %85 : vector<2x16xf32>
    %87 = vector.extract_strided_slice %79 {offsets = [0, 32], sizes = [2, 16], strides = [1, 1]} : vector<2x48xf32> to vector<2x16xf32>
    %88 = math.tanh %86 : vector<2x16xf32>
    %89 = arith.mulf %87, %88 : vector<2x16xf32>
    %c2 = arith.constant 2 : index
    %c0_23 = arith.constant 0 : index
    %90 = vector.load %arg5[%c2, %c0_23] : memref<16x32xf32, #tpu.memory_space<vmem>>, vector<2x16xf32>
    tpu.vector_store %arg5[%c2, %c0_23], %71 {strides = array<i32>} : memref<16x32xf32, #tpu.memory_space<vmem>>, vector<2x16xf32>,
    %c12 = arith.constant 12 : index
    %c16_24 = arith.constant 16 : index
    %91 = vector.load %arg5[%c12, %c16_24] : memref<16x32xf32, #tpu.memory_space<vmem>>, vector<2x16xf32>
    tpu.vector_store %arg5[%c12, %c16_24], %89 {strides = array<i32>} : memref<16x32xf32, #tpu.memory_space<vmem>>, vector<2x16xf32>,
    %92 = vector.extract_strided_slice %5 {offsets = [4, 0], sizes = [2, 64], strides = [1, 1]} : vector<16x128xf32> to vector<2x64xf32>
    %93 = vector.extract_strided_slice %5 {offsets = [10, 64], sizes = [2, 64], strides = [1, 1]} : vector<16x128xf32> to vector<2x64xf32>
    %cst_25 = arith.constant dense<0.000000e+00> : vector<2x64xf32>
    %94 = tpu.matmul %71, %6, %cst_25 {dimension_numbers = #tpu.dot_dimension_numbers<[1], [0], [0], [1], [0, 0, 1, 1], [], []>} : vector<2x16xf32>, vector<16x64xf32>, vector<2x64xf32> -> vector<2x64xf32>
    %95 = arith.addf %92, %94 : vector<2x64xf32>
    %96 = vector.extract_strided_slice %95 {offsets = [0, 0], sizes = [2, 48], strides = [1, 1]} : vector<2x64xf32> to vector<2x48xf32>
    %97 = arith.negf %96 : vector<2x48xf32>
    %98 = math.exp %97 : vector<2x48xf32>
    %cst_26 = arith.constant 1.000000e+00 : f32
    %99 = vector.broadcast %cst_26 : f32 to vector<2x48xf32>
    %100 = arith.addf %99, %98 : vector<2x48xf32>
    %101 = arith.divf %99, %100 : vector<2x48xf32>
    %102 = vector.extract_strided_slice %95 {offsets = [0, 48], sizes = [2, 16], strides = [1, 1]} : vector<2x64xf32> to vector<2x16xf32>
    %103 = math.tanh %102 : vector<2x16xf32>
    %104 = vector.extract_strided_slice %101 {offsets = [0, 16], sizes = [2, 16], strides = [1, 1]} : vector<2x48xf32> to vector<2x16xf32>
    %105 = arith.mulf %104, %68 : vector<2x16xf32>
    %106 = vector.extract_strided_slice %101 {offsets = [0, 0], sizes = [2, 16], strides = [1, 1]} : vector<2x48xf32> to vector<2x16xf32>
    %107 = arith.mulf %106, %103 : vector<2x16xf32>
    %108 = arith.addf %105, %107 : vector<2x16xf32>
    %109 = vector.extract_strided_slice %101 {offsets = [0, 32], sizes = [2, 16], strides = [1, 1]} : vector<2x48xf32> to vector<2x16xf32>
    %110 = math.tanh %108 : vector<2x16xf32>
    %111 = arith.mulf %109, %110 : vector<2x16xf32>
    %cst_27 = arith.constant dense<0.000000e+00> : vector<2x64xf32>
    %112 = tpu.matmul %89, %7, %cst_27 {dimension_numbers = #tpu.dot_dimension_numbers<[1], [0], [0], [1], [0, 0, 1, 1], [], []>} : vector<2x16xf32>, vector<16x64xf32>, vector<2x64xf32> -> vector<2x64xf32>
    %113 = arith.addf %93, %112 : vector<2x64xf32>
    %114 = vector.extract_strided_slice %113 {offsets = [0, 0], sizes = [2, 48], strides = [1, 1]} : vector<2x64xf32> to vector<2x48xf32>
    %115 = arith.negf %114 : vector<2x48xf32>
    %116 = math.exp %115 : vector<2x48xf32>
    %cst_28 = arith.constant 1.000000e+00 : f32
    %117 = vector.broadcast %cst_28 : f32 to vector<2x48xf32>
    %118 = arith.addf %117, %116 : vector<2x48xf32>
    %119 = arith.divf %117, %118 : vector<2x48xf32>
    %120 = vector.extract_strided_slice %113 {offsets = [0, 48], sizes = [2, 16], strides = [1, 1]} : vector<2x64xf32> to vector<2x16xf32>
    %121 = math.tanh %120 : vector<2x16xf32>
    %122 = vector.extract_strided_slice %119 {offsets = [0, 16], sizes = [2, 16], strides = [1, 1]} : vector<2x48xf32> to vector<2x16xf32>
    %123 = arith.mulf %122, %86 : vector<2x16xf32>
    %124 = vector.extract_strided_slice %119 {offsets = [0, 0], sizes = [2, 16], strides = [1, 1]} : vector<2x48xf32> to vector<2x16xf32>
    %125 = arith.mulf %124, %121 : vector<2x16xf32>
    %126 = arith.addf %123, %125 : vector<2x16xf32>
    %127 = vector.extract_strided_slice %119 {offsets = [0, 32], sizes = [2, 16], strides = [1, 1]} : vector<2x48xf32> to vector<2x16xf32>
    %128 = math.tanh %126 : vector<2x16xf32>
    %129 = arith.mulf %127, %128 : vector<2x16xf32>
    %c4 = arith.constant 4 : index
    %c0_29 = arith.constant 0 : index
    %130 = vector.load %arg5[%c4, %c0_29] : memref<16x32xf32, #tpu.memory_space<vmem>>, vector<2x16xf32>
    tpu.vector_store %arg5[%c4, %c0_29], %111 {strides = array<i32>} : memref<16x32xf32, #tpu.memory_space<vmem>>, vector<2x16xf32>,
    %c10 = arith.constant 10 : index
    %c16_30 = arith.constant 16 : index
    %131 = vector.load %arg5[%c10, %c16_30] : memref<16x32xf32, #tpu.memory_space<vmem>>, vector<2x16xf32>
    tpu.vector_store %arg5[%c10, %c16_30], %129 {strides = array<i32>} : memref<16x32xf32, #tpu.memory_space<vmem>>, vector<2x16xf32>,
    %132 = vector.extract_strided_slice %5 {offsets = [6, 0], sizes = [2, 64], strides = [1, 1]} : vector<16x128xf32> to vector<2x64xf32>
    %133 = vector.extract_strided_slice %5 {offsets = [8, 64], sizes = [2, 64], strides = [1, 1]} : vector<16x128xf32> to vector<2x64xf32>
    %cst_31 = arith.constant dense<0.000000e+00> : vector<2x64xf32>
    %134 = tpu.matmul %111, %6, %cst_31 {dimension_numbers = #tpu.dot_dimension_numbers<[1], [0], [0], [1], [0, 0, 1, 1], [], []>} : vector<2x16xf32>, vector<16x64xf32>, vector<2x64xf32> -> vector<2x64xf32>
    %135 = arith.addf %132, %134 : vector<2x64xf32>
    %136 = vector.extract_strided_slice %135 {offsets = [0, 0], sizes = [2, 48], strides = [1, 1]} : vector<2x64xf32> to vector<2x48xf32>
    %137 = arith.negf %136 : vector<2x48xf32>
    %138 = math.exp %137 : vector<2x48xf32>
    %cst_32 = arith.constant 1.000000e+00 : f32
    %139 = vector.broadcast %cst_32 : f32 to vector<2x48xf32>
    %140 = arith.addf %139, %138 : vector<2x48xf32>
    %141 = arith.divf %139, %140 : vector<2x48xf32>
    %142 = vector.extract_strided_slice %135 {offsets = [0, 48], sizes = [2, 16], strides = [1, 1]} : vector<2x64xf32> to vector<2x16xf32>
    %143 = math.tanh %142 : vector<2x16xf32>
    %144 = vector.extract_strided_slice %141 {offsets = [0, 16], sizes = [2, 16], strides = [1, 1]} : vector<2x48xf32> to vector<2x16xf32>
    %145 = arith.mulf %144, %108 : vector<2x16xf32>
    %146 = vector.extract_strided_slice %141 {offsets = [0, 0], sizes = [2, 16], strides = [1, 1]} : vector<2x48xf32> to vector<2x16xf32>
    %147 = arith.mulf %146, %143 : vector<2x16xf32>
    %148 = arith.addf %145, %147 : vector<2x16xf32>
    %149 = vector.extract_strided_slice %141 {offsets = [0, 32], sizes = [2, 16], strides = [1, 1]} : vector<2x48xf32> to vector<2x16xf32>
    %150 = math.tanh %148 : vector<2x16xf32>
    %151 = arith.mulf %149, %150 : vector<2x16xf32>
    %cst_33 = arith.constant dense<0.000000e+00> : vector<2x64xf32>
    %152 = tpu.matmul %129, %7, %cst_33 {dimension_numbers = #tpu.dot_dimension_numbers<[1], [0], [0], [1], [0, 0, 1, 1], [], []>} : vector<2x16xf32>, vector<16x64xf32>, vector<2x64xf32> -> vector<2x64xf32>
    %153 = arith.addf %133, %152 : vector<2x64xf32>
    %154 = vector.extract_strided_slice %153 {offsets = [0, 0], sizes = [2, 48], strides = [1, 1]} : vector<2x64xf32> to vector<2x48xf32>
    %155 = arith.negf %154 : vector<2x48xf32>
    %156 = math.exp %155 : vector<2x48xf32>
    %cst_34 = arith.constant 1.000000e+00 : f32
    %157 = vector.broadcast %cst_34 : f32 to vector<2x48xf32>
    %158 = arith.addf %157, %156 : vector<2x48xf32>
    %159 = arith.divf %157, %158 : vector<2x48xf32>
    %160 = vector.extract_strided_slice %153 {offsets = [0, 48], sizes = [2, 16], strides = [1, 1]} : vector<2x64xf32> to vector<2x16xf32>
    %161 = math.tanh %160 : vector<2x16xf32>
    %162 = vector.extract_strided_slice %159 {offsets = [0, 16], sizes = [2, 16], strides = [1, 1]} : vector<2x48xf32> to vector<2x16xf32>
    %163 = arith.mulf %162, %126 : vector<2x16xf32>
    %164 = vector.extract_strided_slice %159 {offsets = [0, 0], sizes = [2, 16], strides = [1, 1]} : vector<2x48xf32> to vector<2x16xf32>
    %165 = arith.mulf %164, %161 : vector<2x16xf32>
    %166 = arith.addf %163, %165 : vector<2x16xf32>
    %167 = vector.extract_strided_slice %159 {offsets = [0, 32], sizes = [2, 16], strides = [1, 1]} : vector<2x48xf32> to vector<2x16xf32>
    %168 = math.tanh %166 : vector<2x16xf32>
    %169 = arith.mulf %167, %168 : vector<2x16xf32>
    %c6 = arith.constant 6 : index
    %c0_35 = arith.constant 0 : index
    %170 = vector.load %arg5[%c6, %c0_35] : memref<16x32xf32, #tpu.memory_space<vmem>>, vector<2x16xf32>
    tpu.vector_store %arg5[%c6, %c0_35], %151 {strides = array<i32>} : memref<16x32xf32, #tpu.memory_space<vmem>>, vector<2x16xf32>,
    %c8 = arith.constant 8 : index
    %c16_36 = arith.constant 16 : index
    %171 = vector.load %arg5[%c8, %c16_36] : memref<16x32xf32, #tpu.memory_space<vmem>>, vector<2x16xf32>
    tpu.vector_store %arg5[%c8, %c16_36], %169 {strides = array<i32>} : memref<16x32xf32, #tpu.memory_space<vmem>>, vector<2x16xf32>,
    %172 = vector.extract_strided_slice %5 {offsets = [8, 0], sizes = [2, 64], strides = [1, 1]} : vector<16x128xf32> to vector<2x64xf32>
    %173 = vector.extract_strided_slice %5 {offsets = [6, 64], sizes = [2, 64], strides = [1, 1]} : vector<16x128xf32> to vector<2x64xf32>
    %cst_37 = arith.constant dense<0.000000e+00> : vector<2x64xf32>
    %174 = tpu.matmul %151, %6, %cst_37 {dimension_numbers = #tpu.dot_dimension_numbers<[1], [0], [0], [1], [0, 0, 1, 1], [], []>} : vector<2x16xf32>, vector<16x64xf32>, vector<2x64xf32> -> vector<2x64xf32>
    %175 = arith.addf %172, %174 : vector<2x64xf32>
    %176 = vector.extract_strided_slice %175 {offsets = [0, 0], sizes = [2, 48], strides = [1, 1]} : vector<2x64xf32> to vector<2x48xf32>
    %177 = arith.negf %176 : vector<2x48xf32>
    %178 = math.exp %177 : vector<2x48xf32>
    %cst_38 = arith.constant 1.000000e+00 : f32
    %179 = vector.broadcast %cst_38 : f32 to vector<2x48xf32>
    %180 = arith.addf %179, %178 : vector<2x48xf32>
    %181 = arith.divf %179, %180 : vector<2x48xf32>
    %182 = vector.extract_strided_slice %175 {offsets = [0, 48], sizes = [2, 16], strides = [1, 1]} : vector<2x64xf32> to vector<2x16xf32>
    %183 = math.tanh %182 : vector<2x16xf32>
    %184 = vector.extract_strided_slice %181 {offsets = [0, 16], sizes = [2, 16], strides = [1, 1]} : vector<2x48xf32> to vector<2x16xf32>
    %185 = arith.mulf %184, %148 : vector<2x16xf32>
    %186 = vector.extract_strided_slice %181 {offsets = [0, 0], sizes = [2, 16], strides = [1, 1]} : vector<2x48xf32> to vector<2x16xf32>
    %187 = arith.mulf %186, %183 : vector<2x16xf32>
    %188 = arith.addf %185, %187 : vector<2x16xf32>
    %189 = vector.extract_strided_slice %181 {offsets = [0, 32], sizes = [2, 16], strides = [1, 1]} : vector<2x48xf32> to vector<2x16xf32>
    %190 = math.tanh %188 : vector<2x16xf32>
    %191 = arith.mulf %189, %190 : vector<2x16xf32>
    %cst_39 = arith.constant dense<0.000000e+00> : vector<2x64xf32>
    %192 = tpu.matmul %169, %7, %cst_39 {dimension_numbers = #tpu.dot_dimension_numbers<[1], [0], [0], [1], [0, 0, 1, 1], [], []>} : vector<2x16xf32>, vector<16x64xf32>, vector<2x64xf32> -> vector<2x64xf32>
    %193 = arith.addf %173, %192 : vector<2x64xf32>
    %194 = vector.extract_strided_slice %193 {offsets = [0, 0], sizes = [2, 48], strides = [1, 1]} : vector<2x64xf32> to vector<2x48xf32>
    %195 = arith.negf %194 : vector<2x48xf32>
    %196 = math.exp %195 : vector<2x48xf32>
    %cst_40 = arith.constant 1.000000e+00 : f32
    %197 = vector.broadcast %cst_40 : f32 to vector<2x48xf32>
    %198 = arith.addf %197, %196 : vector<2x48xf32>
    %199 = arith.divf %197, %198 : vector<2x48xf32>
    %200 = vector.extract_strided_slice %193 {offsets = [0, 48], sizes = [2, 16], strides = [1, 1]} : vector<2x64xf32> to vector<2x16xf32>
    %201 = math.tanh %200 : vector<2x16xf32>
    %202 = vector.extract_strided_slice %199 {offsets = [0, 16], sizes = [2, 16], strides = [1, 1]} : vector<2x48xf32> to vector<2x16xf32>
    %203 = arith.mulf %202, %166 : vector<2x16xf32>
    %204 = vector.extract_strided_slice %199 {offsets = [0, 0], sizes = [2, 16], strides = [1, 1]} : vector<2x48xf32> to vector<2x16xf32>
    %205 = arith.mulf %204, %201 : vector<2x16xf32>
    %206 = arith.addf %203, %205 : vector<2x16xf32>
    %207 = vector.extract_strided_slice %199 {offsets = [0, 32], sizes = [2, 16], strides = [1, 1]} : vector<2x48xf32> to vector<2x16xf32>
    %208 = math.tanh %206 : vector<2x16xf32>
    %209 = arith.mulf %207, %208 : vector<2x16xf32>
    %c8_41 = arith.constant 8 : index
    %c0_42 = arith.constant 0 : index
    %210 = vector.load %arg5[%c8_41, %c0_42] : memref<16x32xf32, #tpu.memory_space<vmem>>, vector<2x16xf32>
    tpu.vector_store %arg5[%c8_41, %c0_42], %191 {strides = array<i32>} : memref<16x32xf32, #tpu.memory_space<vmem>>, vector<2x16xf32>,
    %c6_43 = arith.constant 6 : index
    %c16_44 = arith.constant 16 : index
    %211 = vector.load %arg5[%c6_43, %c16_44] : memref<16x32xf32, #tpu.memory_space<vmem>>, vector<2x16xf32>
    tpu.vector_store %arg5[%c6_43, %c16_44], %209 {strides = array<i32>} : memref<16x32xf32, #tpu.memory_space<vmem>>, vector<2x16xf32>,
    %212 = vector.extract_strided_slice %5 {offsets = [10, 0], sizes = [2, 64], strides = [1, 1]} : vector<16x128xf32> to vector<2x64xf32>
    %213 = vector.extract_strided_slice %5 {offsets = [4, 64], sizes = [2, 64], strides = [1, 1]} : vector<16x128xf32> to vector<2x64xf32>
    %cst_45 = arith.constant dense<0.000000e+00> : vector<2x64xf32>
    %214 = tpu.matmul %191, %6, %cst_45 {dimension_numbers = #tpu.dot_dimension_numbers<[1], [0], [0], [1], [0, 0, 1, 1], [], []>} : vector<2x16xf32>, vector<16x64xf32>, vector<2x64xf32> -> vector<2x64xf32>
    %215 = arith.addf %212, %214 : vector<2x64xf32>
    %216 = vector.extract_strided_slice %215 {offsets = [0, 0], sizes = [2, 48], strides = [1, 1]} : vector<2x64xf32> to vector<2x48xf32>
    %217 = arith.negf %216 : vector<2x48xf32>
    %218 = math.exp %217 : vector<2x48xf32>
    %cst_46 = arith.constant 1.000000e+00 : f32
    %219 = vector.broadcast %cst_46 : f32 to vector<2x48xf32>
    %220 = arith.addf %219, %218 : vector<2x48xf32>
    %221 = arith.divf %219, %220 : vector<2x48xf32>
    %222 = vector.extract_strided_slice %215 {offsets = [0, 48], sizes = [2, 16], strides = [1, 1]} : vector<2x64xf32> to vector<2x16xf32>
    %223 = math.tanh %222 : vector<2x16xf32>
    %224 = vector.extract_strided_slice %221 {offsets = [0, 16], sizes = [2, 16], strides = [1, 1]} : vector<2x48xf32> to vector<2x16xf32>
    %225 = arith.mulf %224, %188 : vector<2x16xf32>
    %226 = vector.extract_strided_slice %221 {offsets = [0, 0], sizes = [2, 16], strides = [1, 1]} : vector<2x48xf32> to vector<2x16xf32>
    %227 = arith.mulf %226, %223 : vector<2x16xf32>
    %228 = arith.addf %225, %227 : vector<2x16xf32>
    %229 = vector.extract_strided_slice %221 {offsets = [0, 32], sizes = [2, 16], strides = [1, 1]} : vector<2x48xf32> to vector<2x16xf32>
    %230 = math.tanh %228 : vector<2x16xf32>
    %231 = arith.mulf %229, %230 : vector<2x16xf32>
    %cst_47 = arith.constant dense<0.000000e+00> : vector<2x64xf32>
    %232 = tpu.matmul %209, %7, %cst_47 {dimension_numbers = #tpu.dot_dimension_numbers<[1], [0], [0], [1], [0, 0, 1, 1], [], []>} : vector<2x16xf32>, vector<16x64xf32>, vector<2x64xf32> -> vector<2x64xf32>
    %233 = arith.addf %213, %232 : vector<2x64xf32>
    %234 = vector.extract_strided_slice %233 {offsets = [0, 0], sizes = [2, 48], strides = [1, 1]} : vector<2x64xf32> to vector<2x48xf32>
    %235 = arith.negf %234 : vector<2x48xf32>
    %236 = math.exp %235 : vector<2x48xf32>
    %cst_48 = arith.constant 1.000000e+00 : f32
    %237 = vector.broadcast %cst_48 : f32 to vector<2x48xf32>
    %238 = arith.addf %237, %236 : vector<2x48xf32>
    %239 = arith.divf %237, %238 : vector<2x48xf32>
    %240 = vector.extract_strided_slice %233 {offsets = [0, 48], sizes = [2, 16], strides = [1, 1]} : vector<2x64xf32> to vector<2x16xf32>
    %241 = math.tanh %240 : vector<2x16xf32>
    %242 = vector.extract_strided_slice %239 {offsets = [0, 16], sizes = [2, 16], strides = [1, 1]} : vector<2x48xf32> to vector<2x16xf32>
    %243 = arith.mulf %242, %206 : vector<2x16xf32>
    %244 = vector.extract_strided_slice %239 {offsets = [0, 0], sizes = [2, 16], strides = [1, 1]} : vector<2x48xf32> to vector<2x16xf32>
    %245 = arith.mulf %244, %241 : vector<2x16xf32>
    %246 = arith.addf %243, %245 : vector<2x16xf32>
    %247 = vector.extract_strided_slice %239 {offsets = [0, 32], sizes = [2, 16], strides = [1, 1]} : vector<2x48xf32> to vector<2x16xf32>
    %248 = math.tanh %246 : vector<2x16xf32>
    %249 = arith.mulf %247, %248 : vector<2x16xf32>
    %c10_49 = arith.constant 10 : index
    %c0_50 = arith.constant 0 : index
    %250 = vector.load %arg5[%c10_49, %c0_50] : memref<16x32xf32, #tpu.memory_space<vmem>>, vector<2x16xf32>
    tpu.vector_store %arg5[%c10_49, %c0_50], %231 {strides = array<i32>} : memref<16x32xf32, #tpu.memory_space<vmem>>, vector<2x16xf32>,
    %c4_51 = arith.constant 4 : index
    %c16_52 = arith.constant 16 : index
    %251 = vector.load %arg5[%c4_51, %c16_52] : memref<16x32xf32, #tpu.memory_space<vmem>>, vector<2x16xf32>
    tpu.vector_store %arg5[%c4_51, %c16_52], %249 {strides = array<i32>} : memref<16x32xf32, #tpu.memory_space<vmem>>, vector<2x16xf32>,
    %252 = vector.extract_strided_slice %5 {offsets = [12, 0], sizes = [2, 64], strides = [1, 1]} : vector<16x128xf32> to vector<2x64xf32>
    %253 = vector.extract_strided_slice %5 {offsets = [2, 64], sizes = [2, 64], strides = [1, 1]} : vector<16x128xf32> to vector<2x64xf32>
    %cst_53 = arith.constant dense<0.000000e+00> : vector<2x64xf32>
    %254 = tpu.matmul %231, %6, %cst_53 {dimension_numbers = #tpu.dot_dimension_numbers<[1], [0], [0], [1], [0, 0, 1, 1], [], []>} : vector<2x16xf32>, vector<16x64xf32>, vector<2x64xf32> -> vector<2x64xf32>
    %255 = arith.addf %252, %254 : vector<2x64xf32>
    %256 = vector.extract_strided_slice %255 {offsets = [0, 0], sizes = [2, 48], strides = [1, 1]} : vector<2x64xf32> to vector<2x48xf32>
    %257 = arith.negf %256 : vector<2x48xf32>
    %258 = math.exp %257 : vector<2x48xf32>
    %cst_54 = arith.constant 1.000000e+00 : f32
    %259 = vector.broadcast %cst_54 : f32 to vector<2x48xf32>
    %260 = arith.addf %259, %258 : vector<2x48xf32>
    %261 = arith.divf %259, %260 : vector<2x48xf32>
    %262 = vector.extract_strided_slice %255 {offsets = [0, 48], sizes = [2, 16], strides = [1, 1]} : vector<2x64xf32> to vector<2x16xf32>
    %263 = math.tanh %262 : vector<2x16xf32>
    %264 = vector.extract_strided_slice %261 {offsets = [0, 16], sizes = [2, 16], strides = [1, 1]} : vector<2x48xf32> to vector<2x16xf32>
    %265 = arith.mulf %264, %228 : vector<2x16xf32>
    %266 = vector.extract_strided_slice %261 {offsets = [0, 0], sizes = [2, 16], strides = [1, 1]} : vector<2x48xf32> to vector<2x16xf32>
    %267 = arith.mulf %266, %263 : vector<2x16xf32>
    %268 = arith.addf %265, %267 : vector<2x16xf32>
    %269 = vector.extract_strided_slice %261 {offsets = [0, 32], sizes = [2, 16], strides = [1, 1]} : vector<2x48xf32> to vector<2x16xf32>
    %270 = math.tanh %268 : vector<2x16xf32>
    %271 = arith.mulf %269, %270 : vector<2x16xf32>
    %cst_55 = arith.constant dense<0.000000e+00> : vector<2x64xf32>
    %272 = tpu.matmul %249, %7, %cst_55 {dimension_numbers = #tpu.dot_dimension_numbers<[1], [0], [0], [1], [0, 0, 1, 1], [], []>} : vector<2x16xf32>, vector<16x64xf32>, vector<2x64xf32> -> vector<2x64xf32>
    %273 = arith.addf %253, %272 : vector<2x64xf32>
    %274 = vector.extract_strided_slice %273 {offsets = [0, 0], sizes = [2, 48], strides = [1, 1]} : vector<2x64xf32> to vector<2x48xf32>
    %275 = arith.negf %274 : vector<2x48xf32>
    %276 = math.exp %275 : vector<2x48xf32>
    %cst_56 = arith.constant 1.000000e+00 : f32
    %277 = vector.broadcast %cst_56 : f32 to vector<2x48xf32>
    %278 = arith.addf %277, %276 : vector<2x48xf32>
    %279 = arith.divf %277, %278 : vector<2x48xf32>
    %280 = vector.extract_strided_slice %273 {offsets = [0, 48], sizes = [2, 16], strides = [1, 1]} : vector<2x64xf32> to vector<2x16xf32>
    %281 = math.tanh %280 : vector<2x16xf32>
    %282 = vector.extract_strided_slice %279 {offsets = [0, 16], sizes = [2, 16], strides = [1, 1]} : vector<2x48xf32> to vector<2x16xf32>
    %283 = arith.mulf %282, %246 : vector<2x16xf32>
    %284 = vector.extract_strided_slice %279 {offsets = [0, 0], sizes = [2, 16], strides = [1, 1]} : vector<2x48xf32> to vector<2x16xf32>
    %285 = arith.mulf %284, %281 : vector<2x16xf32>
    %286 = arith.addf %283, %285 : vector<2x16xf32>
    %287 = vector.extract_strided_slice %279 {offsets = [0, 32], sizes = [2, 16], strides = [1, 1]} : vector<2x48xf32> to vector<2x16xf32>
    %288 = math.tanh %286 : vector<2x16xf32>
    %289 = arith.mulf %287, %288 : vector<2x16xf32>
    %c12_57 = arith.constant 12 : index
    %c0_58 = arith.constant 0 : index
    %290 = vector.load %arg5[%c12_57, %c0_58] : memref<16x32xf32, #tpu.memory_space<vmem>>, vector<2x16xf32>
    tpu.vector_store %arg5[%c12_57, %c0_58], %271 {strides = array<i32>} : memref<16x32xf32, #tpu.memory_space<vmem>>, vector<2x16xf32>,
    %c2_59 = arith.constant 2 : index
    %c16_60 = arith.constant 16 : index
    %291 = vector.load %arg5[%c2_59, %c16_60] : memref<16x32xf32, #tpu.memory_space<vmem>>, vector<2x16xf32>
    tpu.vector_store %arg5[%c2_59, %c16_60], %289 {strides = array<i32>} : memref<16x32xf32, #tpu.memory_space<vmem>>, vector<2x16xf32>,
    %292 = vector.extract_strided_slice %5 {offsets = [14, 0], sizes = [2, 64], strides = [1, 1]} : vector<16x128xf32> to vector<2x64xf32>
    %293 = vector.extract_strided_slice %5 {offsets = [0, 64], sizes = [2, 64], strides = [1, 1]} : vector<16x128xf32> to vector<2x64xf32>
    %cst_61 = arith.constant dense<0.000000e+00> : vector<2x64xf32>
    %294 = tpu.matmul %271, %6, %cst_61 {dimension_numbers = #tpu.dot_dimension_numbers<[1], [0], [0], [1], [0, 0, 1, 1], [], []>} : vector<2x16xf32>, vector<16x64xf32>, vector<2x64xf32> -> vector<2x64xf32>
    %295 = arith.addf %292, %294 : vector<2x64xf32>
    %296 = vector.extract_strided_slice %295 {offsets = [0, 0], sizes = [2, 48], strides = [1, 1]} : vector<2x64xf32> to vector<2x48xf32>
    %297 = arith.negf %296 : vector<2x48xf32>
    %298 = math.exp %297 : vector<2x48xf32>
    %cst_62 = arith.constant 1.000000e+00 : f32
    %299 = vector.broadcast %cst_62 : f32 to vector<2x48xf32>
    %300 = arith.addf %299, %298 : vector<2x48xf32>
    %301 = arith.divf %299, %300 : vector<2x48xf32>
    %302 = vector.extract_strided_slice %295 {offsets = [0, 48], sizes = [2, 16], strides = [1, 1]} : vector<2x64xf32> to vector<2x16xf32>
    %303 = math.tanh %302 : vector<2x16xf32>
    %304 = vector.extract_strided_slice %301 {offsets = [0, 16], sizes = [2, 16], strides = [1, 1]} : vector<2x48xf32> to vector<2x16xf32>
    %305 = arith.mulf %304, %268 : vector<2x16xf32>
    %306 = vector.extract_strided_slice %301 {offsets = [0, 0], sizes = [2, 16], strides = [1, 1]} : vector<2x48xf32> to vector<2x16xf32>
    %307 = arith.mulf %306, %303 : vector<2x16xf32>
    %308 = arith.addf %305, %307 : vector<2x16xf32>
    %309 = vector.extract_strided_slice %301 {offsets = [0, 32], sizes = [2, 16], strides = [1, 1]} : vector<2x48xf32> to vector<2x16xf32>
    %310 = math.tanh %308 : vector<2x16xf32>
    %311 = arith.mulf %309, %310 : vector<2x16xf32>
    %cst_63 = arith.constant dense<0.000000e+00> : vector<2x64xf32>
    %312 = tpu.matmul %289, %7, %cst_63 {dimension_numbers = #tpu.dot_dimension_numbers<[1], [0], [0], [1], [0, 0, 1, 1], [], []>} : vector<2x16xf32>, vector<16x64xf32>, vector<2x64xf32> -> vector<2x64xf32>
    %313 = arith.addf %293, %312 : vector<2x64xf32>
    %314 = vector.extract_strided_slice %313 {offsets = [0, 0], sizes = [2, 48], strides = [1, 1]} : vector<2x64xf32> to vector<2x48xf32>
    %315 = arith.negf %314 : vector<2x48xf32>
    %316 = math.exp %315 : vector<2x48xf32>
    %cst_64 = arith.constant 1.000000e+00 : f32
    %317 = vector.broadcast %cst_64 : f32 to vector<2x48xf32>
    %318 = arith.addf %317, %316 : vector<2x48xf32>
    %319 = arith.divf %317, %318 : vector<2x48xf32>
    %320 = vector.extract_strided_slice %313 {offsets = [0, 48], sizes = [2, 16], strides = [1, 1]} : vector<2x64xf32> to vector<2x16xf32>
    %321 = math.tanh %320 : vector<2x16xf32>
    %322 = vector.extract_strided_slice %319 {offsets = [0, 16], sizes = [2, 16], strides = [1, 1]} : vector<2x48xf32> to vector<2x16xf32>
    %323 = arith.mulf %322, %286 : vector<2x16xf32>
    %324 = vector.extract_strided_slice %319 {offsets = [0, 0], sizes = [2, 16], strides = [1, 1]} : vector<2x48xf32> to vector<2x16xf32>
    %325 = arith.mulf %324, %321 : vector<2x16xf32>
    %326 = arith.addf %323, %325 : vector<2x16xf32>
    %327 = vector.extract_strided_slice %319 {offsets = [0, 32], sizes = [2, 16], strides = [1, 1]} : vector<2x48xf32> to vector<2x16xf32>
    %328 = math.tanh %326 : vector<2x16xf32>
    %329 = arith.mulf %327, %328 : vector<2x16xf32>
    %c14_65 = arith.constant 14 : index
    %c0_66 = arith.constant 0 : index
    %330 = vector.load %arg5[%c14_65, %c0_66] : memref<16x32xf32, #tpu.memory_space<vmem>>, vector<2x16xf32>
    tpu.vector_store %arg5[%c14_65, %c0_66], %311 {strides = array<i32>} : memref<16x32xf32, #tpu.memory_space<vmem>>, vector<2x16xf32>,
    %c0_67 = arith.constant 0 : index
    %c16_68 = arith.constant 16 : index
    %331 = vector.load %arg5[%c0_67, %c16_68] : memref<16x32xf32, #tpu.memory_space<vmem>>, vector<2x16xf32>
    tpu.vector_store %arg5[%c0_67, %c16_68], %329 {strides = array<i32>} : memref<16x32xf32, #tpu.memory_space<vmem>>, vector<2x16xf32>,
    %c0_69 = arith.constant 0 : index
    %c0_70 = arith.constant 0 : index
    %332 = vector.load %arg6[%c0_69, %c0_70] : memref<2x16xf32, #tpu.memory_space<vmem>>, vector<2x16xf32>
    tpu.vector_store %arg6[%c0_69, %c0_70], %311 {strides = array<i32>} : memref<2x16xf32, #tpu.memory_space<vmem>>, vector<2x16xf32>,
    %c0_71 = arith.constant 0 : index
    %c0_72 = arith.constant 0 : index
    %333 = vector.load %arg7[%c0_71, %c0_72] : memref<2x16xf32, #tpu.memory_space<vmem>>, vector<2x16xf32>
    tpu.vector_store %arg7[%c0_71, %c0_72], %308 {strides = array<i32>} : memref<2x16xf32, #tpu.memory_space<vmem>>, vector<2x16xf32>,
    %c0_73 = arith.constant 0 : index
    %c0_74 = arith.constant 0 : index
    %334 = vector.load %arg8[%c0_73, %c0_74] : memref<2x16xf32, #tpu.memory_space<vmem>>, vector<2x16xf32>
    tpu.vector_store %arg8[%c0_73, %c0_74], %329 {strides = array<i32>} : memref<2x16xf32, #tpu.memory_space<vmem>>, vector<2x16xf32>,
    %c0_75 = arith.constant 0 : index
    %c0_76 = arith.constant 0 : index
    %335 = vector.load %arg9[%c0_75, %c0_76] : memref<2x16xf32, #tpu.memory_space<vmem>>, vector<2x16xf32>
    tpu.vector_store %arg9[%c0_75, %c0_76], %326 {strides = array<i32>} : memref<2x16xf32, #tpu.memory_space<vmem>>, vector<2x16xf32>,
    return
  }
}

module attributes {stable_mosaic.version = 11 : i64} {
  func.func @_bilstm_kernel(%arg0: memref<16x16xf32, #tpu.memory_space<vmem>>, %arg1: memref<16x128xf32, #tpu.memory_space<vmem>>, %arg2: memref<16x64xf32, #tpu.memory_space<vmem>>, %arg3: memref<16x64xf32, #tpu.memory_space<vmem>>, %arg4: memref<1x128xf32, #tpu.memory_space<vmem>>, %arg5: memref<16x32xf32, #tpu.memory_space<vmem>>, %arg6: memref<2x16xf32, #tpu.memory_space<vmem>>, %arg7: memref<2x16xf32, #tpu.memory_space<vmem>>, %arg8: memref<2x16xf32, #tpu.memory_space<vmem>>, %arg9: memref<2x16xf32, #tpu.memory_space<vmem>>) attributes {dimension_semantics = [], scalar_prefetch = 0 : i64, scratch_operands = 0 : i64, tpu.core_type = #tpu.core_type<tc>} {
    %c0 = arith.constant 0 : index
    %c0_0 = arith.constant 0 : index
    %0 = vector.load %arg0[%c0, %c0_0] : memref<16x16xf32, #tpu.memory_space<vmem>>, vector<16x16xf32>
    %c0_1 = arith.constant 0 : index
    %c0_2 = arith.constant 0 : index
    %1 = vector.load %arg1[%c0_1, %c0_2] : memref<16x128xf32, #tpu.memory_space<vmem>>, vector<16x128xf32>
    %cst = arith.constant dense<0.000000e+00> : vector<16x128xf32>
    %2 = tpu.matmul %0, %1, %cst {dimension_numbers = #tpu.dot_dimension_numbers<[1], [0], [0], [1], [0, 0, 1, 1], [], []>} : vector<16x16xf32>, vector<16x128xf32>, vector<16x128xf32> -> vector<16x128xf32>
    %c0_3 = arith.constant 0 : index
    %c0_4 = arith.constant 0 : index
    %3 = vector.load %arg4[%c0_3, %c0_4] : memref<1x128xf32, #tpu.memory_space<vmem>>, vector<1x128xf32>
    %4 = vector.broadcast %3 : vector<1x128xf32> to vector<16x128xf32>
    %5 = arith.addf %2, %4 : vector<16x128xf32>
    %c0_5 = arith.constant 0 : index
    %c0_6 = arith.constant 0 : index
    %6 = vector.load %arg2[%c0_5, %c0_6] : memref<16x64xf32, #tpu.memory_space<vmem>>, vector<16x64xf32>
    %c0_7 = arith.constant 0 : index
    %c0_8 = arith.constant 0 : index
    %7 = vector.load %arg3[%c0_7, %c0_8] : memref<16x64xf32, #tpu.memory_space<vmem>>, vector<16x64xf32>
    %cst_9 = arith.constant 0.000000e+00 : f32
    %8 = vector.broadcast %cst_9 : f32 to vector<2x16xf32>
    %cst_10 = arith.constant 0.000000e+00 : f32
    %9 = vector.broadcast %cst_10 : f32 to vector<2x16xf32>
    %cst_11 = arith.constant 0.000000e+00 : f32
    %10 = vector.broadcast %cst_11 : f32 to vector<2x16xf32>
    %cst_12 = arith.constant 0.000000e+00 : f32
    %11 = vector.broadcast %cst_12 : f32 to vector<2x16xf32>
    %12 = vector.extract_strided_slice %5 {offsets = [0, 0], sizes = [2, 64], strides = [1, 1]} : vector<16x128xf32> to vector<2x64xf32>
    %13 = vector.extract_strided_slice %5 {offsets = [14, 64], sizes = [2, 64], strides = [1, 1]} : vector<16x128xf32> to vector<2x64xf32>
    %cst_13 = arith.constant dense<0.000000e+00> : vector<2x64xf32>
    %14 = tpu.matmul %8, %6, %cst_13 {dimension_numbers = #tpu.dot_dimension_numbers<[1], [0], [0], [1], [0, 0, 1, 1], [], []>} : vector<2x16xf32>, vector<16x64xf32>, vector<2x64xf32> -> vector<2x64xf32>
    %15 = arith.addf %12, %14 : vector<2x64xf32>
    %16 = vector.extract_strided_slice %15 {offsets = [0, 0], sizes = [2, 48], strides = [1, 1]} : vector<2x64xf32> to vector<2x48xf32>
    %17 = arith.negf %16 : vector<2x48xf32>
    %18 = math.exp %17 : vector<2x48xf32>
    %cst_14 = arith.constant 1.000000e+00 : f32
    %19 = vector.broadcast %cst_14 : f32 to vector<2x48xf32>
    %20 = arith.addf %19, %18 : vector<2x48xf32>
    %21 = arith.divf %19, %20 : vector<2x48xf32>
    %22 = vector.extract_strided_slice %15 {offsets = [0, 48], sizes = [2, 16], strides = [1, 1]} : vector<2x64xf32> to vector<2x16xf32>
    %23 = math.tanh %22 : vector<2x16xf32>
    %24 = vector.extract_strided_slice %21 {offsets = [0, 16], sizes = [2, 16], strides = [1, 1]} : vector<2x48xf32> to vector<2x16xf32>
    %25 = arith.mulf %24, %9 : vector<2x16xf32>
    %26 = vector.extract_strided_slice %21 {offsets = [0, 0], sizes = [2, 16], strides = [1, 1]} : vector<2x48xf32> to vector<2x16xf32>
    %27 = arith.mulf %26, %23 : vector<2x16xf32>
    %28 = arith.addf %25, %27 : vector<2x16xf32>
    %29 = vector.extract_strided_slice %21 {offsets = [0, 32], sizes = [2, 16], strides = [1, 1]} : vector<2x48xf32> to vector<2x16xf32>
    %30 = math.tanh %28 : vector<2x16xf32>
    %31 = arith.mulf %29, %30 : vector<2x16xf32>
    %cst_15 = arith.constant dense<0.000000e+00> : vector<2x64xf32>
    %32 = tpu.matmul %10, %7, %cst_15 {dimension_numbers = #tpu.dot_dimension_numbers<[1], [0], [0], [1], [0, 0, 1, 1], [], []>} : vector<2x16xf32>, vector<16x64xf32>, vector<2x64xf32> -> vector<2x64xf32>
    %33 = arith.addf %13, %32 : vector<2x64xf32>
    %34 = vector.extract_strided_slice %33 {offsets = [0, 0], sizes = [2, 48], strides = [1, 1]} : vector<2x64xf32> to vector<2x48xf32>
    %35 = arith.negf %34 : vector<2x48xf32>
    %36 = math.exp %35 : vector<2x48xf32>
    %cst_16 = arith.constant 1.000000e+00 : f32
    %37 = vector.broadcast %cst_16 : f32 to vector<2x48xf32>
    %38 = arith.addf %37, %36 : vector<2x48xf32>
    %39 = arith.divf %37, %38 : vector<2x48xf32>
    %40 = vector.extract_strided_slice %33 {offsets = [0, 48], sizes = [2, 16], strides = [1, 1]} : vector<2x64xf32> to vector<2x16xf32>
    %41 = math.tanh %40 : vector<2x16xf32>
    %42 = vector.extract_strided_slice %39 {offsets = [0, 16], sizes = [2, 16], strides = [1, 1]} : vector<2x48xf32> to vector<2x16xf32>
    %43 = arith.mulf %42, %11 : vector<2x16xf32>
    %44 = vector.extract_strided_slice %39 {offsets = [0, 0], sizes = [2, 16], strides = [1, 1]} : vector<2x48xf32> to vector<2x16xf32>
    %45 = arith.mulf %44, %41 : vector<2x16xf32>
    %46 = arith.addf %43, %45 : vector<2x16xf32>
    %47 = vector.extract_strided_slice %39 {offsets = [0, 32], sizes = [2, 16], strides = [1, 1]} : vector<2x48xf32> to vector<2x16xf32>
    %48 = math.tanh %46 : vector<2x16xf32>
    %49 = arith.mulf %47, %48 : vector<2x16xf32>
    %c0_17 = arith.constant 0 : index
    %c0_18 = arith.constant 0 : index
    %50 = vector.load %arg5[%c0_17, %c0_18] : memref<16x32xf32, #tpu.memory_space<vmem>>, vector<2x16xf32>
    tpu.vector_store %arg5[%c0_17, %c0_18], %31 {strides = array<i32>} : memref<16x32xf32, #tpu.memory_space<vmem>>, vector<2x16xf32>,
    %c14 = arith.constant 14 : index
    %c16 = arith.constant 16 : index
    %51 = vector.load %arg5[%c14, %c16] : memref<16x32xf32, #tpu.memory_space<vmem>>, vector<2x16xf32>
    tpu.vector_store %arg5[%c14, %c16], %49 {strides = array<i32>} : memref<16x32xf32, #tpu.memory_space<vmem>>, vector<2x16xf32>,
    %52 = vector.extract_strided_slice %5 {offsets = [2, 0], sizes = [2, 64], strides = [1, 1]} : vector<16x128xf32> to vector<2x64xf32>
    %53 = vector.extract_strided_slice %5 {offsets = [12, 64], sizes = [2, 64], strides = [1, 1]} : vector<16x128xf32> to vector<2x64xf32>
    %cst_19 = arith.constant dense<0.000000e+00> : vector<2x64xf32>
    %54 = tpu.matmul %31, %6, %cst_19 {dimension_numbers = #tpu.dot_dimension_numbers<[1], [0], [0], [1], [0, 0, 1, 1], [], []>} : vector<2x16xf32>, vector<16x64xf32>, vector<2x64xf32> -> vector<2x64xf32>
    %55 = arith.addf %52, %54 : vector<2x64xf32>
    %56 = vector.extract_strided_slice %55 {offsets = [0, 0], sizes = [2, 48], strides = [1, 1]} : vector<2x64xf32> to vector<2x48xf32>
    %57 = arith.negf %56 : vector<2x48xf32>
    %58 = math.exp %57 : vector<2x48xf32>
    %cst_20 = arith.constant 1.000000e+00 : f32
    %59 = vector.broadcast %cst_20 : f32 to vector<2x48xf32>
    %60 = arith.addf %59, %58 : vector<2x48xf32>
    %61 = arith.divf %59, %60 : vector<2x48xf32>
    %62 = vector.extract_strided_slice %55 {offsets = [0, 48], sizes = [2, 16], strides = [1, 1]} : vector<2x64xf32> to vector<2x16xf32>
    %63 = math.tanh %62 : vector<2x16xf32>
    %64 = vector.extract_strided_slice %61 {offsets = [0, 16], sizes = [2, 16], strides = [1, 1]} : vector<2x48xf32> to vector<2x16xf32>
    %65 = arith.mulf %64, %28 : vector<2x16xf32>
    %66 = vector.extract_strided_slice %61 {offsets = [0, 0], sizes = [2, 16], strides = [1, 1]} : vector<2x48xf32> to vector<2x16xf32>
    %67 = arith.mulf %66, %63 : vector<2x16xf32>
    %68 = arith.addf %65, %67 : vector<2x16xf32>
    %69 = vector.extract_strided_slice %61 {offsets = [0, 32], sizes = [2, 16], strides = [1, 1]} : vector<2x48xf32> to vector<2x16xf32>
    %70 = math.tanh %68 : vector<2x16xf32>
    %71 = arith.mulf %69, %70 : vector<2x16xf32>
    %cst_21 = arith.constant dense<0.000000e+00> : vector<2x64xf32>
    %72 = tpu.matmul %49, %7, %cst_21 {dimension_numbers = #tpu.dot_dimension_numbers<[1], [0], [0], [1], [0, 0, 1, 1], [], []>} : vector<2x16xf32>, vector<16x64xf32>, vector<2x64xf32> -> vector<2x64xf32>
    %73 = arith.addf %53, %72 : vector<2x64xf32>
    %74 = vector.extract_strided_slice %73 {offsets = [0, 0], sizes = [2, 48], strides = [1, 1]} : vector<2x64xf32> to vector<2x48xf32>
    %75 = arith.negf %74 : vector<2x48xf32>
    %76 = math.exp %75 : vector<2x48xf32>
    %cst_22 = arith.constant 1.000000e+00 : f32
    %77 = vector.broadcast %cst_22 : f32 to vector<2x48xf32>
    %78 = arith.addf %77, %76 : vector<2x48xf32>
    %79 = arith.divf %77, %78 : vector<2x48xf32>
    %80 = vector.extract_strided_slice %73 {offsets = [0, 48], sizes = [2, 16], strides = [1, 1]} : vector<2x64xf32> to vector<2x16xf32>
    %81 = math.tanh %80 : vector<2x16xf32>
    %82 = vector.extract_strided_slice %79 {offsets = [0, 16], sizes = [2, 16], strides = [1, 1]} : vector<2x48xf32> to vector<2x16xf32>
    %83 = arith.mulf %82, %46 : vector<2x16xf32>
    %84 = vector.extract_strided_slice %79 {offsets = [0, 0], sizes = [2, 16], strides = [1, 1]} : vector<2x48xf32> to vector<2x16xf32>
    %85 = arith.mulf %84, %81 : vector<2x16xf32>
    %86 = arith.addf %83, %85 : vector<2x16xf32>
    %87 = vector.extract_strided_slice %79 {offsets = [0, 32], sizes = [2, 16], strides = [1, 1]} : vector<2x48xf32> to vector<2x16xf32>
    %88 = math.tanh %86 : vector<2x16xf32>
    %89 = arith.mulf %87, %88 : vector<2x16xf32>
    %c2 = arith.constant 2 : index
    %c0_23 = arith.constant 0 : index
    %90 = vector.load %arg5[%c2, %c0_23] : memref<16x32xf32, #tpu.memory_space<vmem>>, vector<2x16xf32>
    tpu.vector_store %arg5[%c2, %c0_23], %71 {strides = array<i32>} : memref<16x32xf32, #tpu.memory_space<vmem>>, vector<2x16xf32>,
    %c12 = arith.constant 12 : index
    %c16_24 = arith.constant 16 : index
    %91 = vector.load %arg5[%c12, %c16_24] : memref<16x32xf32, #tpu.memory_space<vmem>>, vector<2x16xf32>
    tpu.vector_store %arg5[%c12, %c16_24], %89 {strides = array<i32>} : memref<16x32xf32, #tpu.memory_space<vmem>>, vector<2x16xf32>,
    %92 = vector.extract_strided_slice %5 {offsets = [4, 0], sizes = [2, 64], strides = [1, 1]} : vector<16x128xf32> to vector<2x64xf32>
    %93 = vector.extract_strided_slice %5 {offsets = [10, 64], sizes = [2, 64], strides = [1, 1]} : vector<16x128xf32> to vector<2x64xf32>
    %cst_25 = arith.constant dense<0.000000e+00> : vector<2x64xf32>
    %94 = tpu.matmul %71, %6, %cst_25 {dimension_numbers = #tpu.dot_dimension_numbers<[1], [0], [0], [1], [0, 0, 1, 1], [], []>} : vector<2x16xf32>, vector<16x64xf32>, vector<2x64xf32> -> vector<2x64xf32>
    %95 = arith.addf %92, %94 : vector<2x64xf32>
    %96 = vector.extract_strided_slice %95 {offsets = [0, 0], sizes = [2, 48], strides = [1, 1]} : vector<2x64xf32> to vector<2x48xf32>
    %97 = arith.negf %96 : vector<2x48xf32>
    %98 = math.exp %97 : vector<2x48xf32>
    %cst_26 = arith.constant 1.000000e+00 : f32
    %99 = vector.broadcast %cst_26 : f32 to vector<2x48xf32>
    %100 = arith.addf %99, %98 : vector<2x48xf32>
    %101 = arith.divf %99, %100 : vector<2x48xf32>
    %102 = vector.extract_strided_slice %95 {offsets = [0, 48], sizes = [2, 16], strides = [1, 1]} : vector<2x64xf32> to vector<2x16xf32>
    %103 = math.tanh %102 : vector<2x16xf32>
    %104 = vector.extract_strided_slice %101 {offsets = [0, 16], sizes = [2, 16], strides = [1, 1]} : vector<2x48xf32> to vector<2x16xf32>
    %105 = arith.mulf %104, %68 : vector<2x16xf32>
    %106 = vector.extract_strided_slice %101 {offsets = [0, 0], sizes = [2, 16], strides = [1, 1]} : vector<2x48xf32> to vector<2x16xf32>
    %107 = arith.mulf %106, %103 : vector<2x16xf32>
    %108 = arith.addf %105, %107 : vector<2x16xf32>
    %109 = vector.extract_strided_slice %101 {offsets = [0, 32], sizes = [2, 16], strides = [1, 1]} : vector<2x48xf32> to vector<2x16xf32>
    %110 = math.tanh %108 : vector<2x16xf32>
    %111 = arith.mulf %109, %110 : vector<2x16xf32>
    %cst_27 = arith.constant dense<0.000000e+00> : vector<2x64xf32>
    %112 = tpu.matmul %89, %7, %cst_27 {dimension_numbers = #tpu.dot_dimension_numbers<[1], [0], [0], [1], [0, 0, 1, 1], [], []>} : vector<2x16xf32>, vector<16x64xf32>, vector<2x64xf32> -> vector<2x64xf32>
    %113 = arith.addf %93, %112 : vector<2x64xf32>
    %114 = vector.extract_strided_slice %113 {offsets = [0, 0], sizes = [2, 48], strides = [1, 1]} : vector<2x64xf32> to vector<2x48xf32>
    %115 = arith.negf %114 : vector<2x48xf32>
    %116 = math.exp %115 : vector<2x48xf32>
    %cst_28 = arith.constant 1.000000e+00 : f32
    %117 = vector.broadcast %cst_28 : f32 to vector<2x48xf32>
    %118 = arith.addf %117, %116 : vector<2x48xf32>
    %119 = arith.divf %117, %118 : vector<2x48xf32>
    %120 = vector.extract_strided_slice %113 {offsets = [0, 48], sizes = [2, 16], strides = [1, 1]} : vector<2x64xf32> to vector<2x16xf32>
    %121 = math.tanh %120 : vector<2x16xf32>
    %122 = vector.extract_strided_slice %119 {offsets = [0, 16], sizes = [2, 16], strides = [1, 1]} : vector<2x48xf32> to vector<2x16xf32>
    %123 = arith.mulf %122, %86 : vector<2x16xf32>
    %124 = vector.extract_strided_slice %119 {offsets = [0, 0], sizes = [2, 16], strides = [1, 1]} : vector<2x48xf32> to vector<2x16xf32>
    %125 = arith.mulf %124, %121 : vector<2x16xf32>
    %126 = arith.addf %123, %125 : vector<2x16xf32>
    %127 = vector.extract_strided_slice %119 {offsets = [0, 32], sizes = [2, 16], strides = [1, 1]} : vector<2x48xf32> to vector<2x16xf32>
    %128 = math.tanh %126 : vector<2x16xf32>
    %129 = arith.mulf %127, %128 : vector<2x16xf32>
    %c4 = arith.constant 4 : index
    %c0_29 = arith.constant 0 : index
    %130 = vector.load %arg5[%c4, %c0_29] : memref<16x32xf32, #tpu.memory_space<vmem>>, vector<2x16xf32>
    tpu.vector_store %arg5[%c4, %c0_29], %111 {strides = array<i32>} : memref<16x32xf32, #tpu.memory_space<vmem>>, vector<2x16xf32>,
    %c10 = arith.constant 10 : index
    %c16_30 = arith.constant 16 : index
    %131 = vector.load %arg5[%c10, %c16_30] : memref<16x32xf32, #tpu.memory_space<vmem>>, vector<2x16xf32>
    tpu.vector_store %arg5[%c10, %c16_30], %129 {strides = array<i32>} : memref<16x32xf32, #tpu.memory_space<vmem>>, vector<2x16xf32>,
    %132 = vector.extract_strided_slice %5 {offsets = [6, 0], sizes = [2, 64], strides = [1, 1]} : vector<16x128xf32> to vector<2x64xf32>
    %133 = vector.extract_strided_slice %5 {offsets = [8, 64], sizes = [2, 64], strides = [1, 1]} : vector<16x128xf32> to vector<2x64xf32>
    %cst_31 = arith.constant dense<0.000000e+00> : vector<2x64xf32>
    %134 = tpu.matmul %111, %6, %cst_31 {dimension_numbers = #tpu.dot_dimension_numbers<[1], [0], [0], [1], [0, 0, 1, 1], [], []>} : vector<2x16xf32>, vector<16x64xf32>, vector<2x64xf32> -> vector<2x64xf32>
    %135 = arith.addf %132, %134 : vector<2x64xf32>
    %136 = vector.extract_strided_slice %135 {offsets = [0, 0], sizes = [2, 48], strides = [1, 1]} : vector<2x64xf32> to vector<2x48xf32>
    %137 = arith.negf %136 : vector<2x48xf32>
    %138 = math.exp %137 : vector<2x48xf32>
    %cst_32 = arith.constant 1.000000e+00 : f32
    %139 = vector.broadcast %cst_32 : f32 to vector<2x48xf32>
    %140 = arith.addf %139, %138 : vector<2x48xf32>
    %141 = arith.divf %139, %140 : vector<2x48xf32>
    %142 = vector.extract_strided_slice %135 {offsets = [0, 48], sizes = [2, 16], strides = [1, 1]} : vector<2x64xf32> to vector<2x16xf32>
    %143 = math.tanh %142 : vector<2x16xf32>
    %144 = vector.extract_strided_slice %141 {offsets = [0, 16], sizes = [2, 16], strides = [1, 1]} : vector<2x48xf32> to vector<2x16xf32>
    %145 = arith.mulf %144, %108 : vector<2x16xf32>
    %146 = vector.extract_strided_slice %141 {offsets = [0, 0], sizes = [2, 16], strides = [1, 1]} : vector<2x48xf32> to vector<2x16xf32>
    %147 = arith.mulf %146, %143 : vector<2x16xf32>
    %148 = arith.addf %145, %147 : vector<2x16xf32>
    %149 = vector.extract_strided_slice %141 {offsets = [0, 32], sizes = [2, 16], strides = [1, 1]} : vector<2x48xf32> to vector<2x16xf32>
    %150 = math.tanh %148 : vector<2x16xf32>
    %151 = arith.mulf %149, %150 : vector<2x16xf32>
    %cst_33 = arith.constant dense<0.000000e+00> : vector<2x64xf32>
    %152 = tpu.matmul %129, %7, %cst_33 {dimension_numbers = #tpu.dot_dimension_numbers<[1], [0], [0], [1], [0, 0, 1, 1], [], []>} : vector<2x16xf32>, vector<16x64xf32>, vector<2x64xf32> -> vector<2x64xf32>
    %153 = arith.addf %133, %152 : vector<2x64xf32>
    %154 = vector.extract_strided_slice %153 {offsets = [0, 0], sizes = [2, 48], strides = [1, 1]} : vector<2x64xf32> to vector<2x48xf32>
    %155 = arith.negf %154 : vector<2x48xf32>
    %156 = math.exp %155 : vector<2x48xf32>
    %cst_34 = arith.constant 1.000000e+00 : f32
    %157 = vector.broadcast %cst_34 : f32 to vector<2x48xf32>
    %158 = arith.addf %157, %156 : vector<2x48xf32>
    %159 = arith.divf %157, %158 : vector<2x48xf32>
    %160 = vector.extract_strided_slice %153 {offsets = [0, 48], sizes = [2, 16], strides = [1, 1]} : vector<2x64xf32> to vector<2x16xf32>
    %161 = math.tanh %160 : vector<2x16xf32>
    %162 = vector.extract_strided_slice %159 {offsets = [0, 16], sizes = [2, 16], strides = [1, 1]} : vector<2x48xf32> to vector<2x16xf32>
    %163 = arith.mulf %162, %126 : vector<2x16xf32>
    %164 = vector.extract_strided_slice %159 {offsets = [0, 0], sizes = [2, 16], strides = [1, 1]} : vector<2x48xf32> to vector<2x16xf32>
    %165 = arith.mulf %164, %161 : vector<2x16xf32>
    %166 = arith.addf %163, %165 : vector<2x16xf32>
    %167 = vector.extract_strided_slice %159 {offsets = [0, 32], sizes = [2, 16], strides = [1, 1]} : vector<2x48xf32> to vector<2x16xf32>
    %168 = math.tanh %166 : vector<2x16xf32>
    %169 = arith.mulf %167, %168 : vector<2x16xf32>
    %c6 = arith.constant 6 : index
    %c0_35 = arith.constant 0 : index
    %170 = vector.load %arg5[%c6, %c0_35] : memref<16x32xf32, #tpu.memory_space<vmem>>, vector<2x16xf32>
    tpu.vector_store %arg5[%c6, %c0_35], %151 {strides = array<i32>} : memref<16x32xf32, #tpu.memory_space<vmem>>, vector<2x16xf32>,
    %c8 = arith.constant 8 : index
    %c16_36 = arith.constant 16 : index
    %171 = vector.load %arg5[%c8, %c16_36] : memref<16x32xf32, #tpu.memory_space<vmem>>, vector<2x16xf32>
    tpu.vector_store %arg5[%c8, %c16_36], %169 {strides = array<i32>} : memref<16x32xf32, #tpu.memory_space<vmem>>, vector<2x16xf32>,
    %172 = vector.extract_strided_slice %5 {offsets = [8, 0], sizes = [2, 64], strides = [1, 1]} : vector<16x128xf32> to vector<2x64xf32>
    %173 = vector.extract_strided_slice %5 {offsets = [6, 64], sizes = [2, 64], strides = [1, 1]} : vector<16x128xf32> to vector<2x64xf32>
    %cst_37 = arith.constant dense<0.000000e+00> : vector<2x64xf32>
    %174 = tpu.matmul %151, %6, %cst_37 {dimension_numbers = #tpu.dot_dimension_numbers<[1], [0], [0], [1], [0, 0, 1, 1], [], []>} : vector<2x16xf32>, vector<16x64xf32>, vector<2x64xf32> -> vector<2x64xf32>
    %175 = arith.addf %172, %174 : vector<2x64xf32>
    %176 = vector.extract_strided_slice %175 {offsets = [0, 0], sizes = [2, 48], strides = [1, 1]} : vector<2x64xf32> to vector<2x48xf32>
    %177 = arith.negf %176 : vector<2x48xf32>
    %178 = math.exp %177 : vector<2x48xf32>
    %cst_38 = arith.constant 1.000000e+00 : f32
    %179 = vector.broadcast %cst_38 : f32 to vector<2x48xf32>
    %180 = arith.addf %179, %178 : vector<2x48xf32>
    %181 = arith.divf %179, %180 : vector<2x48xf32>
    %182 = vector.extract_strided_slice %175 {offsets = [0, 48], sizes = [2, 16], strides = [1, 1]} : vector<2x64xf32> to vector<2x16xf32>
    %183 = math.tanh %182 : vector<2x16xf32>
    %184 = vector.extract_strided_slice %181 {offsets = [0, 16], sizes = [2, 16], strides = [1, 1]} : vector<2x48xf32> to vector<2x16xf32>
    %185 = arith.mulf %184, %148 : vector<2x16xf32>
    %186 = vector.extract_strided_slice %181 {offsets = [0, 0], sizes = [2, 16], strides = [1, 1]} : vector<2x48xf32> to vector<2x16xf32>
    %187 = arith.mulf %186, %183 : vector<2x16xf32>
    %188 = arith.addf %185, %187 : vector<2x16xf32>
    %189 = vector.extract_strided_slice %181 {offsets = [0, 32], sizes = [2, 16], strides = [1, 1]} : vector<2x48xf32> to vector<2x16xf32>
    %190 = math.tanh %188 : vector<2x16xf32>
    %191 = arith.mulf %189, %190 : vector<2x16xf32>
    %cst_39 = arith.constant dense<0.000000e+00> : vector<2x64xf32>
    %192 = tpu.matmul %169, %7, %cst_39 {dimension_numbers = #tpu.dot_dimension_numbers<[1], [0], [0], [1], [0, 0, 1, 1], [], []>} : vector<2x16xf32>, vector<16x64xf32>, vector<2x64xf32> -> vector<2x64xf32>
    %193 = arith.addf %173, %192 : vector<2x64xf32>
    %194 = vector.extract_strided_slice %193 {offsets = [0, 0], sizes = [2, 48], strides = [1, 1]} : vector<2x64xf32> to vector<2x48xf32>
    %195 = arith.negf %194 : vector<2x48xf32>
    %196 = math.exp %195 : vector<2x48xf32>
    %cst_40 = arith.constant 1.000000e+00 : f32
    %197 = vector.broadcast %cst_40 : f32 to vector<2x48xf32>
    %198 = arith.addf %197, %196 : vector<2x48xf32>
    %199 = arith.divf %197, %198 : vector<2x48xf32>
    %200 = vector.extract_strided_slice %193 {offsets = [0, 48], sizes = [2, 16], strides = [1, 1]} : vector<2x64xf32> to vector<2x16xf32>
    %201 = math.tanh %200 : vector<2x16xf32>
    %202 = vector.extract_strided_slice %199 {offsets = [0, 16], sizes = [2, 16], strides = [1, 1]} : vector<2x48xf32> to vector<2x16xf32>
    %203 = arith.mulf %202, %166 : vector<2x16xf32>
    %204 = vector.extract_strided_slice %199 {offsets = [0, 0], sizes = [2, 16], strides = [1, 1]} : vector<2x48xf32> to vector<2x16xf32>
    %205 = arith.mulf %204, %201 : vector<2x16xf32>
    %206 = arith.addf %203, %205 : vector<2x16xf32>
    %207 = vector.extract_strided_slice %199 {offsets = [0, 32], sizes = [2, 16], strides = [1, 1]} : vector<2x48xf32> to vector<2x16xf32>
    %208 = math.tanh %206 : vector<2x16xf32>
    %209 = arith.mulf %207, %208 : vector<2x16xf32>
    %c8_41 = arith.constant 8 : index
    %c0_42 = arith.constant 0 : index
    %210 = vector.load %arg5[%c8_41, %c0_42] : memref<16x32xf32, #tpu.memory_space<vmem>>, vector<2x16xf32>
    tpu.vector_store %arg5[%c8_41, %c0_42], %191 {strides = array<i32>} : memref<16x32xf32, #tpu.memory_space<vmem>>, vector<2x16xf32>,
    %c6_43 = arith.constant 6 : index
    %c16_44 = arith.constant 16 : index
    %211 = vector.load %arg5[%c6_43, %c16_44] : memref<16x32xf32, #tpu.memory_space<vmem>>, vector<2x16xf32>
    tpu.vector_store %arg5[%c6_43, %c16_44], %209 {strides = array<i32>} : memref<16x32xf32, #tpu.memory_space<vmem>>, vector<2x16xf32>,
    %212 = vector.extract_strided_slice %5 {offsets = [10, 0], sizes = [2, 64], strides = [1, 1]} : vector<16x128xf32> to vector<2x64xf32>
    %213 = vector.extract_strided_slice %5 {offsets = [4, 64], sizes = [2, 64], strides = [1, 1]} : vector<16x128xf32> to vector<2x64xf32>
    %cst_45 = arith.constant dense<0.000000e+00> : vector<2x64xf32>
    %214 = tpu.matmul %191, %6, %cst_45 {dimension_numbers = #tpu.dot_dimension_numbers<[1], [0], [0], [1], [0, 0, 1, 1], [], []>} : vector<2x16xf32>, vector<16x64xf32>, vector<2x64xf32> -> vector<2x64xf32>
    %215 = arith.addf %212, %214 : vector<2x64xf32>
    %216 = vector.extract_strided_slice %215 {offsets = [0, 0], sizes = [2, 48], strides = [1, 1]} : vector<2x64xf32> to vector<2x48xf32>
    %217 = arith.negf %216 : vector<2x48xf32>
    %218 = math.exp %217 : vector<2x48xf32>
    %cst_46 = arith.constant 1.000000e+00 : f32
    %219 = vector.broadcast %cst_46 : f32 to vector<2x48xf32>
    %220 = arith.addf %219, %218 : vector<2x48xf32>
    %221 = arith.divf %219, %220 : vector<2x48xf32>
    %222 = vector.extract_strided_slice %215 {offsets = [0, 48], sizes = [2, 16], strides = [1, 1]} : vector<2x64xf32> to vector<2x16xf32>
    %223 = math.tanh %222 : vector<2x16xf32>
    %224 = vector.extract_strided_slice %221 {offsets = [0, 16], sizes = [2, 16], strides = [1, 1]} : vector<2x48xf32> to vector<2x16xf32>
    %225 = arith.mulf %224, %188 : vector<2x16xf32>
    %226 = vector.extract_strided_slice %221 {offsets = [0, 0], sizes = [2, 16], strides = [1, 1]} : vector<2x48xf32> to vector<2x16xf32>
    %227 = arith.mulf %226, %223 : vector<2x16xf32>
    %228 = arith.addf %225, %227 : vector<2x16xf32>
    %229 = vector.extract_strided_slice %221 {offsets = [0, 32], sizes = [2, 16], strides = [1, 1]} : vector<2x48xf32> to vector<2x16xf32>
    %230 = math.tanh %228 : vector<2x16xf32>
    %231 = arith.mulf %229, %230 : vector<2x16xf32>
    %cst_47 = arith.constant dense<0.000000e+00> : vector<2x64xf32>
    %232 = tpu.matmul %209, %7, %cst_47 {dimension_numbers = #tpu.dot_dimension_numbers<[1], [0], [0], [1], [0, 0, 1, 1], [], []>} : vector<2x16xf32>, vector<16x64xf32>, vector<2x64xf32> -> vector<2x64xf32>
    %233 = arith.addf %213, %232 : vector<2x64xf32>
    %234 = vector.extract_strided_slice %233 {offsets = [0, 0], sizes = [2, 48], strides = [1, 1]} : vector<2x64xf32> to vector<2x48xf32>
    %235 = arith.negf %234 : vector<2x48xf32>
    %236 = math.exp %235 : vector<2x48xf32>
    %cst_48 = arith.constant 1.000000e+00 : f32
    %237 = vector.broadcast %cst_48 : f32 to vector<2x48xf32>
    %238 = arith.addf %237, %236 : vector<2x48xf32>
    %239 = arith.divf %237, %238 : vector<2x48xf32>
    %240 = vector.extract_strided_slice %233 {offsets = [0, 48], sizes = [2, 16], strides = [1, 1]} : vector<2x64xf32> to vector<2x16xf32>
    %241 = math.tanh %240 : vector<2x16xf32>
    %242 = vector.extract_strided_slice %239 {offsets = [0, 16], sizes = [2, 16], strides = [1, 1]} : vector<2x48xf32> to vector<2x16xf32>
    %243 = arith.mulf %242, %206 : vector<2x16xf32>
    %244 = vector.extract_strided_slice %239 {offsets = [0, 0], sizes = [2, 16], strides = [1, 1]} : vector<2x48xf32> to vector<2x16xf32>
    %245 = arith.mulf %244, %241 : vector<2x16xf32>
    %246 = arith.addf %243, %245 : vector<2x16xf32>
    %247 = vector.extract_strided_slice %239 {offsets = [0, 32], sizes = [2, 16], strides = [1, 1]} : vector<2x48xf32> to vector<2x16xf32>
    %248 = math.tanh %246 : vector<2x16xf32>
    %249 = arith.mulf %247, %248 : vector<2x16xf32>
    %c10_49 = arith.constant 10 : index
    %c0_50 = arith.constant 0 : index
    %250 = vector.load %arg5[%c10_49, %c0_50] : memref<16x32xf32, #tpu.memory_space<vmem>>, vector<2x16xf32>
    tpu.vector_store %arg5[%c10_49, %c0_50], %231 {strides = array<i32>} : memref<16x32xf32, #tpu.memory_space<vmem>>, vector<2x16xf32>,
    %c4_51 = arith.constant 4 : index
    %c16_52 = arith.constant 16 : index
    %251 = vector.load %arg5[%c4_51, %c16_52] : memref<16x32xf32, #tpu.memory_space<vmem>>, vector<2x16xf32>
    tpu.vector_store %arg5[%c4_51, %c16_52], %249 {strides = array<i32>} : memref<16x32xf32, #tpu.memory_space<vmem>>, vector<2x16xf32>,
    %252 = vector.extract_strided_slice %5 {offsets = [12, 0], sizes = [2, 64], strides = [1, 1]} : vector<16x128xf32> to vector<2x64xf32>
    %253 = vector.extract_strided_slice %5 {offsets = [2, 64], sizes = [2, 64], strides = [1, 1]} : vector<16x128xf32> to vector<2x64xf32>
    %cst_53 = arith.constant dense<0.000000e+00> : vector<2x64xf32>
    %254 = tpu.matmul %231, %6, %cst_53 {dimension_numbers = #tpu.dot_dimension_numbers<[1], [0], [0], [1], [0, 0, 1, 1], [], []>} : vector<2x16xf32>, vector<16x64xf32>, vector<2x64xf32> -> vector<2x64xf32>
    %255 = arith.addf %252, %254 : vector<2x64xf32>
    %256 = vector.extract_strided_slice %255 {offsets = [0, 0], sizes = [2, 48], strides = [1, 1]} : vector<2x64xf32> to vector<2x48xf32>
    %257 = arith.negf %256 : vector<2x48xf32>
    %258 = math.exp %257 : vector<2x48xf32>
    %cst_54 = arith.constant 1.000000e+00 : f32
    %259 = vector.broadcast %cst_54 : f32 to vector<2x48xf32>
    %260 = arith.addf %259, %258 : vector<2x48xf32>
    %261 = arith.divf %259, %260 : vector<2x48xf32>
    %262 = vector.extract_strided_slice %255 {offsets = [0, 48], sizes = [2, 16], strides = [1, 1]} : vector<2x64xf32> to vector<2x16xf32>
    %263 = math.tanh %262 : vector<2x16xf32>
    %264 = vector.extract_strided_slice %261 {offsets = [0, 16], sizes = [2, 16], strides = [1, 1]} : vector<2x48xf32> to vector<2x16xf32>
    %265 = arith.mulf %264, %228 : vector<2x16xf32>
    %266 = vector.extract_strided_slice %261 {offsets = [0, 0], sizes = [2, 16], strides = [1, 1]} : vector<2x48xf32> to vector<2x16xf32>
    %267 = arith.mulf %266, %263 : vector<2x16xf32>
    %268 = arith.addf %265, %267 : vector<2x16xf32>
    %269 = vector.extract_strided_slice %261 {offsets = [0, 32], sizes = [2, 16], strides = [1, 1]} : vector<2x48xf32> to vector<2x16xf32>
    %270 = math.tanh %268 : vector<2x16xf32>
    %271 = arith.mulf %269, %270 : vector<2x16xf32>
    %cst_55 = arith.constant dense<0.000000e+00> : vector<2x64xf32>
    %272 = tpu.matmul %249, %7, %cst_55 {dimension_numbers = #tpu.dot_dimension_numbers<[1], [0], [0], [1], [0, 0, 1, 1], [], []>} : vector<2x16xf32>, vector<16x64xf32>, vector<2x64xf32> -> vector<2x64xf32>
    %273 = arith.addf %253, %272 : vector<2x64xf32>
    %274 = vector.extract_strided_slice %273 {offsets = [0, 0], sizes = [2, 48], strides = [1, 1]} : vector<2x64xf32> to vector<2x48xf32>
    %275 = arith.negf %274 : vector<2x48xf32>
    %276 = math.exp %275 : vector<2x48xf32>
    %cst_56 = arith.constant 1.000000e+00 : f32
    %277 = vector.broadcast %cst_56 : f32 to vector<2x48xf32>
    %278 = arith.addf %277, %276 : vector<2x48xf32>
    %279 = arith.divf %277, %278 : vector<2x48xf32>
    %280 = vector.extract_strided_slice %273 {offsets = [0, 48], sizes = [2, 16], strides = [1, 1]} : vector<2x64xf32> to vector<2x16xf32>
    %281 = math.tanh %280 : vector<2x16xf32>
    %282 = vector.extract_strided_slice %279 {offsets = [0, 16], sizes = [2, 16], strides = [1, 1]} : vector<2x48xf32> to vector<2x16xf32>
    %283 = arith.mulf %282, %246 : vector<2x16xf32>
    %284 = vector.extract_strided_slice %279 {offsets = [0, 0], sizes = [2, 16], strides = [1, 1]} : vector<2x48xf32> to vector<2x16xf32>
    %285 = arith.mulf %284, %281 : vector<2x16xf32>
    %286 = arith.addf %283, %285 : vector<2x16xf32>
    %287 = vector.extract_strided_slice %279 {offsets = [0, 32], sizes = [2, 16], strides = [1, 1]} : vector<2x48xf32> to vector<2x16xf32>
    %288 = math.tanh %286 : vector<2x16xf32>
    %289 = arith.mulf %287, %288 : vector<2x16xf32>
    %c12_57 = arith.constant 12 : index
    %c0_58 = arith.constant 0 : index
    %290 = vector.load %arg5[%c12_57, %c0_58] : memref<16x32xf32, #tpu.memory_space<vmem>>, vector<2x16xf32>
    tpu.vector_store %arg5[%c12_57, %c0_58], %271 {strides = array<i32>} : memref<16x32xf32, #tpu.memory_space<vmem>>, vector<2x16xf32>,
    %c2_59 = arith.constant 2 : index
    %c16_60 = arith.constant 16 : index
    %291 = vector.load %arg5[%c2_59, %c16_60] : memref<16x32xf32, #tpu.memory_space<vmem>>, vector<2x16xf32>
    tpu.vector_store %arg5[%c2_59, %c16_60], %289 {strides = array<i32>} : memref<16x32xf32, #tpu.memory_space<vmem>>, vector<2x16xf32>,
    %292 = vector.extract_strided_slice %5 {offsets = [14, 0], sizes = [2, 64], strides = [1, 1]} : vector<16x128xf32> to vector<2x64xf32>
    %293 = vector.extract_strided_slice %5 {offsets = [0, 64], sizes = [2, 64], strides = [1, 1]} : vector<16x128xf32> to vector<2x64xf32>
    %cst_61 = arith.constant dense<0.000000e+00> : vector<2x64xf32>
    %294 = tpu.matmul %271, %6, %cst_61 {dimension_numbers = #tpu.dot_dimension_numbers<[1], [0], [0], [1], [0, 0, 1, 1], [], []>} : vector<2x16xf32>, vector<16x64xf32>, vector<2x64xf32> -> vector<2x64xf32>
    %295 = arith.addf %292, %294 : vector<2x64xf32>
    %296 = vector.extract_strided_slice %295 {offsets = [0, 0], sizes = [2, 48], strides = [1, 1]} : vector<2x64xf32> to vector<2x48xf32>
    %297 = arith.negf %296 : vector<2x48xf32>
    %298 = math.exp %297 : vector<2x48xf32>
    %cst_62 = arith.constant 1.000000e+00 : f32
    %299 = vector.broadcast %cst_62 : f32 to vector<2x48xf32>
    %300 = arith.addf %299, %298 : vector<2x48xf32>
    %301 = arith.divf %299, %300 : vector<2x48xf32>
    %302 = vector.extract_strided_slice %295 {offsets = [0, 48], sizes = [2, 16], strides = [1, 1]} : vector<2x64xf32> to vector<2x16xf32>
    %303 = math.tanh %302 : vector<2x16xf32>
    %304 = vector.extract_strided_slice %301 {offsets = [0, 16], sizes = [2, 16], strides = [1, 1]} : vector<2x48xf32> to vector<2x16xf32>
    %305 = arith.mulf %304, %268 : vector<2x16xf32>
    %306 = vector.extract_strided_slice %301 {offsets = [0, 0], sizes = [2, 16], strides = [1, 1]} : vector<2x48xf32> to vector<2x16xf32>
    %307 = arith.mulf %306, %303 : vector<2x16xf32>
    %308 = arith.addf %305, %307 : vector<2x16xf32>
    %309 = vector.extract_strided_slice %301 {offsets = [0, 32], sizes = [2, 16], strides = [1, 1]} : vector<2x48xf32> to vector<2x16xf32>
    %310 = math.tanh %308 : vector<2x16xf32>
    %311 = arith.mulf %309, %310 : vector<2x16xf32>
    %cst_63 = arith.constant dense<0.000000e+00> : vector<2x64xf32>
    %312 = tpu.matmul %289, %7, %cst_63 {dimension_numbers = #tpu.dot_dimension_numbers<[1], [0], [0], [1], [0, 0, 1, 1], [], []>} : vector<2x16xf32>, vector<16x64xf32>, vector<2x64xf32> -> vector<2x64xf32>
    %313 = arith.addf %293, %312 : vector<2x64xf32>
    %314 = vector.extract_strided_slice %313 {offsets = [0, 0], sizes = [2, 48], strides = [1, 1]} : vector<2x64xf32> to vector<2x48xf32>
    %315 = arith.negf %314 : vector<2x48xf32>
    %316 = math.exp %315 : vector<2x48xf32>
    %cst_64 = arith.constant 1.000000e+00 : f32
    %317 = vector.broadcast %cst_64 : f32 to vector<2x48xf32>
    %318 = arith.addf %317, %316 : vector<2x48xf32>
    %319 = arith.divf %317, %318 : vector<2x48xf32>
    %320 = vector.extract_strided_slice %313 {offsets = [0, 48], sizes = [2, 16], strides = [1, 1]} : vector<2x64xf32> to vector<2x16xf32>
    %321 = math.tanh %320 : vector<2x16xf32>
    %322 = vector.extract_strided_slice %319 {offsets = [0, 16], sizes = [2, 16], strides = [1, 1]} : vector<2x48xf32> to vector<2x16xf32>
    %323 = arith.mulf %322, %286 : vector<2x16xf32>
    %324 = vector.extract_strided_slice %319 {offsets = [0, 0], sizes = [2, 16], strides = [1, 1]} : vector<2x48xf32> to vector<2x16xf32>
    %325 = arith.mulf %324, %321 : vector<2x16xf32>
    %326 = arith.addf %323, %325 : vector<2x16xf32>
    %327 = vector.extract_strided_slice %319 {offsets = [0, 32], sizes = [2, 16], strides = [1, 1]} : vector<2x48xf32> to vector<2x16xf32>
    %328 = math.tanh %326 : vector<2x16xf32>
    %329 = arith.mulf %327, %328 : vector<2x16xf32>
    %c14_65 = arith.constant 14 : index
    %c0_66 = arith.constant 0 : index
    %330 = vector.load %arg5[%c14_65, %c0_66] : memref<16x32xf32, #tpu.memory_space<vmem>>, vector<2x16xf32>
    tpu.vector_store %arg5[%c14_65, %c0_66], %311 {strides = array<i32>} : memref<16x32xf32, #tpu.memory_space<vmem>>, vector<2x16xf32>,
    %c0_67 = arith.constant 0 : index
    %c16_68 = arith.constant 16 : index
    %331 = vector.load %arg5[%c0_67, %c16_68] : memref<16x32xf32, #tpu.memory_space<vmem>>, vector<2x16xf32>
    tpu.vector_store %arg5[%c0_67, %c16_68], %329 {strides = array<i32>} : memref<16x32xf32, #tpu.memory_space<vmem>>, vector<2x16xf32>,
    %c0_69 = arith.constant 0 : index
    %c0_70 = arith.constant 0 : index
    %332 = vector.load %arg6[%c0_69, %c0_70] : memref<2x16xf32, #tpu.memory_space<vmem>>, vector<2x16xf32>
    tpu.vector_store %arg6[%c0_69, %c0_70], %311 {strides = array<i32>} : memref<2x16xf32, #tpu.memory_space<vmem>>, vector<2x16xf32>,
    %c0_71 = arith.constant 0 : index
    %c0_72 = arith.constant 0 : index
    %333 = vector.load %arg7[%c0_71, %c0_72] : memref<2x16xf32, #tpu.memory_space<vmem>>, vector<2x16xf32>
    tpu.vector_store %arg7[%c0_71, %c0_72], %308 {strides = array<i32>} : memref<2x16xf32, #tpu.memory_space<vmem>>, vector<2x16xf32>,
    %c0_73 = arith.constant 0 : index
    %c0_74 = arith.constant 0 : index
    %334 = vector.load %arg8[%c0_73, %c0_74] : memref<2x16xf32, #tpu.memory_space<vmem>>, vector<2x16xf32>
    tpu.vector_store %arg8[%c0_73, %c0_74], %329 {strides = array<i32>} : memref<2x16xf32, #tpu.memory_space<vmem>>, vector<2x16xf32>,
    %c0_75 = arith.constant 0 : index
    %c0_76 = arith.constant 0 : index
    %335 = vector.load %arg9[%c0_75, %c0_76] : memref<2x16xf32, #tpu.memory_space<vmem>>, vector<2x16xf32>
    tpu.vector_store %arg9[%c0_75, %c0_76], %326 {strides = array<i32>} : memref<2x16xf32, #tpu.memory_space<vmem>>, vector<2x16xf32>,
    return
  }
}

module attributes {stable_mosaic.version = 11 : i64} {
  func.func @_latent_kernel(%arg0: memref<2x128xf32, #tpu.memory_space<vmem>>, %arg1: memref<128x24xf32, #tpu.memory_space<vmem>>, %arg2: memref<1x24xf32, #tpu.memory_space<vmem>>, %arg3: memref<24x64xf32, #tpu.memory_space<vmem>>, %arg4: memref<1x64xf32, #tpu.memory_space<vmem>>, %arg5: memref<2x24xf32, #tpu.memory_space<vmem>>, %arg6: memref<2x64xf32, #tpu.memory_space<vmem>>) attributes {dimension_semantics = [], scalar_prefetch = 0 : i64, scratch_operands = 0 : i64, tpu.core_type = #tpu.core_type<tc>} {
    %c0 = arith.constant 0 : index
    %c0_0 = arith.constant 0 : index
    %0 = vector.load %arg0[%c0, %c0_0] : memref<2x128xf32, #tpu.memory_space<vmem>>, vector<2x128xf32>
    %c0_1 = arith.constant 0 : index
    %c0_2 = arith.constant 0 : index
    %1 = vector.load %arg1[%c0_1, %c0_2] : memref<128x24xf32, #tpu.memory_space<vmem>>, vector<128x24xf32>
    %cst = arith.constant dense<0.000000e+00> : vector<2x24xf32>
    %2 = tpu.matmul %0, %1, %cst {dimension_numbers = #tpu.dot_dimension_numbers<[1], [0], [0], [1], [0, 0, 1, 1], [], []>} : vector<2x128xf32>, vector<128x24xf32>, vector<2x24xf32> -> vector<2x24xf32>
    %c0_3 = arith.constant 0 : index
    %c0_4 = arith.constant 0 : index
    %3 = vector.load %arg2[%c0_3, %c0_4] : memref<1x24xf32, #tpu.memory_space<vmem>>, vector<1x24xf32>
    %4 = vector.broadcast %3 : vector<1x24xf32> to vector<2x24xf32>
    %5 = arith.addf %2, %4 : vector<2x24xf32>
    %cst_5 = arith.constant 0.000000e+00 : f32
    %6 = vector.broadcast %cst_5 : f32 to vector<2x24xf32>
    %7 = arith.maximumf %5, %6 : vector<2x24xf32>
    %c0_6 = arith.constant 0 : index
    %c0_7 = arith.constant 0 : index
    %8 = vector.load %arg5[%c0_6, %c0_7] : memref<2x24xf32, #tpu.memory_space<vmem>>, vector<2x24xf32>
    tpu.vector_store %arg5[%c0_6, %c0_7], %7 {strides = array<i32>} : memref<2x24xf32, #tpu.memory_space<vmem>>, vector<2x24xf32>,
    %c0_8 = arith.constant 0 : index
    %c0_9 = arith.constant 0 : index
    %9 = vector.load %arg3[%c0_8, %c0_9] : memref<24x64xf32, #tpu.memory_space<vmem>>, vector<24x64xf32>
    %cst_10 = arith.constant dense<0.000000e+00> : vector<2x64xf32>
    %10 = tpu.matmul %7, %9, %cst_10 {dimension_numbers = #tpu.dot_dimension_numbers<[1], [0], [0], [1], [0, 0, 1, 1], [], []>} : vector<2x24xf32>, vector<24x64xf32>, vector<2x64xf32> -> vector<2x64xf32>
    %c0_11 = arith.constant 0 : index
    %c0_12 = arith.constant 0 : index
    %11 = vector.load %arg4[%c0_11, %c0_12] : memref<1x64xf32, #tpu.memory_space<vmem>>, vector<1x64xf32>
    %12 = vector.broadcast %11 : vector<1x64xf32> to vector<2x64xf32>
    %13 = arith.addf %10, %12 : vector<2x64xf32>
    %cst_13 = arith.constant 0.000000e+00 : f32
    %14 = vector.broadcast %cst_13 : f32 to vector<2x64xf32>
    %15 = arith.maximumf %13, %14 : vector<2x64xf32>
    %c0_14 = arith.constant 0 : index
    %c0_15 = arith.constant 0 : index
    %16 = vector.load %arg6[%c0_14, %c0_15] : memref<2x64xf32, #tpu.memory_space<vmem>>, vector<2x64xf32>
    tpu.vector_store %arg6[%c0_14, %c0_15], %15 {strides = array<i32>} : memref<2x64xf32, #tpu.memory_space<vmem>>, vector<2x64xf32>,
    return
  }
}

module attributes {stable_mosaic.version = 11 : i64} {
  func.func @_decoder_kernel(%arg0: memref<16x20xf32, #tpu.memory_space<vmem>>, %arg1: memref<20x128xf32, #tpu.memory_space<vmem>>, %arg2: memref<32x128xf32, #tpu.memory_space<vmem>>, %arg3: memref<1x128xf32, #tpu.memory_space<vmem>>, %arg4: memref<64x128xf32, #tpu.memory_space<vmem>>, %arg5: memref<1x128xf32, #tpu.memory_space<vmem>>, %arg6: memref<2x64xf32, #tpu.memory_space<vmem>>, %arg7: memref<32x24xf32, #tpu.memory_space<vmem>>, %arg8: memref<1x24xf32, #tpu.memory_space<vmem>>, %arg9: memref<16x24xf32, #tpu.memory_space<vmem>>, %arg10: memref<16x32xf32, #tpu.memory_space<vmem>>) attributes {dimension_semantics = [], scalar_prefetch = 0 : i64, scratch_operands = 1 : i64, tpu.core_type = #tpu.core_type<tc>} {
    %c0 = arith.constant 0 : index
    %c0_0 = arith.constant 0 : index
    %0 = vector.load %arg0[%c0, %c0_0] : memref<16x20xf32, #tpu.memory_space<vmem>>, vector<16x20xf32>
    %c0_1 = arith.constant 0 : index
    %c0_2 = arith.constant 0 : index
    %1 = vector.load %arg1[%c0_1, %c0_2] : memref<20x128xf32, #tpu.memory_space<vmem>>, vector<20x128xf32>
    %cst = arith.constant dense<0.000000e+00> : vector<16x128xf32>
    %2 = tpu.matmul %0, %1, %cst {dimension_numbers = #tpu.dot_dimension_numbers<[1], [0], [0], [1], [0, 0, 1, 1], [], []>} : vector<16x20xf32>, vector<20x128xf32>, vector<16x128xf32> -> vector<16x128xf32>
    %c0_3 = arith.constant 0 : index
    %c0_4 = arith.constant 0 : index
    %3 = vector.load %arg3[%c0_3, %c0_4] : memref<1x128xf32, #tpu.memory_space<vmem>>, vector<1x128xf32>
    %4 = vector.broadcast %3 : vector<1x128xf32> to vector<16x128xf32>
    %5 = arith.addf %2, %4 : vector<16x128xf32>
    %c0_5 = arith.constant 0 : index
    %c0_6 = arith.constant 0 : index
    %6 = vector.load %arg2[%c0_5, %c0_6] : memref<32x128xf32, #tpu.memory_space<vmem>>, vector<32x128xf32>
    %c0_7 = arith.constant 0 : index
    %c0_8 = arith.constant 0 : index
    %7 = vector.load %arg4[%c0_7, %c0_8] : memref<64x128xf32, #tpu.memory_space<vmem>>, vector<64x128xf32>
    %c0_9 = arith.constant 0 : index
    %c0_10 = arith.constant 0 : index
    %8 = vector.load %arg5[%c0_9, %c0_10] : memref<1x128xf32, #tpu.memory_space<vmem>>, vector<1x128xf32>
    %c0_11 = arith.constant 0 : index
    %c0_12 = arith.constant 0 : index
    %9 = vector.load %arg6[%c0_11, %c0_12] : memref<2x64xf32, #tpu.memory_space<vmem>>, vector<2x32xf32>
    %c0_13 = arith.constant 0 : index
    %c32 = arith.constant 32 : index
    %10 = vector.load %arg6[%c0_13, %c32] : memref<2x64xf32, #tpu.memory_space<vmem>>, vector<2x32xf32>
    %c0_14 = arith.constant 0 : index
    %c0_15 = arith.constant 0 : index
    %11 = vector.load %arg6[%c0_14, %c0_15] : memref<2x64xf32, #tpu.memory_space<vmem>>, vector<2x32xf32>
    %c0_16 = arith.constant 0 : index
    %c32_17 = arith.constant 32 : index
    %12 = vector.load %arg6[%c0_16, %c32_17] : memref<2x64xf32, #tpu.memory_space<vmem>>, vector<2x32xf32>
    %13 = vector.extract_strided_slice %5 {offsets = [0, 0], sizes = [2, 128], strides = [1, 1]} : vector<16x128xf32> to vector<2x128xf32>
    %cst_18 = arith.constant dense<0.000000e+00> : vector<2x128xf32>
    %14 = tpu.matmul %9, %6, %cst_18 {dimension_numbers = #tpu.dot_dimension_numbers<[1], [0], [0], [1], [0, 0, 1, 1], [], []>} : vector<2x32xf32>, vector<32x128xf32>, vector<2x128xf32> -> vector<2x128xf32>
    %15 = arith.addf %13, %14 : vector<2x128xf32>
    %16 = vector.extract_strided_slice %15 {offsets = [0, 0], sizes = [2, 96], strides = [1, 1]} : vector<2x128xf32> to vector<2x96xf32>
    %17 = arith.negf %16 : vector<2x96xf32>
    %18 = math.exp %17 : vector<2x96xf32>
    %cst_19 = arith.constant 1.000000e+00 : f32
    %19 = vector.broadcast %cst_19 : f32 to vector<2x96xf32>
    %20 = arith.addf %19, %18 : vector<2x96xf32>
    %21 = arith.divf %19, %20 : vector<2x96xf32>
    %22 = vector.extract_strided_slice %15 {offsets = [0, 96], sizes = [2, 32], strides = [1, 1]} : vector<2x128xf32> to vector<2x32xf32>
    %23 = math.tanh %22 : vector<2x32xf32>
    %24 = vector.extract_strided_slice %21 {offsets = [0, 32], sizes = [2, 32], strides = [1, 1]} : vector<2x96xf32> to vector<2x32xf32>
    %25 = arith.mulf %24, %10 : vector<2x32xf32>
    %26 = vector.extract_strided_slice %21 {offsets = [0, 0], sizes = [2, 32], strides = [1, 1]} : vector<2x96xf32> to vector<2x32xf32>
    %27 = arith.mulf %26, %23 : vector<2x32xf32>
    %28 = arith.addf %25, %27 : vector<2x32xf32>
    %29 = vector.extract_strided_slice %21 {offsets = [0, 64], sizes = [2, 32], strides = [1, 1]} : vector<2x96xf32> to vector<2x32xf32>
    %30 = math.tanh %28 : vector<2x32xf32>
    %31 = arith.mulf %29, %30 : vector<2x32xf32>
    %32 = tpu.concatenate %31, %11 in 1 : vector<2x32xf32>, vector<2x32xf32> -> vector<2x64xf32>
    %cst_20 = arith.constant dense<0.000000e+00> : vector<2x128xf32>
    %33 = tpu.matmul %32, %7, %cst_20 {dimension_numbers = #tpu.dot_dimension_numbers<[1], [0], [0], [1], [0, 0, 1, 1], [], []>} : vector<2x64xf32>, vector<64x128xf32>, vector<2x128xf32> -> vector<2x128xf32>
    %34 = vector.broadcast %8 : vector<1x128xf32> to vector<2x128xf32>
    %35 = arith.addf %33, %34 : vector<2x128xf32>
    %36 = vector.extract_strided_slice %35 {offsets = [0, 0], sizes = [2, 96], strides = [1, 1]} : vector<2x128xf32> to vector<2x96xf32>
    %37 = arith.negf %36 : vector<2x96xf32>
    %38 = math.exp %37 : vector<2x96xf32>
    %cst_21 = arith.constant 1.000000e+00 : f32
    %39 = vector.broadcast %cst_21 : f32 to vector<2x96xf32>
    %40 = arith.addf %39, %38 : vector<2x96xf32>
    %41 = arith.divf %39, %40 : vector<2x96xf32>
    %42 = vector.extract_strided_slice %35 {offsets = [0, 96], sizes = [2, 32], strides = [1, 1]} : vector<2x128xf32> to vector<2x32xf32>
    %43 = math.tanh %42 : vector<2x32xf32>
    %44 = vector.extract_strided_slice %41 {offsets = [0, 32], sizes = [2, 32], strides = [1, 1]} : vector<2x96xf32> to vector<2x32xf32>
    %45 = arith.mulf %44, %12 : vector<2x32xf32>
    %46 = vector.extract_strided_slice %41 {offsets = [0, 0], sizes = [2, 32], strides = [1, 1]} : vector<2x96xf32> to vector<2x32xf32>
    %47 = arith.mulf %46, %43 : vector<2x32xf32>
    %48 = arith.addf %45, %47 : vector<2x32xf32>
    %49 = vector.extract_strided_slice %41 {offsets = [0, 64], sizes = [2, 32], strides = [1, 1]} : vector<2x96xf32> to vector<2x32xf32>
    %50 = math.tanh %48 : vector<2x32xf32>
    %51 = arith.mulf %49, %50 : vector<2x32xf32>
    %c0_22 = arith.constant 0 : index
    %c0_23 = arith.constant 0 : index
    %52 = vector.load %arg10[%c0_22, %c0_23] : memref<16x32xf32, #tpu.memory_space<vmem>>, vector<2x32xf32>
    tpu.vector_store %arg10[%c0_22, %c0_23], %51 {strides = array<i32>} : memref<16x32xf32, #tpu.memory_space<vmem>>, vector<2x32xf32>,
    %53 = vector.extract_strided_slice %5 {offsets = [2, 0], sizes = [2, 128], strides = [1, 1]} : vector<16x128xf32> to vector<2x128xf32>
    %cst_24 = arith.constant dense<0.000000e+00> : vector<2x128xf32>
    %54 = tpu.matmul %31, %6, %cst_24 {dimension_numbers = #tpu.dot_dimension_numbers<[1], [0], [0], [1], [0, 0, 1, 1], [], []>} : vector<2x32xf32>, vector<32x128xf32>, vector<2x128xf32> -> vector<2x128xf32>
    %55 = arith.addf %53, %54 : vector<2x128xf32>
    %56 = vector.extract_strided_slice %55 {offsets = [0, 0], sizes = [2, 96], strides = [1, 1]} : vector<2x128xf32> to vector<2x96xf32>
    %57 = arith.negf %56 : vector<2x96xf32>
    %58 = math.exp %57 : vector<2x96xf32>
    %cst_25 = arith.constant 1.000000e+00 : f32
    %59 = vector.broadcast %cst_25 : f32 to vector<2x96xf32>
    %60 = arith.addf %59, %58 : vector<2x96xf32>
    %61 = arith.divf %59, %60 : vector<2x96xf32>
    %62 = vector.extract_strided_slice %55 {offsets = [0, 96], sizes = [2, 32], strides = [1, 1]} : vector<2x128xf32> to vector<2x32xf32>
    %63 = math.tanh %62 : vector<2x32xf32>
    %64 = vector.extract_strided_slice %61 {offsets = [0, 32], sizes = [2, 32], strides = [1, 1]} : vector<2x96xf32> to vector<2x32xf32>
    %65 = arith.mulf %64, %28 : vector<2x32xf32>
    %66 = vector.extract_strided_slice %61 {offsets = [0, 0], sizes = [2, 32], strides = [1, 1]} : vector<2x96xf32> to vector<2x32xf32>
    %67 = arith.mulf %66, %63 : vector<2x32xf32>
    %68 = arith.addf %65, %67 : vector<2x32xf32>
    %69 = vector.extract_strided_slice %61 {offsets = [0, 64], sizes = [2, 32], strides = [1, 1]} : vector<2x96xf32> to vector<2x32xf32>
    %70 = math.tanh %68 : vector<2x32xf32>
    %71 = arith.mulf %69, %70 : vector<2x32xf32>
    %72 = tpu.concatenate %71, %51 in 1 : vector<2x32xf32>, vector<2x32xf32> -> vector<2x64xf32>
    %cst_26 = arith.constant dense<0.000000e+00> : vector<2x128xf32>
    %73 = tpu.matmul %72, %7, %cst_26 {dimension_numbers = #tpu.dot_dimension_numbers<[1], [0], [0], [1], [0, 0, 1, 1], [], []>} : vector<2x64xf32>, vector<64x128xf32>, vector<2x128xf32> -> vector<2x128xf32>
    %74 = vector.broadcast %8 : vector<1x128xf32> to vector<2x128xf32>
    %75 = arith.addf %73, %74 : vector<2x128xf32>
    %76 = vector.extract_strided_slice %75 {offsets = [0, 0], sizes = [2, 96], strides = [1, 1]} : vector<2x128xf32> to vector<2x96xf32>
    %77 = arith.negf %76 : vector<2x96xf32>
    %78 = math.exp %77 : vector<2x96xf32>
    %cst_27 = arith.constant 1.000000e+00 : f32
    %79 = vector.broadcast %cst_27 : f32 to vector<2x96xf32>
    %80 = arith.addf %79, %78 : vector<2x96xf32>
    %81 = arith.divf %79, %80 : vector<2x96xf32>
    %82 = vector.extract_strided_slice %75 {offsets = [0, 96], sizes = [2, 32], strides = [1, 1]} : vector<2x128xf32> to vector<2x32xf32>
    %83 = math.tanh %82 : vector<2x32xf32>
    %84 = vector.extract_strided_slice %81 {offsets = [0, 32], sizes = [2, 32], strides = [1, 1]} : vector<2x96xf32> to vector<2x32xf32>
    %85 = arith.mulf %84, %48 : vector<2x32xf32>
    %86 = vector.extract_strided_slice %81 {offsets = [0, 0], sizes = [2, 32], strides = [1, 1]} : vector<2x96xf32> to vector<2x32xf32>
    %87 = arith.mulf %86, %83 : vector<2x32xf32>
    %88 = arith.addf %85, %87 : vector<2x32xf32>
    %89 = vector.extract_strided_slice %81 {offsets = [0, 64], sizes = [2, 32], strides = [1, 1]} : vector<2x96xf32> to vector<2x32xf32>
    %90 = math.tanh %88 : vector<2x32xf32>
    %91 = arith.mulf %89, %90 : vector<2x32xf32>
    %c2 = arith.constant 2 : index
    %c0_28 = arith.constant 0 : index
    %92 = vector.load %arg10[%c2, %c0_28] : memref<16x32xf32, #tpu.memory_space<vmem>>, vector<2x32xf32>
    tpu.vector_store %arg10[%c2, %c0_28], %91 {strides = array<i32>} : memref<16x32xf32, #tpu.memory_space<vmem>>, vector<2x32xf32>,
    %93 = vector.extract_strided_slice %5 {offsets = [4, 0], sizes = [2, 128], strides = [1, 1]} : vector<16x128xf32> to vector<2x128xf32>
    %cst_29 = arith.constant dense<0.000000e+00> : vector<2x128xf32>
    %94 = tpu.matmul %71, %6, %cst_29 {dimension_numbers = #tpu.dot_dimension_numbers<[1], [0], [0], [1], [0, 0, 1, 1], [], []>} : vector<2x32xf32>, vector<32x128xf32>, vector<2x128xf32> -> vector<2x128xf32>
    %95 = arith.addf %93, %94 : vector<2x128xf32>
    %96 = vector.extract_strided_slice %95 {offsets = [0, 0], sizes = [2, 96], strides = [1, 1]} : vector<2x128xf32> to vector<2x96xf32>
    %97 = arith.negf %96 : vector<2x96xf32>
    %98 = math.exp %97 : vector<2x96xf32>
    %cst_30 = arith.constant 1.000000e+00 : f32
    %99 = vector.broadcast %cst_30 : f32 to vector<2x96xf32>
    %100 = arith.addf %99, %98 : vector<2x96xf32>
    %101 = arith.divf %99, %100 : vector<2x96xf32>
    %102 = vector.extract_strided_slice %95 {offsets = [0, 96], sizes = [2, 32], strides = [1, 1]} : vector<2x128xf32> to vector<2x32xf32>
    %103 = math.tanh %102 : vector<2x32xf32>
    %104 = vector.extract_strided_slice %101 {offsets = [0, 32], sizes = [2, 32], strides = [1, 1]} : vector<2x96xf32> to vector<2x32xf32>
    %105 = arith.mulf %104, %68 : vector<2x32xf32>
    %106 = vector.extract_strided_slice %101 {offsets = [0, 0], sizes = [2, 32], strides = [1, 1]} : vector<2x96xf32> to vector<2x32xf32>
    %107 = arith.mulf %106, %103 : vector<2x32xf32>
    %108 = arith.addf %105, %107 : vector<2x32xf32>
    %109 = vector.extract_strided_slice %101 {offsets = [0, 64], sizes = [2, 32], strides = [1, 1]} : vector<2x96xf32> to vector<2x32xf32>
    %110 = math.tanh %108 : vector<2x32xf32>
    %111 = arith.mulf %109, %110 : vector<2x32xf32>
    %112 = tpu.concatenate %111, %91 in 1 : vector<2x32xf32>, vector<2x32xf32> -> vector<2x64xf32>
    %cst_31 = arith.constant dense<0.000000e+00> : vector<2x128xf32>
    %113 = tpu.matmul %112, %7, %cst_31 {dimension_numbers = #tpu.dot_dimension_numbers<[1], [0], [0], [1], [0, 0, 1, 1], [], []>} : vector<2x64xf32>, vector<64x128xf32>, vector<2x128xf32> -> vector<2x128xf32>
    %114 = vector.broadcast %8 : vector<1x128xf32> to vector<2x128xf32>
    %115 = arith.addf %113, %114 : vector<2x128xf32>
    %116 = vector.extract_strided_slice %115 {offsets = [0, 0], sizes = [2, 96], strides = [1, 1]} : vector<2x128xf32> to vector<2x96xf32>
    %117 = arith.negf %116 : vector<2x96xf32>
    %118 = math.exp %117 : vector<2x96xf32>
    %cst_32 = arith.constant 1.000000e+00 : f32
    %119 = vector.broadcast %cst_32 : f32 to vector<2x96xf32>
    %120 = arith.addf %119, %118 : vector<2x96xf32>
    %121 = arith.divf %119, %120 : vector<2x96xf32>
    %122 = vector.extract_strided_slice %115 {offsets = [0, 96], sizes = [2, 32], strides = [1, 1]} : vector<2x128xf32> to vector<2x32xf32>
    %123 = math.tanh %122 : vector<2x32xf32>
    %124 = vector.extract_strided_slice %121 {offsets = [0, 32], sizes = [2, 32], strides = [1, 1]} : vector<2x96xf32> to vector<2x32xf32>
    %125 = arith.mulf %124, %88 : vector<2x32xf32>
    %126 = vector.extract_strided_slice %121 {offsets = [0, 0], sizes = [2, 32], strides = [1, 1]} : vector<2x96xf32> to vector<2x32xf32>
    %127 = arith.mulf %126, %123 : vector<2x32xf32>
    %128 = arith.addf %125, %127 : vector<2x32xf32>
    %129 = vector.extract_strided_slice %121 {offsets = [0, 64], sizes = [2, 32], strides = [1, 1]} : vector<2x96xf32> to vector<2x32xf32>
    %130 = math.tanh %128 : vector<2x32xf32>
    %131 = arith.mulf %129, %130 : vector<2x32xf32>
    %c4 = arith.constant 4 : index
    %c0_33 = arith.constant 0 : index
    %132 = vector.load %arg10[%c4, %c0_33] : memref<16x32xf32, #tpu.memory_space<vmem>>, vector<2x32xf32>
    tpu.vector_store %arg10[%c4, %c0_33], %131 {strides = array<i32>} : memref<16x32xf32, #tpu.memory_space<vmem>>, vector<2x32xf32>,
    %133 = vector.extract_strided_slice %5 {offsets = [6, 0], sizes = [2, 128], strides = [1, 1]} : vector<16x128xf32> to vector<2x128xf32>
    %cst_34 = arith.constant dense<0.000000e+00> : vector<2x128xf32>
    %134 = tpu.matmul %111, %6, %cst_34 {dimension_numbers = #tpu.dot_dimension_numbers<[1], [0], [0], [1], [0, 0, 1, 1], [], []>} : vector<2x32xf32>, vector<32x128xf32>, vector<2x128xf32> -> vector<2x128xf32>
    %135 = arith.addf %133, %134 : vector<2x128xf32>
    %136 = vector.extract_strided_slice %135 {offsets = [0, 0], sizes = [2, 96], strides = [1, 1]} : vector<2x128xf32> to vector<2x96xf32>
    %137 = arith.negf %136 : vector<2x96xf32>
    %138 = math.exp %137 : vector<2x96xf32>
    %cst_35 = arith.constant 1.000000e+00 : f32
    %139 = vector.broadcast %cst_35 : f32 to vector<2x96xf32>
    %140 = arith.addf %139, %138 : vector<2x96xf32>
    %141 = arith.divf %139, %140 : vector<2x96xf32>
    %142 = vector.extract_strided_slice %135 {offsets = [0, 96], sizes = [2, 32], strides = [1, 1]} : vector<2x128xf32> to vector<2x32xf32>
    %143 = math.tanh %142 : vector<2x32xf32>
    %144 = vector.extract_strided_slice %141 {offsets = [0, 32], sizes = [2, 32], strides = [1, 1]} : vector<2x96xf32> to vector<2x32xf32>
    %145 = arith.mulf %144, %108 : vector<2x32xf32>
    %146 = vector.extract_strided_slice %141 {offsets = [0, 0], sizes = [2, 32], strides = [1, 1]} : vector<2x96xf32> to vector<2x32xf32>
    %147 = arith.mulf %146, %143 : vector<2x32xf32>
    %148 = arith.addf %145, %147 : vector<2x32xf32>
    %149 = vector.extract_strided_slice %141 {offsets = [0, 64], sizes = [2, 32], strides = [1, 1]} : vector<2x96xf32> to vector<2x32xf32>
    %150 = math.tanh %148 : vector<2x32xf32>
    %151 = arith.mulf %149, %150 : vector<2x32xf32>
    %152 = tpu.concatenate %151, %131 in 1 : vector<2x32xf32>, vector<2x32xf32> -> vector<2x64xf32>
    %cst_36 = arith.constant dense<0.000000e+00> : vector<2x128xf32>
    %153 = tpu.matmul %152, %7, %cst_36 {dimension_numbers = #tpu.dot_dimension_numbers<[1], [0], [0], [1], [0, 0, 1, 1], [], []>} : vector<2x64xf32>, vector<64x128xf32>, vector<2x128xf32> -> vector<2x128xf32>
    %154 = vector.broadcast %8 : vector<1x128xf32> to vector<2x128xf32>
    %155 = arith.addf %153, %154 : vector<2x128xf32>
    %156 = vector.extract_strided_slice %155 {offsets = [0, 0], sizes = [2, 96], strides = [1, 1]} : vector<2x128xf32> to vector<2x96xf32>
    %157 = arith.negf %156 : vector<2x96xf32>
    %158 = math.exp %157 : vector<2x96xf32>
    %cst_37 = arith.constant 1.000000e+00 : f32
    %159 = vector.broadcast %cst_37 : f32 to vector<2x96xf32>
    %160 = arith.addf %159, %158 : vector<2x96xf32>
    %161 = arith.divf %159, %160 : vector<2x96xf32>
    %162 = vector.extract_strided_slice %155 {offsets = [0, 96], sizes = [2, 32], strides = [1, 1]} : vector<2x128xf32> to vector<2x32xf32>
    %163 = math.tanh %162 : vector<2x32xf32>
    %164 = vector.extract_strided_slice %161 {offsets = [0, 32], sizes = [2, 32], strides = [1, 1]} : vector<2x96xf32> to vector<2x32xf32>
    %165 = arith.mulf %164, %128 : vector<2x32xf32>
    %166 = vector.extract_strided_slice %161 {offsets = [0, 0], sizes = [2, 32], strides = [1, 1]} : vector<2x96xf32> to vector<2x32xf32>
    %167 = arith.mulf %166, %163 : vector<2x32xf32>
    %168 = arith.addf %165, %167 : vector<2x32xf32>
    %169 = vector.extract_strided_slice %161 {offsets = [0, 64], sizes = [2, 32], strides = [1, 1]} : vector<2x96xf32> to vector<2x32xf32>
    %170 = math.tanh %168 : vector<2x32xf32>
    %171 = arith.mulf %169, %170 : vector<2x32xf32>
    %c6 = arith.constant 6 : index
    %c0_38 = arith.constant 0 : index
    %172 = vector.load %arg10[%c6, %c0_38] : memref<16x32xf32, #tpu.memory_space<vmem>>, vector<2x32xf32>
    tpu.vector_store %arg10[%c6, %c0_38], %171 {strides = array<i32>} : memref<16x32xf32, #tpu.memory_space<vmem>>, vector<2x32xf32>,
    %173 = vector.extract_strided_slice %5 {offsets = [8, 0], sizes = [2, 128], strides = [1, 1]} : vector<16x128xf32> to vector<2x128xf32>
    %cst_39 = arith.constant dense<0.000000e+00> : vector<2x128xf32>
    %174 = tpu.matmul %151, %6, %cst_39 {dimension_numbers = #tpu.dot_dimension_numbers<[1], [0], [0], [1], [0, 0, 1, 1], [], []>} : vector<2x32xf32>, vector<32x128xf32>, vector<2x128xf32> -> vector<2x128xf32>
    %175 = arith.addf %173, %174 : vector<2x128xf32>
    %176 = vector.extract_strided_slice %175 {offsets = [0, 0], sizes = [2, 96], strides = [1, 1]} : vector<2x128xf32> to vector<2x96xf32>
    %177 = arith.negf %176 : vector<2x96xf32>
    %178 = math.exp %177 : vector<2x96xf32>
    %cst_40 = arith.constant 1.000000e+00 : f32
    %179 = vector.broadcast %cst_40 : f32 to vector<2x96xf32>
    %180 = arith.addf %179, %178 : vector<2x96xf32>
    %181 = arith.divf %179, %180 : vector<2x96xf32>
    %182 = vector.extract_strided_slice %175 {offsets = [0, 96], sizes = [2, 32], strides = [1, 1]} : vector<2x128xf32> to vector<2x32xf32>
    %183 = math.tanh %182 : vector<2x32xf32>
    %184 = vector.extract_strided_slice %181 {offsets = [0, 32], sizes = [2, 32], strides = [1, 1]} : vector<2x96xf32> to vector<2x32xf32>
    %185 = arith.mulf %184, %148 : vector<2x32xf32>
    %186 = vector.extract_strided_slice %181 {offsets = [0, 0], sizes = [2, 32], strides = [1, 1]} : vector<2x96xf32> to vector<2x32xf32>
    %187 = arith.mulf %186, %183 : vector<2x32xf32>
    %188 = arith.addf %185, %187 : vector<2x32xf32>
    %189 = vector.extract_strided_slice %181 {offsets = [0, 64], sizes = [2, 32], strides = [1, 1]} : vector<2x96xf32> to vector<2x32xf32>
    %190 = math.tanh %188 : vector<2x32xf32>
    %191 = arith.mulf %189, %190 : vector<2x32xf32>
    %192 = tpu.concatenate %191, %171 in 1 : vector<2x32xf32>, vector<2x32xf32> -> vector<2x64xf32>
    %cst_41 = arith.constant dense<0.000000e+00> : vector<2x128xf32>
    %193 = tpu.matmul %192, %7, %cst_41 {dimension_numbers = #tpu.dot_dimension_numbers<[1], [0], [0], [1], [0, 0, 1, 1], [], []>} : vector<2x64xf32>, vector<64x128xf32>, vector<2x128xf32> -> vector<2x128xf32>
    %194 = vector.broadcast %8 : vector<1x128xf32> to vector<2x128xf32>
    %195 = arith.addf %193, %194 : vector<2x128xf32>
    %196 = vector.extract_strided_slice %195 {offsets = [0, 0], sizes = [2, 96], strides = [1, 1]} : vector<2x128xf32> to vector<2x96xf32>
    %197 = arith.negf %196 : vector<2x96xf32>
    %198 = math.exp %197 : vector<2x96xf32>
    %cst_42 = arith.constant 1.000000e+00 : f32
    %199 = vector.broadcast %cst_42 : f32 to vector<2x96xf32>
    %200 = arith.addf %199, %198 : vector<2x96xf32>
    %201 = arith.divf %199, %200 : vector<2x96xf32>
    %202 = vector.extract_strided_slice %195 {offsets = [0, 96], sizes = [2, 32], strides = [1, 1]} : vector<2x128xf32> to vector<2x32xf32>
    %203 = math.tanh %202 : vector<2x32xf32>
    %204 = vector.extract_strided_slice %201 {offsets = [0, 32], sizes = [2, 32], strides = [1, 1]} : vector<2x96xf32> to vector<2x32xf32>
    %205 = arith.mulf %204, %168 : vector<2x32xf32>
    %206 = vector.extract_strided_slice %201 {offsets = [0, 0], sizes = [2, 32], strides = [1, 1]} : vector<2x96xf32> to vector<2x32xf32>
    %207 = arith.mulf %206, %203 : vector<2x32xf32>
    %208 = arith.addf %205, %207 : vector<2x32xf32>
    %209 = vector.extract_strided_slice %201 {offsets = [0, 64], sizes = [2, 32], strides = [1, 1]} : vector<2x96xf32> to vector<2x32xf32>
    %210 = math.tanh %208 : vector<2x32xf32>
    %211 = arith.mulf %209, %210 : vector<2x32xf32>
    %c8 = arith.constant 8 : index
    %c0_43 = arith.constant 0 : index
    %212 = vector.load %arg10[%c8, %c0_43] : memref<16x32xf32, #tpu.memory_space<vmem>>, vector<2x32xf32>
    tpu.vector_store %arg10[%c8, %c0_43], %211 {strides = array<i32>} : memref<16x32xf32, #tpu.memory_space<vmem>>, vector<2x32xf32>,
    %213 = vector.extract_strided_slice %5 {offsets = [10, 0], sizes = [2, 128], strides = [1, 1]} : vector<16x128xf32> to vector<2x128xf32>
    %cst_44 = arith.constant dense<0.000000e+00> : vector<2x128xf32>
    %214 = tpu.matmul %191, %6, %cst_44 {dimension_numbers = #tpu.dot_dimension_numbers<[1], [0], [0], [1], [0, 0, 1, 1], [], []>} : vector<2x32xf32>, vector<32x128xf32>, vector<2x128xf32> -> vector<2x128xf32>
    %215 = arith.addf %213, %214 : vector<2x128xf32>
    %216 = vector.extract_strided_slice %215 {offsets = [0, 0], sizes = [2, 96], strides = [1, 1]} : vector<2x128xf32> to vector<2x96xf32>
    %217 = arith.negf %216 : vector<2x96xf32>
    %218 = math.exp %217 : vector<2x96xf32>
    %cst_45 = arith.constant 1.000000e+00 : f32
    %219 = vector.broadcast %cst_45 : f32 to vector<2x96xf32>
    %220 = arith.addf %219, %218 : vector<2x96xf32>
    %221 = arith.divf %219, %220 : vector<2x96xf32>
    %222 = vector.extract_strided_slice %215 {offsets = [0, 96], sizes = [2, 32], strides = [1, 1]} : vector<2x128xf32> to vector<2x32xf32>
    %223 = math.tanh %222 : vector<2x32xf32>
    %224 = vector.extract_strided_slice %221 {offsets = [0, 32], sizes = [2, 32], strides = [1, 1]} : vector<2x96xf32> to vector<2x32xf32>
    %225 = arith.mulf %224, %188 : vector<2x32xf32>
    %226 = vector.extract_strided_slice %221 {offsets = [0, 0], sizes = [2, 32], strides = [1, 1]} : vector<2x96xf32> to vector<2x32xf32>
    %227 = arith.mulf %226, %223 : vector<2x32xf32>
    %228 = arith.addf %225, %227 : vector<2x32xf32>
    %229 = vector.extract_strided_slice %221 {offsets = [0, 64], sizes = [2, 32], strides = [1, 1]} : vector<2x96xf32> to vector<2x32xf32>
    %230 = math.tanh %228 : vector<2x32xf32>
    %231 = arith.mulf %229, %230 : vector<2x32xf32>
    %232 = tpu.concatenate %231, %211 in 1 : vector<2x32xf32>, vector<2x32xf32> -> vector<2x64xf32>
    %cst_46 = arith.constant dense<0.000000e+00> : vector<2x128xf32>
    %233 = tpu.matmul %232, %7, %cst_46 {dimension_numbers = #tpu.dot_dimension_numbers<[1], [0], [0], [1], [0, 0, 1, 1], [], []>} : vector<2x64xf32>, vector<64x128xf32>, vector<2x128xf32> -> vector<2x128xf32>
    %234 = vector.broadcast %8 : vector<1x128xf32> to vector<2x128xf32>
    %235 = arith.addf %233, %234 : vector<2x128xf32>
    %236 = vector.extract_strided_slice %235 {offsets = [0, 0], sizes = [2, 96], strides = [1, 1]} : vector<2x128xf32> to vector<2x96xf32>
    %237 = arith.negf %236 : vector<2x96xf32>
    %238 = math.exp %237 : vector<2x96xf32>
    %cst_47 = arith.constant 1.000000e+00 : f32
    %239 = vector.broadcast %cst_47 : f32 to vector<2x96xf32>
    %240 = arith.addf %239, %238 : vector<2x96xf32>
    %241 = arith.divf %239, %240 : vector<2x96xf32>
    %242 = vector.extract_strided_slice %235 {offsets = [0, 96], sizes = [2, 32], strides = [1, 1]} : vector<2x128xf32> to vector<2x32xf32>
    %243 = math.tanh %242 : vector<2x32xf32>
    %244 = vector.extract_strided_slice %241 {offsets = [0, 32], sizes = [2, 32], strides = [1, 1]} : vector<2x96xf32> to vector<2x32xf32>
    %245 = arith.mulf %244, %208 : vector<2x32xf32>
    %246 = vector.extract_strided_slice %241 {offsets = [0, 0], sizes = [2, 32], strides = [1, 1]} : vector<2x96xf32> to vector<2x32xf32>
    %247 = arith.mulf %246, %243 : vector<2x32xf32>
    %248 = arith.addf %245, %247 : vector<2x32xf32>
    %249 = vector.extract_strided_slice %241 {offsets = [0, 64], sizes = [2, 32], strides = [1, 1]} : vector<2x96xf32> to vector<2x32xf32>
    %250 = math.tanh %248 : vector<2x32xf32>
    %251 = arith.mulf %249, %250 : vector<2x32xf32>
    %c10 = arith.constant 10 : index
    %c0_48 = arith.constant 0 : index
    %252 = vector.load %arg10[%c10, %c0_48] : memref<16x32xf32, #tpu.memory_space<vmem>>, vector<2x32xf32>
    tpu.vector_store %arg10[%c10, %c0_48], %251 {strides = array<i32>} : memref<16x32xf32, #tpu.memory_space<vmem>>, vector<2x32xf32>,
    %253 = vector.extract_strided_slice %5 {offsets = [12, 0], sizes = [2, 128], strides = [1, 1]} : vector<16x128xf32> to vector<2x128xf32>
    %cst_49 = arith.constant dense<0.000000e+00> : vector<2x128xf32>
    %254 = tpu.matmul %231, %6, %cst_49 {dimension_numbers = #tpu.dot_dimension_numbers<[1], [0], [0], [1], [0, 0, 1, 1], [], []>} : vector<2x32xf32>, vector<32x128xf32>, vector<2x128xf32> -> vector<2x128xf32>
    %255 = arith.addf %253, %254 : vector<2x128xf32>
    %256 = vector.extract_strided_slice %255 {offsets = [0, 0], sizes = [2, 96], strides = [1, 1]} : vector<2x128xf32> to vector<2x96xf32>
    %257 = arith.negf %256 : vector<2x96xf32>
    %258 = math.exp %257 : vector<2x96xf32>
    %cst_50 = arith.constant 1.000000e+00 : f32
    %259 = vector.broadcast %cst_50 : f32 to vector<2x96xf32>
    %260 = arith.addf %259, %258 : vector<2x96xf32>
    %261 = arith.divf %259, %260 : vector<2x96xf32>
    %262 = vector.extract_strided_slice %255 {offsets = [0, 96], sizes = [2, 32], strides = [1, 1]} : vector<2x128xf32> to vector<2x32xf32>
    %263 = math.tanh %262 : vector<2x32xf32>
    %264 = vector.extract_strided_slice %261 {offsets = [0, 32], sizes = [2, 32], strides = [1, 1]} : vector<2x96xf32> to vector<2x32xf32>
    %265 = arith.mulf %264, %228 : vector<2x32xf32>
    %266 = vector.extract_strided_slice %261 {offsets = [0, 0], sizes = [2, 32], strides = [1, 1]} : vector<2x96xf32> to vector<2x32xf32>
    %267 = arith.mulf %266, %263 : vector<2x32xf32>
    %268 = arith.addf %265, %267 : vector<2x32xf32>
    %269 = vector.extract_strided_slice %261 {offsets = [0, 64], sizes = [2, 32], strides = [1, 1]} : vector<2x96xf32> to vector<2x32xf32>
    %270 = math.tanh %268 : vector<2x32xf32>
    %271 = arith.mulf %269, %270 : vector<2x32xf32>
    %272 = tpu.concatenate %271, %251 in 1 : vector<2x32xf32>, vector<2x32xf32> -> vector<2x64xf32>
    %cst_51 = arith.constant dense<0.000000e+00> : vector<2x128xf32>
    %273 = tpu.matmul %272, %7, %cst_51 {dimension_numbers = #tpu.dot_dimension_numbers<[1], [0], [0], [1], [0, 0, 1, 1], [], []>} : vector<2x64xf32>, vector<64x128xf32>, vector<2x128xf32> -> vector<2x128xf32>
    %274 = vector.broadcast %8 : vector<1x128xf32> to vector<2x128xf32>
    %275 = arith.addf %273, %274 : vector<2x128xf32>
    %276 = vector.extract_strided_slice %275 {offsets = [0, 0], sizes = [2, 96], strides = [1, 1]} : vector<2x128xf32> to vector<2x96xf32>
    %277 = arith.negf %276 : vector<2x96xf32>
    %278 = math.exp %277 : vector<2x96xf32>
    %cst_52 = arith.constant 1.000000e+00 : f32
    %279 = vector.broadcast %cst_52 : f32 to vector<2x96xf32>
    %280 = arith.addf %279, %278 : vector<2x96xf32>
    %281 = arith.divf %279, %280 : vector<2x96xf32>
    %282 = vector.extract_strided_slice %275 {offsets = [0, 96], sizes = [2, 32], strides = [1, 1]} : vector<2x128xf32> to vector<2x32xf32>
    %283 = math.tanh %282 : vector<2x32xf32>
    %284 = vector.extract_strided_slice %281 {offsets = [0, 32], sizes = [2, 32], strides = [1, 1]} : vector<2x96xf32> to vector<2x32xf32>
    %285 = arith.mulf %284, %248 : vector<2x32xf32>
    %286 = vector.extract_strided_slice %281 {offsets = [0, 0], sizes = [2, 32], strides = [1, 1]} : vector<2x96xf32> to vector<2x32xf32>
    %287 = arith.mulf %286, %283 : vector<2x32xf32>
    %288 = arith.addf %285, %287 : vector<2x32xf32>
    %289 = vector.extract_strided_slice %281 {offsets = [0, 64], sizes = [2, 32], strides = [1, 1]} : vector<2x96xf32> to vector<2x32xf32>
    %290 = math.tanh %288 : vector<2x32xf32>
    %291 = arith.mulf %289, %290 : vector<2x32xf32>
    %c12 = arith.constant 12 : index
    %c0_53 = arith.constant 0 : index
    %292 = vector.load %arg10[%c12, %c0_53] : memref<16x32xf32, #tpu.memory_space<vmem>>, vector<2x32xf32>
    tpu.vector_store %arg10[%c12, %c0_53], %291 {strides = array<i32>} : memref<16x32xf32, #tpu.memory_space<vmem>>, vector<2x32xf32>,
    %293 = vector.extract_strided_slice %5 {offsets = [14, 0], sizes = [2, 128], strides = [1, 1]} : vector<16x128xf32> to vector<2x128xf32>
    %cst_54 = arith.constant dense<0.000000e+00> : vector<2x128xf32>
    %294 = tpu.matmul %271, %6, %cst_54 {dimension_numbers = #tpu.dot_dimension_numbers<[1], [0], [0], [1], [0, 0, 1, 1], [], []>} : vector<2x32xf32>, vector<32x128xf32>, vector<2x128xf32> -> vector<2x128xf32>
    %295 = arith.addf %293, %294 : vector<2x128xf32>
    %296 = vector.extract_strided_slice %295 {offsets = [0, 0], sizes = [2, 96], strides = [1, 1]} : vector<2x128xf32> to vector<2x96xf32>
    %297 = arith.negf %296 : vector<2x96xf32>
    %298 = math.exp %297 : vector<2x96xf32>
    %cst_55 = arith.constant 1.000000e+00 : f32
    %299 = vector.broadcast %cst_55 : f32 to vector<2x96xf32>
    %300 = arith.addf %299, %298 : vector<2x96xf32>
    %301 = arith.divf %299, %300 : vector<2x96xf32>
    %302 = vector.extract_strided_slice %295 {offsets = [0, 96], sizes = [2, 32], strides = [1, 1]} : vector<2x128xf32> to vector<2x32xf32>
    %303 = math.tanh %302 : vector<2x32xf32>
    %304 = vector.extract_strided_slice %301 {offsets = [0, 32], sizes = [2, 32], strides = [1, 1]} : vector<2x96xf32> to vector<2x32xf32>
    %305 = arith.mulf %304, %268 : vector<2x32xf32>
    %306 = vector.extract_strided_slice %301 {offsets = [0, 0], sizes = [2, 32], strides = [1, 1]} : vector<2x96xf32> to vector<2x32xf32>
    %307 = arith.mulf %306, %303 : vector<2x32xf32>
    %308 = arith.addf %305, %307 : vector<2x32xf32>
    %309 = vector.extract_strided_slice %301 {offsets = [0, 64], sizes = [2, 32], strides = [1, 1]} : vector<2x96xf32> to vector<2x32xf32>
    %310 = math.tanh %308 : vector<2x32xf32>
    %311 = arith.mulf %309, %310 : vector<2x32xf32>
    %312 = tpu.concatenate %311, %291 in 1 : vector<2x32xf32>, vector<2x32xf32> -> vector<2x64xf32>
    %cst_56 = arith.constant dense<0.000000e+00> : vector<2x128xf32>
    %313 = tpu.matmul %312, %7, %cst_56 {dimension_numbers = #tpu.dot_dimension_numbers<[1], [0], [0], [1], [0, 0, 1, 1], [], []>} : vector<2x64xf32>, vector<64x128xf32>, vector<2x128xf32> -> vector<2x128xf32>
    %314 = vector.broadcast %8 : vector<1x128xf32> to vector<2x128xf32>
    %315 = arith.addf %313, %314 : vector<2x128xf32>
    %316 = vector.extract_strided_slice %315 {offsets = [0, 0], sizes = [2, 96], strides = [1, 1]} : vector<2x128xf32> to vector<2x96xf32>
    %317 = arith.negf %316 : vector<2x96xf32>
    %318 = math.exp %317 : vector<2x96xf32>
    %cst_57 = arith.constant 1.000000e+00 : f32
    %319 = vector.broadcast %cst_57 : f32 to vector<2x96xf32>
    %320 = arith.addf %319, %318 : vector<2x96xf32>
    %321 = arith.divf %319, %320 : vector<2x96xf32>
    %322 = vector.extract_strided_slice %315 {offsets = [0, 96], sizes = [2, 32], strides = [1, 1]} : vector<2x128xf32> to vector<2x32xf32>
    %323 = math.tanh %322 : vector<2x32xf32>
    %324 = vector.extract_strided_slice %321 {offsets = [0, 32], sizes = [2, 32], strides = [1, 1]} : vector<2x96xf32> to vector<2x32xf32>
    %325 = arith.mulf %324, %288 : vector<2x32xf32>
    %326 = vector.extract_strided_slice %321 {offsets = [0, 0], sizes = [2, 32], strides = [1, 1]} : vector<2x96xf32> to vector<2x32xf32>
    %327 = arith.mulf %326, %323 : vector<2x32xf32>
    %328 = arith.addf %325, %327 : vector<2x32xf32>
    %329 = vector.extract_strided_slice %321 {offsets = [0, 64], sizes = [2, 32], strides = [1, 1]} : vector<2x96xf32> to vector<2x32xf32>
    %330 = math.tanh %328 : vector<2x32xf32>
    %331 = arith.mulf %329, %330 : vector<2x32xf32>
    %c14 = arith.constant 14 : index
    %c0_58 = arith.constant 0 : index
    %332 = vector.load %arg10[%c14, %c0_58] : memref<16x32xf32, #tpu.memory_space<vmem>>, vector<2x32xf32>
    tpu.vector_store %arg10[%c14, %c0_58], %331 {strides = array<i32>} : memref<16x32xf32, #tpu.memory_space<vmem>>, vector<2x32xf32>,
    %c0_59 = arith.constant 0 : index
    %c0_60 = arith.constant 0 : index
    %333 = vector.load %arg10[%c0_59, %c0_60] : memref<16x32xf32, #tpu.memory_space<vmem>>, vector<16x32xf32>
    %c0_61 = arith.constant 0 : index
    %c0_62 = arith.constant 0 : index
    %334 = vector.load %arg7[%c0_61, %c0_62] : memref<32x24xf32, #tpu.memory_space<vmem>>, vector<32x24xf32>
    %cst_63 = arith.constant dense<0.000000e+00> : vector<16x24xf32>
    %335 = tpu.matmul %333, %334, %cst_63 {dimension_numbers = #tpu.dot_dimension_numbers<[1], [0], [0], [1], [0, 0, 1, 1], [], []>} : vector<16x32xf32>, vector<32x24xf32>, vector<16x24xf32> -> vector<16x24xf32>
    %c0_64 = arith.constant 0 : index
    %c0_65 = arith.constant 0 : index
    %336 = vector.load %arg8[%c0_64, %c0_65] : memref<1x24xf32, #tpu.memory_space<vmem>>, vector<1x24xf32>
    %337 = vector.broadcast %336 : vector<1x24xf32> to vector<16x24xf32>
    %338 = arith.addf %335, %337 : vector<16x24xf32>
    %cst_66 = arith.constant dense<0xFF800000> : vector<16xf32>
    %339 = vector.multi_reduction <maximumf>, %338, %cst_66 [1] : vector<16x24xf32> to vector<16xf32>
    %340 = vector.shape_cast %339 : vector<16xf32> to vector<16x1xf32>
    %341 = vector.broadcast %340 : vector<16x1xf32> to vector<16x24xf32>
    %342 = arith.subf %338, %341 : vector<16x24xf32>
    %343 = math.exp %342 : vector<16x24xf32>
    %cst_67 = arith.constant dense<0.000000e+00> : vector<16xf32>
    %344 = vector.multi_reduction <add>, %343, %cst_67 [1] : vector<16x24xf32> to vector<16xf32>
    %345 = vector.shape_cast %344 : vector<16xf32> to vector<16x1xf32>
    %346 = math.log %345 : vector<16x1xf32>
    %347 = vector.broadcast %346 : vector<16x1xf32> to vector<16x24xf32>
    %348 = arith.subf %342, %347 : vector<16x24xf32>
    %c0_68 = arith.constant 0 : index
    %c0_69 = arith.constant 0 : index
    %349 = vector.load %arg9[%c0_68, %c0_69] : memref<16x24xf32, #tpu.memory_space<vmem>>, vector<16x24xf32>
    tpu.vector_store %arg9[%c0_68, %c0_69], %348 {strides = array<i32>} : memref<16x24xf32, #tpu.memory_space<vmem>>, vector<16x24xf32>,
    return
  }
}

</mosaic_0001>

<bundles_post_ra>
// kernel: model_forward.6
= control target key start
LH: loop header
LB: loop body
LE: loop exit
PB: predicated region body
PF: predicated region fallthrough
CT: control target
= control target key end

     0   :  { %v318_v1 = vmov 0.0   ;;  %vm319_vm0 = vmmov 0   ;;  %s428_s0 = inlined_call_operand.vmem [shape: f32[2,128], index: 0, kind: input, shape index: {}]   ;;  %s429_s1 = inlined_call_operand.vmem [shape: f32[128,24], index: 1, kind: input, shape index: {}]   ;;  %s430_s2 = inlined_call_operand.vmem [shape: f32[1,24], index: 2, kind: input, shape index: {}]   ;;  %s431_s3 = inlined_call_operand.vmem [shape: f32[24,64], index: 3, kind: input, shape index: {}]   ;;  %s432_s4 = inlined_call_operand.vmem [shape: f32[1,64], index: 4, kind: input, shape index: {}]   ;;  %s433_s5 = inlined_call_operand.hbm [shape: f32[2,24], index: 5, kind: output, shape index: {0}]   ;;  %s434_s6 = inlined_call_operand.vmem [shape: f32[2,64], index: 6, kind: output, shape index: {1}]  }
   0x1   :  { %v39_v0 = vld [vmem:[%s429_s1 + $0x78] sm:$0xff]  ;;  %249 = vmatprep.subr.mxu0 %v318_v1  ;;  %v38_v2 = vld [vmem:[%s429_s1 + $0x70] sm:$0xff]  ;;  %281 = vmatprep.mubr.msk.f32.mxu0 %vm319_vm0, %v318_v1  ;;  %v37_v3 = vld [vmem:[%s429_s1 + $0x68] sm:$0xff] }
   0x2   :  { %250 = vmatpush3.msra.mxu0 %v39_v0  ;;  %284 = vmatprep.subr.mxu1 %v318_v1  ;;  %v36_v4 = vld [vmem:[%s429_s1 + $0x60] sm:$0xff] }
   0x3   :  { %251 = vmatprep.subr.mxu0 %v318_v1  ;;  %290 = vmatprep.mubr.msk.f32.mxu1 %vm319_vm0, %v318_v1 }
   0x4   :  { %252 = vmatpush3.msra.mxu0 %v38_v2 }
   0x5   :  { %253 = vmatprep.subr.mxu0 %v318_v1 }
   0x6   :  { %254 = vmatpush3.msra.mxu0 %v37_v3 }
   0x7   :  { %12 = vsyncpa [#allocation3], 0  ;;  %255 = vmatprep.subr.mxu0 %v318_v1  ;;  %v35_v5 = vld [vmem:[%s429_s1 + $0x58] sm:$0xff]  ;;  %v34_v6 = vld [vmem:[%s429_s1 + $0x50] sm:$0xff]  ;;  %vm130_vm1 = vcmask 195584   ;;  %vm118_vm2 = vcmask 189440  }
   0x8   :  { %256 = vmatpush3.msra.mxu0 %v36_v4  ;;  %v33_v7 = vld [vmem:[%s429_s1 + $0x48] sm:$0xff]  ;;  %v32_v8 = vld [vmem:[%s429_s1 + $0x40] sm:$0xff]  ;;  %v31_v9 = vld [vmem:[%s429_s1 + $0x38] sm:$0xff]  ;;  %s320_s13 = smov [#allocation2]  }
   0x9   :  { %257 = vmatprep.subr.mxu0 %v318_v1  ;;  %v30_v10 = vld [vmem:[%s429_s1 + $0x30] sm:$0xff]  ;;  %v29_v11 = vld [vmem:[%s429_s1 + $0x28] sm:$0xff]  ;;  %v28_v12 = vld [vmem:[%s429_s1 + $0x20] sm:$0xff]  ;;  %s213_s14 = sshll.u32 %s320_s13, 4  ;;  %s214_s14 = int_to_ptr.vmem [resolvable:$true] %s213_s14 }
   0xa   :  { %258 = vmatpush3.msra.mxu0 %v35_v5  ;;  %v27_v13 = vld [vmem:[%s429_s1 + $0x18] sm:$0xff]  ;;  %v26_v14 = vld [vmem:[%s429_s1 + $0x10] sm:$0xff]  ;;  %v25_v15 = vld [vmem:[%s429_s1 + $0x8] sm:$0xff]  ;;  %s296_s15 = scalar_lea.vmem %s214_s14, 32  ;;  %p301_p1 = scmp.lt.s32.totalorder %s214_s14, %s214_s14 }
   0xb   :  { %259 = vmatprep.subr.mxu0 %v318_v1  ;;  %v24_v16 = vld [vmem:[%s429_s1] sm:$0xff]  ;;  %v122_v18 = vld [vmem:[%s431_s3 + $0x10] sm:$0xff]  ;;  %v121_v19 = vld [vmem:[%s431_s3 + $0x8] sm:$0xff]  ;;  %p297_p0 = scmp.ne.s32.totalorder %s214_s14, %s296_s15  ;;  %p302_p2 = scmp.lt.s32.totalorder %s296_s15, %s296_s15 }
   0xc   :  { %260 = vmatpush3.msra.mxu0 %v34_v6  ;;  %v23_v17 = vld [vmem:[%s428_s0] sm:$0x3]  ;;  %285 = vmatpush3.msra.mxu1 %v122_v18 }
   0xd   :  { %261 = vmatprep.subr.mxu0 %v318_v1  ;;  %286 = vmatprep.subr.mxu1 %v318_v1  ;;  %v120_v20 = vld [vmem:[%s431_s3] sm:$0xff]  ;;  %p303_p3 = por %p302_p2, %p301_p1 }
   0xe   :  { %262 = vmatpush3.msra.mxu0 %v33_v7  ;;  %287 = vmatpush3.msra.mxu1 %v121_v19  ;;  %v225_v21 = vld [vmem:[%s430_s2] ss:$0 sm:$0xff] }
   0xf   :  { %263 = vmatprep.subr.mxu0 %v318_v1  ;;  %288 = vmatprep.subr.mxu1 %v318_v1  ;;  %p304_p4 = pnand %p303_p3, %p297_p0 }
  0x10   :  { %264 = vmatpush3.msra.mxu0 %v32_v8  ;;  %289 = vmatpush3.msra.mxu1 %v120_v20 }
  0x11   :  { %265 = vmatprep.subr.mxu0 %v318_v1 }
  0x12   :  { %266 = vmatpush3.msra.mxu0 %v31_v9 }
  0x13   :  { %267 = vmatprep.subr.mxu0 %v318_v1 }
  0x14   :  { %268 = vmatpush3.msra.mxu0 %v30_v10 }
  0x15   :  { %269 = vmatprep.subr.mxu0 %v318_v1 }
  0x16   :  { %270 = vmatpush3.msra.mxu0 %v29_v11 }
  0x17   :  { %271 = vmatprep.subr.mxu0 %v318_v1 }
  0x18   :  { %272 = vmatpush3.msra.mxu0 %v28_v12 }
  0x19   :  { %273 = vmatprep.subr.mxu0 %v318_v1 }
  0x1a   :  { %274 = vmatpush3.msra.mxu0 %v27_v13 }
  0x1b   :  { %275 = vmatprep.subr.mxu0 %v318_v1 }
  0x1c   :  { %276 = vmatpush3.msra.mxu0 %v26_v14 }
  0x1d   :  { %277 = vmatprep.subr.mxu0 %v318_v1 }
  0x1e   :  { %278 = vmatpush3.msra.mxu0 %v25_v15 }
  0x1f   :  { %279 = vmatprep.subr.mxu0 %v318_v1 }
  0x20   :  { %280 = vmatpush3.msra.mxu0 %v24_v16 }
  0x21   :  { %282 = vmatmul.mubr.f32.vlgmr.msra.gmra.mxu0 %v23_v17 }
  0xe1   :  { %v113_v22 = vpop.f32.mrf.mxu0 }
  0xe2   :  { %v114_v23 = vadd.f32 %v225_v21, %v113_v22 }
  0xe3   :  { %v283_v24 = vpop.f32.mrf.mxu0 }
  0xe4   :  { %v117_v25 = vmax.f32 %v114_v23, 0.0 }
  0xe6   :  { %291 = vmatmul.mubr.msk.f32.vlgmr.msra.gmra.mxu1 %vm130_vm1, %v117_v25  ;;  %119 = vst.msk [vmem:[#allocation2] sm:$0x3] %vm118_vm2, %v117_v25 }
  0xe7   :  { %307 = shalt.err (!%p304_p4)
}
  0xe8   :  { %216 = dma.vmem_to_hbm [thread:$0]  %s214_s14, 32, %s433_s5, [#allocation3]   ;;  %v226_v26 = vld [vmem:[%s432_s4] ss:$0 sm:$0xff]  ;;  %vm205_vm3 = vcmask 517120  }
 0x1a6   :  { %v200_v27 = vpop.f32.mrf.mxu1 }
 0x1a7   :  { %v201_v28 = vadd.f32 %v226_v26, %v200_v27 }
 0x1a8   :  { %v292_v29 = vpop.f32.mrf.mxu1 }
 0x1a9   :  { %v204_v30 = vmax.f32 %v201_v28, 0.0 }
 0x1ab   :  { %206 = vst.msk [vmem:[%s434_s6] sm:$0x3] %vm205_vm3, %v204_v30 }
 0x1ac   :  { %316 = dma.done.wait [#allocation3], 32  }
 0x1ad   :  { %317 = vsyncadd [#allocation3], 4294967264 }
 0x1ae   :  { %224 = vsyncpa [#allocation3], 1 }

// kernel: model_forward.5
= control target key start
LH: loop header
LB: loop body
LE: loop exit
PB: predicated region body
PF: predicated region fallthrough
CT: control target
= control target key end

     0   :  { %v2317_v3 = vmov 0.0   ;;  %s2765_s0 = inlined_call_operand.vmem [shape: f32[16,32], index: 0, kind: input, shape index: {}]   ;;  %s2766_s1 = inlined_call_operand.vmem [shape: f32[32,128], index: 1, kind: input, shape index: {}]   ;;  %s2767_s2 = inlined_call_operand.vmem [shape: f32[16,64], index: 2, kind: input, shape index: {}]   ;;  %s2768_s3 = inlined_call_operand.vmem [shape: f32[16,64], index: 3, kind: input, shape index: {}]   ;;  %s2769_s4 = inlined_call_operand.vmem [shape: f32[1,128], index: 4, kind: input, shape index: {}]   ;;  %s2770_s5 = inlined_call_operand.hbm [shape: f32[16,32], index: 5, kind: output, shape index: {0}]   ;;  %s2771_s6 = inlined_call_operand.vmem [shape: f32[2,16], index: 6, kind: output, shape index: {1}]   ;;  %s2772_s7 = inlined_call_operand.vmem [shape: f32[2,16], index: 7, kind: output, shape index: {2}]   ;;  %s2773_s8 = inlined_call_operand.vmem [shape: f32[2,16], index: 8, kind: output, shape index: {3}]   ;;  %s2774_s9 = inlined_call_operand.vmem [shape: f32[2,16], index: 9, kind: output, shape index: {4}]  }
   0x1   :  { %v31_v0 = vld [vmem:[%s2766_s1 + $0x18] sm:$0xff]  ;;  %v2385_v1 = vld [vmem:[%s2767_s2 + $0x8] sm:$0xff]  ;;  %v30_v2 = vld [vmem:[%s2766_s1 + $0x10] sm:$0xff]  ;;  %2043 = vmatprep.subr.mxu1 %v2317_v3 }
   0x2   :  { %2032 = vmatprep.subr.mxu0 %v31_v0  ;;  %v2394_v4 = vld [vmem:[%s2767_s2] sm:$0xff]  ;;  %2044 = vmatpush3.msra.mxu1 %v2385_v1  ;;  %v29_v5 = vld [vmem:[%s2766_s1 + $0x8] sm:$0xff] }
   0x3   :  { %2033 = vmatpush3.msra.mxu0 %v31_v0  ;;  %2045 = vmatprep.subr.mxu1 %v2317_v3 }
   0x4   :  { %2034 = vmatprep.subr.mxu0 %v30_v2 }
   0x5   :  { %15 = vsyncpa [#allocation3], 0  ;;  %2035 = vmatpush3.msra.mxu0 %v30_v2  ;;  %2046 = vmatpush3.msra.mxu1 %v2394_v4  ;;  %v2405_v6 = vld [vmem:[%s2768_s3 + $0x8] sm:$0xff]  ;;  %vm2318_vm0 = vmmov 0   ;;  %v28_v7 = vld [vmem:[%s2766_s1] sm:$0xff]  ;;  %vm39_vm1 = vcmask 261120  }
   0x6   :  { %2047 = vmatprep.mubr.msk.f32.mxu1 %vm2318_vm0, %v2317_v3  ;;  %2036 = vmatprep.subr.mxu0 %v29_v5  ;;  %v26_v8 = vld [vmem:[%s2765_s0] sm:$0xff]  ;;  %v27_v10 = vld [vmem:[%s2765_s0 + $0x8] sm:$0xff]  ;;  %s2319_s0 = smov 64   ;;  %s2320_s28 = smov 80   ;;  %vm125_vm2 = vcmask 130048   ;;  %vm328_vm3 = vcmask 123904  }
   0x7   :  { %2048 = vmatmul.mubr.f32.vlgmr.msra.gmra.mxu1 %v2317_v3  ;;  %2050 = vmatprep.subr.mxu1 %v2317_v3  ;;  %v2421_v9 = vld [vmem:[%s2768_s3] sm:$0xff]  ;;  %s2321_s29 = smov 16   ;;  %s2323_s30 = smov 96   ;;  %vm334_vm4 = vcmask 261254   ;;  %vm557_vm5 = vcmask 259204   ;;  %vm783_vm6 = vcmask 257154  }
   0x8   :  { %2037 = vmatpush3.msra.mxu0 %v29_v5  ;;  %2051 = vmatpush3.msra.mxu1 %v2405_v6  ;;  %v1945_v17 = vld [vmem:[%s2769_s4] ss:$0 sm:$0xff]  ;;  %s2322_s4 = smov 32   ;;  %s2324_s10 = smov 48   ;;  %vm1008_vm7 = vcmask 255104   ;;  %vm551_vm8 = vcmask 125954  }
   0x9   :  { %2038 = vmatprep.subr.mxu0 %v28_v7  ;;  %2052 = vmatprep.subr.mxu1 %v2317_v3  ;;  %s2325_s11 = smov 112   ;;  %vm777_vm9 = vcmask 128004   ;;  %vm1002_vm10 = vcmask 130054  }
   0xa   :  { %2039 = vmatpush3.msra.mxu0 %v28_v7  ;;  %2040 = vmatprep.mubr.msk.f32.mxu0 %vm39_vm1, %v26_v8 }
   0xb   :  { %2053 = vmatpush3.msra.mxu1 %v2421_v9  ;;  %2054 = vmatprep.mubr.msk.f32.mxu1 %vm2318_vm0, %v2317_v3 }
   0xc   :  { %2041 = vmatmul.mubr.msk.f32.vlgmr.msra.gmra.mxu0 %vm39_vm1, %v27_v10  ;;  %2055 = vmatmul.mubr.f32.vlgmr.msra.gmra.mxu1 %v2317_v3 }
   0xd   :  { %2064 = vmatprep.subr.mxu1 %v2317_v3  ;;  %2068 = vmatprep.mubr.msk.f32.mxu1 %vm2318_vm0, %v2317_v3 }
   0xe   :  { %2065 = vmatpush3.msra.mxu1 %v2405_v6  ;;  %2057 = vmatprep.subr.mxu0 %v2317_v3 }
   0xf   :  { %2066 = vmatprep.subr.mxu1 %v2317_v3  ;;  %2058 = vmatpush3.msra.mxu0 %v2385_v1 }
  0x10   :  { %2067 = vmatpush3.msra.mxu1 %v2421_v9  ;;  %2059 = vmatprep.subr.mxu0 %v2317_v3 }
  0x11   :  { %2060 = vmatpush3.msra.mxu0 %v2394_v4  ;;  %2061 = vmatprep.mubr.msk.f32.mxu0 %vm2318_vm0, %v2317_v3 }
  0x12   :  { %2078 = vmatprep.subr.mxu1 %v2317_v3  ;;  %2071 = vmatprep.subr.mxu0 %v2317_v3 }
  0xc7   :  { %v195_v11 = vpop.f32.mrf.mxu1 }
  0xc9   :  { %v2049_v12 = vpop.f32.mrf.mxu1 }
  0xcc   :  { %v290_v13 = vpop.f32.mrf.mxu1  ;;  %v2042_v16 = vpop.f32.mrf.mxu0 }
  0xcd   :  { %v295_v14 = vrot.slane %v290_v13, 2  ;;  %v2449_v18 = vadd.f32 %v2042_v16, %v1945_v17 }
  0xce   :  { %v2056_v15 = vpop.f32.mrf.mxu1  ;;  %v112_v28 = vpop.f32.mrf.mxu0 }
  0xcf   :  { %296 = vrot.lane.b32.xlu0 %v295_v14, %s2319_s0  ;;  %v2454_v29 = vadd.f32 %v1945_v17, %v112_v28 }
  0xd1   :  { %v199_v33 = vadd.f32 %v195_v11, %v2454_v29 }
  0xd3   :  { %v1948_v36 = vmul.f32 -1.442695, %v199_v33 }
 0x141   :  { %v297_v19 = vpop.permute.xlu0 %296 }
 0x142   :  { %v299_v20 = vadd.f32 %v297_v19, %v2449_v18 }
 0x144   :  { %2167 = vtanh.f32 %v299_v20  ;;  %v1949_v22 = vmul.f32 -1.442695, %v299_v20 }
 0x146   :  { %2169 = vpow2.f32 %v1949_v22 }
 0x151   :  { %v2168_v21 = vpop.eup %2167 }
 0x152   :  { %309 = vrot.lane.b32.xlu0 %v2168_v21, %s2320_s28 }
 0x153   :  { %v2170_v23 = vpop.eup %2169 }
 0x154   :  { %v303_v24 = vadd.f32 1.0, %v2170_v23 }
 0x156   :  { %2171 = vrcp.f32 %v303_v24 }
 0x163   :  { %v2172_v25 = vpop.eup %2171 }
 0x164   :  { %v307_v30 = vmul.f32 0.0, %v2172_v25 }
 0x1c4   :  { %v310_v26 = vpop.permute.xlu0 %309 }
 0x1c5   :  { %v312_v27 = vmul.f32 %v2172_v25, %v310_v26 }
 0x1c7   :  { %314 = vrot.lane.b32.xlu1 %v312_v27, %s2321_s29 }
 0x239   :  { %v315_v31 = vpop.permute.xlu1 %314 }
 0x23a   :  { %v2456_v32 = vadd.f32 %v315_v31, %v307_v30 }
 0x23c   :  { %2173 = vtanh.f32 %v2456_v32  ;;  %v528_v7 = vrot.slane %v2456_v32, 2 }
 0x23d   :  { %2175 = vtanh.f32 %v199_v33 }
 0x23e   :  { %2177 = vpow2.f32 %v1948_v36 }
 0x249   :  { %v2174_v34 = vpop.eup %2173 }
 0x24a   :  { %320 = vrot.lane.b32.xlu1 %v2174_v34, %s2321_s29  ;;  %v2176_v35 = vpop.eup %2175 }
 0x24b   :  { %v2178_v37 = vpop.eup %2177 }
 0x24c   :  { %v203_v38 = vadd.f32 1.0, %v2178_v37 }
 0x24e   :  { %209 = vrot.lane.b32.xlu1 %v2176_v35, %s2320_s28  ;;  %2179 = vrcp.f32 %v203_v38 }
 0x25b   :  { %v2180_v42 = vpop.eup %2179 }
 0x25c   :  { %v207_v46 = vmul.f32 0.0, %v2180_v42 }
 0x2bc   :  { %v321_v39 = vpop.permute.xlu1 %320 }
 0x2bd   :  { %v2462_v40 = vmul.f32 %v2172_v25, %v321_v39 }
 0x2bf   :  { %v439_v41 = vrot.slane %v2462_v40, 6 }
 0x2c0   :  { %v210_v43 = vpop.permute.xlu1 %209 }
 0x2c1   :  { %v212_v44 = vmul.f32 %v2180_v42, %v210_v43  ;;  %440 = vrot.lane.b32.xlu0 %v439_v41, %s2322_s4 }
 0x2c3   :  { %214 = vrot.lane.b32.xlu1 %v212_v44, %s2321_s29 }
 0x333   :  { %v441_v45 = vpop.permute.xlu0 %440 }
 0x334   :  { %2069 = vmatmul.mubr.msk.f32.vlgmr.msra.gmra.mxu1 %vm125_vm2, %v441_v45 }
 0x335   :  { %v215_v47 = vpop.permute.xlu1 %214  ;;  %2079 = vmatpush3.msra.mxu1 %v2405_v6  ;;  %2082 = vmatprep.mubr.msk.f32.mxu1 %vm2318_vm0, %v2317_v3 }
 0x336   :  { %v2471_v48 = vadd.f32 %v215_v47, %v207_v46  ;;  %2080 = vmatprep.subr.mxu1 %v2317_v3 }
 0x337   :  { %2081 = vmatpush3.msra.mxu1 %v2421_v9 }
 0x338   :  { %2181 = vtanh.f32 %v2471_v48  ;;  %2092 = vmatprep.subr.mxu1 %v2317_v3  ;;  %v420_v27 = vrot.slane %v2471_v48, 6 }
 0x345   :  { %v2182_v49 = vpop.eup %2181 }
 0x346   :  { %220 = vrot.lane.b32.xlu1 %v2182_v49, %s2321_s29 }
 0x3b8   :  { %v221_v50 = vpop.permute.xlu1 %220 }
 0x3b9   :  { %v223_v51 = vmul.f32 %v2180_v42, %v221_v50 }
 0x3bb   :  { %325 = vrot.lane.b32.xlu1 %v223_v51, %s2323_s30 }
 0x3f4   :  { %v510_v52 = vpop.f32.mrf.mxu1 }
 0x3f5   :  { %v515_v53 = vrot.slane %v510_v52, 4 }
 0x3f6   :  { %v2070_v54 = vpop.f32.mrf.mxu1 }
 0x3f7   :  { %516 = vrot.lane.b32.xlu0 %v515_v53, %s2319_s0 }
 0x42d   :  { %v326_v55 = vpop.permute.xlu1 %325 }
 0x42e   :  { %329 = vst.msk [vmem:[#allocation2] sm:$0x3] %vm328_vm3, %v326_v55  ;;  %2062 = vmatmul.mubr.msk.f32.vlgmr.msra.gmra.mxu0 %vm125_vm2, %v326_v55 }
 0x42f   :  { %2072 = vmatpush3.msra.mxu0 %v2385_v1  ;;  %2075 = vmatprep.mubr.msk.f32.mxu0 %vm2318_vm0, %v2317_v3 }
 0x430   :  { %2073 = vmatprep.subr.mxu0 %v2317_v3 }
 0x431   :  { %2074 = vmatpush3.msra.mxu0 %v2394_v4 }
 0x432   :  { %2085 = vmatprep.subr.mxu0 %v2317_v3 }
 0x469   :  { %v517_v56 = vpop.permute.xlu0 %516 }
 0x46a   :  { %v519_v57 = vadd.f32 %v517_v56, %v2449_v18 }
 0x46c   :  { %2183 = vtanh.f32 %v519_v57  ;;  %v1953_v59 = vmul.f32 -1.442695, %v519_v57 }
 0x46e   :  { %2185 = vpow2.f32 %v1953_v59 }
 0x479   :  { %v2184_v58 = vpop.eup %2183 }
 0x47a   :  { %532 = vrot.lane.b32.xlu0 %v2184_v58, %s2320_s28 }
 0x47b   :  { %v2186_v60 = vpop.eup %2185 }
 0x47c   :  { %v523_v61 = vadd.f32 1.0, %v2186_v60 }
 0x47e   :  { %2187 = vrcp.f32 %v523_v61 }
 0x48b   :  { %v2188_v62 = vpop.eup %2187 }
 0x48c   :  { %v530_v10 = vmul.f32 %v2188_v62, %v528_v7 }
 0x4ec   :  { %v533_v63 = vpop.permute.xlu0 %532 }
 0x4ed   :  { %v535_v0 = vmul.f32 %v2188_v62, %v533_v63 }
 0x4ee   :  { %v404_v2 = vpop.f32.mrf.mxu0 }
 0x4ef   :  { %537 = vrot.lane.b32.xlu0 %v535_v0, %s2321_s29  ;;  %v409_v8 = vrot.slane %v404_v2, 6 }
 0x4f0   :  { %v2063_v5 = vpop.f32.mrf.mxu0 }
 0x4f1   :  { %v411_v13 = vadd.f32 %v409_v8, %v2454_v29 }
 0x4f3   :  { %v1951_v16 = vmul.f32 -1.442695, %v411_v13 }
 0x561   :  { %v538_v11 = vpop.permute.xlu0 %537 }
 0x562   :  { %v2492_v12 = vadd.f32 %v538_v11, %v530_v10 }
 0x564   :  { %2189 = vtanh.f32 %v2492_v12  ;;  %v754_v52 = vrot.slane %v2492_v12, 2 }
 0x565   :  { %2191 = vtanh.f32 %v411_v13 }
 0x566   :  { %2193 = vpow2.f32 %v1951_v16 }
 0x571   :  { %v2190_v14 = vpop.eup %2189 }
 0x572   :  { %543 = vrot.lane.b32.xlu0 %v2190_v14, %s2321_s29  ;;  %v2192_v15 = vpop.eup %2191 }
 0x573   :  { %v2194_v17 = vpop.eup %2193 }
 0x574   :  { %v415_v19 = vadd.f32 1.0, %v2194_v17 }
 0x576   :  { %424 = vrot.lane.b32.xlu0 %v2192_v15, %s2320_s28  ;;  %2195 = vrcp.f32 %v415_v19 }
 0x583   :  { %v2196_v24 = vpop.eup %2195 }
 0x584   :  { %v422_v28 = vmul.f32 %v2196_v24, %v420_v27 }
 0x5e4   :  { %v544_v20 = vpop.permute.xlu0 %543 }
 0x5e5   :  { %v2498_v21 = vmul.f32 %v2188_v62, %v544_v20 }
 0x5e7   :  { %v665_v22 = vrot.slane %v2498_v21, 4 }
 0x5e8   :  { %v425_v23 = vpop.permute.xlu0 %424 }
 0x5e9   :  { %666 = vrot.lane.b32.xlu1 %v665_v22, %s2322_s4  ;;  %v427_v25 = vmul.f32 %v2196_v24, %v425_v23 }
 0x5ed   :  { %429 = vrot.lane.b32.xlu1 %v427_v25, %s2321_s29 }
 0x65b   :  { %v667_v26 = vpop.permute.xlu1 %666 }
 0x65c   :  { %2083 = vmatmul.mubr.msk.f32.vlgmr.msra.gmra.mxu1 %vm125_vm2, %v667_v26 }
 0x65d   :  { %2093 = vmatpush3.msra.mxu1 %v2405_v6  ;;  %2096 = vmatprep.mubr.msk.f32.mxu1 %vm2318_vm0, %v2317_v3 }
 0x65e   :  { %2094 = vmatprep.subr.mxu1 %v2317_v3 }
 0x65f   :  { %v430_v30 = vpop.permute.xlu1 %429  ;;  %2095 = vmatpush3.msra.mxu1 %v2421_v9 }
 0x660   :  { %v2510_v31 = vadd.f32 %v430_v30, %v422_v28  ;;  %2106 = vmatprep.subr.mxu1 %v2317_v3 }
 0x662   :  { %2197 = vtanh.f32 %v2510_v31  ;;  %v646_v11 = vrot.slane %v2510_v31, 6 }
 0x66f   :  { %v2198_v32 = vpop.eup %2197 }
 0x670   :  { %435 = vrot.lane.b32.xlu1 %v2198_v32, %s2321_s29 }
 0x6e2   :  { %v436_v33 = vpop.permute.xlu1 %435 }
 0x6e3   :  { %v2515_v34 = vmul.f32 %v2196_v24, %v436_v33 }
 0x6e5   :  { %v559_v35 = vrot.slane %v2515_v34, 2 }
 0x6e7   :  { %560 = vrot.lane.b32.xlu1 %v559_v35, %s2323_s30 }
 0x71c   :  { %v736_v36 = vpop.f32.mrf.mxu1 }
 0x71d   :  { %v741_v37 = vrot.slane %v736_v36, 6 }
 0x71e   :  { %v2084_v38 = vpop.f32.mrf.mxu1 }
 0x71f   :  { %742 = vrot.lane.b32.xlu0 %v741_v37, %s2319_s0 }
 0x759   :  { %v561_v39 = vpop.permute.xlu1 %560 }
 0x75a   :  { %2076 = vmatmul.mubr.msk.f32.vlgmr.msra.gmra.mxu0 %vm125_vm2, %v561_v39 }
 0x75b   :  { %2086 = vmatpush3.msra.mxu0 %v2385_v1  ;;  %2089 = vmatprep.mubr.msk.f32.mxu0 %vm2318_vm0, %v2317_v3 }
 0x75c   :  { %2087 = vmatprep.subr.mxu0 %v2317_v3 }
 0x75d   :  { %2088 = vmatpush3.msra.mxu0 %v2394_v4 }
 0x75e   :  { %2099 = vmatprep.subr.mxu0 %v2317_v3 }
 0x791   :  { %v743_v41 = vpop.permute.xlu0 %742 }
 0x792   :  { %v745_v42 = vadd.f32 %v743_v41, %v2449_v18 }
 0x794   :  { %2199 = vtanh.f32 %v745_v42  ;;  %v1957_v44 = vmul.f32 -1.442695, %v745_v42 }
 0x796   :  { %2201 = vpow2.f32 %v1957_v44 }
 0x7a1   :  { %v2200_v43 = vpop.eup %2199 }
 0x7a2   :  { %758 = vrot.lane.b32.xlu0 %v2200_v43, %s2320_s28 }
 0x7a3   :  { %v2202_v45 = vpop.eup %2201 }
 0x7a4   :  { %v749_v46 = vadd.f32 1.0, %v2202_v45 }
 0x7a6   :  { %2203 = vrcp.f32 %v749_v46 }
 0x7b3   :  { %v2204_v47 = vpop.eup %2203 }
 0x7b4   :  { %v756_v54 = vmul.f32 %v2204_v47, %v754_v52 }
 0x814   :  { %v759_v48 = vpop.permute.xlu0 %758 }
 0x815   :  { %v761_v49 = vmul.f32 %v2204_v47, %v759_v48 }
 0x817   :  { %763 = vrot.lane.b32.xlu0 %v761_v49, %s2321_s29 }
 0x81a   :  { %v630_v50 = vpop.f32.mrf.mxu0 }
 0x81b   :  { %v635_v53 = vrot.slane %v630_v50, 4 }
 0x81c   :  { %v2077_v51 = vpop.f32.mrf.mxu0 }
 0x81d   :  { %v637_v57 = vadd.f32 %v635_v53, %v2454_v29 }
 0x81f   :  { %v1955_v60 = vmul.f32 -1.442695, %v637_v57 }
 0x889   :  { %v764_v55 = vpop.permute.xlu0 %763 }
 0x88a   :  { %v2531_v56 = vadd.f32 %v764_v55, %v756_v54 }
 0x88c   :  { %2205 = vtanh.f32 %v2531_v56  ;;  %v979_v37 = vrot.slane %v2531_v56, 2 }
 0x88d   :  { %2207 = vtanh.f32 %v637_v57 }
 0x88e   :  { %2209 = vpow2.f32 %v1955_v60 }
 0x899   :  { %v2206_v58 = vpop.eup %2205 }
 0x89a   :  { %769 = vrot.lane.b32.xlu1 %v2206_v58, %s2321_s29  ;;  %v2208_v59 = vpop.eup %2207 }
 0x89b   :  { %v2210_v61 = vpop.eup %2209 }
 0x89c   :  { %v641_v62 = vadd.f32 1.0, %v2210_v61 }
 0x89e   :  { %650 = vrot.lane.b32.xlu1 %v2208_v59, %s2320_s28  ;;  %2211 = vrcp.f32 %v641_v62 }
 0x8ab   :  { %v2212_v7 = vpop.eup %2211 }
 0x8ac   :  { %v648_v12 = vmul.f32 %v2212_v7, %v646_v11 }
 0x90c   :  { %v770_v63 = vpop.permute.xlu1 %769 }
 0x90d   :  { %v2537_v0 = vmul.f32 %v2204_v47, %v770_v63 }
 0x90f   :  { %v891_v2 = vrot.slane %v2537_v0, 2 }
 0x910   :  { %v651_v5 = vpop.permute.xlu1 %650 }
 0x911   :  { %892 = vrot.lane.b32.xlu0 %v891_v2, %s2322_s4  ;;  %v653_v8 = vmul.f32 %v2212_v7, %v651_v5 }
 0x915   :  { %655 = vrot.lane.b32.xlu0 %v653_v8, %s2321_s29 }
 0x983   :  { %v893_v10 = vpop.permute.xlu0 %892 }
 0x984   :  { %2097 = vmatmul.mubr.msk.f32.vlgmr.msra.gmra.mxu1 %vm125_vm2, %v893_v10 }
 0x985   :  { %2107 = vmatpush3.msra.mxu1 %v2405_v6  ;;  %2110 = vmatprep.mubr.msk.f32.mxu1 %vm2318_vm0, %v2317_v3 }
 0x986   :  { %2108 = vmatprep.subr.mxu1 %v2317_v3 }
 0x987   :  { %v656_v13 = vpop.permute.xlu0 %655  ;;  %2109 = vmatpush3.msra.mxu1 %v2421_v9 }
 0x988   :  { %v2549_v14 = vadd.f32 %v656_v13, %v648_v12  ;;  %2120 = vmatprep.subr.mxu1 %v2317_v3 }
 0x98a   :  { %2213 = vtanh.f32 %v2549_v14  ;;  %v872_v55 = vrot.slane %v2549_v14, 6 }
 0x997   :  { %v2214_v15 = vpop.eup %2213 }
 0x998   :  { %661 = vrot.lane.b32.xlu1 %v2214_v15, %s2321_s29 }
 0xa0a   :  { %v662_v16 = vpop.permute.xlu1 %661 }
 0xa0b   :  { %v2554_v17 = vmul.f32 %v2212_v7, %v662_v16 }
 0xa0d   :  { %v785_v19 = vrot.slane %v2554_v17, 4 }
 0xa0f   :  { %786 = vrot.lane.b32.xlu1 %v785_v19, %s2323_s30 }
 0xa44   :  { %v962_v20 = vpop.f32.mrf.mxu1 }
 0xa45   :  { %967 = vrot.lane.b32.xlu0 %v962_v20, %s2319_s0 }
 0xa46   :  { %v2098_v22 = vpop.f32.mrf.mxu1 }
 0xa81   :  { %v787_v23 = vpop.permute.xlu1 %786 }
 0xa82   :  { %2090 = vmatmul.mubr.msk.f32.vlgmr.msra.gmra.mxu0 %vm125_vm2, %v787_v23 }
 0xa83   :  { %2100 = vmatpush3.msra.mxu0 %v2385_v1  ;;  %2103 = vmatprep.mubr.msk.f32.mxu0 %vm2318_vm0, %v2317_v3 }
 0xa84   :  { %2101 = vmatprep.subr.mxu0 %v2317_v3 }
 0xa85   :  { %2102 = vmatpush3.msra.mxu0 %v2394_v4 }
 0xa86   :  { %2113 = vmatprep.subr.mxu0 %v2317_v3 }
 0xab7   :  { %v968_v24 = vpop.permute.xlu0 %967 }
 0xab8   :  { %v970_v25 = vadd.f32 %v968_v24, %v2449_v18 }
 0xaba   :  { %2215 = vtanh.f32 %v970_v25  ;;  %v1961_v27 = vmul.f32 -1.442695, %v970_v25 }
 0xabc   :  { %2217 = vpow2.f32 %v1961_v27 }
 0xac7   :  { %v2216_v26 = vpop.eup %2215 }
 0xac8   :  { %983 = vrot.lane.b32.xlu0 %v2216_v26, %s2320_s28 }
 0xac9   :  { %v2218_v28 = vpop.eup %2217 }
 0xaca   :  { %v974_v30 = vadd.f32 1.0, %v2218_v28 }
 0xacc   :  { %2219 = vrcp.f32 %v974_v30 }
 0xad9   :  { %v2220_v31 = vpop.eup %2219 }
 0xada   :  { %v981_v39 = vmul.f32 %v2220_v31, %v979_v37 }
 0xb3a   :  { %v984_v32 = vpop.permute.xlu0 %983 }
 0xb3b   :  { %v986_v33 = vmul.f32 %v2220_v31, %v984_v32 }
 0xb3d   :  { %988 = vrot.lane.b32.xlu1 %v986_v33, %s2321_s29 }
 0xb42   :  { %v856_v35 = vpop.f32.mrf.mxu0 }
 0xb43   :  { %v861_v38 = vrot.slane %v856_v35, 2 }
 0xb44   :  { %v2091_v36 = vpop.f32.mrf.mxu0 }
 0xb45   :  { %v863_v43 = vadd.f32 %v861_v38, %v2454_v29 }
 0xb47   :  { %v1959_v46 = vmul.f32 -1.442695, %v863_v43 }
 0xbaf   :  { %v989_v41 = vpop.permute.xlu1 %988 }
 0xbb0   :  { %v2570_v42 = vadd.f32 %v989_v41, %v981_v39 }
 0xbb2   :  { %2221 = vtanh.f32 %v2570_v42  ;;  %v1201_v26 = vrot.slane %v2570_v42, 2 }
 0xbb3   :  { %2223 = vtanh.f32 %v863_v43 }
 0xbb4   :  { %2225 = vpow2.f32 %v1959_v46 }
 0xbbf   :  { %v2222_v44 = vpop.eup %2221 }
 0xbc0   :  { %994 = vrot.lane.b32.xlu0 %v2222_v44, %s2321_s29  ;;  %v2224_v45 = vpop.eup %2223 }
 0xbc1   :  { %v2226_v47 = vpop.eup %2225 }
 0xbc2   :  { %v867_v48 = vadd.f32 1.0, %v2226_v47 }
 0xbc4   :  { %876 = vrot.lane.b32.xlu0 %v2224_v45, %s2320_s28  ;;  %2227 = vrcp.f32 %v867_v48 }
 0xbd1   :  { %v2228_v51 = vpop.eup %2227 }
 0xbd2   :  { %v874_v56 = vmul.f32 %v2228_v51, %v872_v55 }
 0xc32   :  { %v995_v49 = vpop.permute.xlu0 %994 }
 0xc33   :  { %v2576_v50 = vmul.f32 %v2220_v31, %v995_v49 }
 0xc35   :  { %1113 = vrot.lane.b32.xlu1 %v2576_v50, %s2322_s4 }
 0xc36   :  { %v877_v52 = vpop.permute.xlu0 %876 }
 0xc37   :  { %v879_v53 = vmul.f32 %v2228_v51, %v877_v52 }
 0xc39   :  { %881 = vrot.lane.b32.xlu1 %v879_v53, %s2321_s29 }
 0xca7   :  { %v1114_v54 = vpop.permute.xlu1 %1113 }
 0xca8   :  { %2111 = vmatmul.mubr.msk.f32.vlgmr.msra.gmra.mxu1 %vm125_vm2, %v1114_v54 }
 0xca9   :  { %2121 = vmatpush3.msra.mxu1 %v2405_v6  ;;  %2124 = vmatprep.mubr.msk.f32.mxu1 %vm2318_vm0, %v2317_v3 }
 0xcaa   :  { %2122 = vmatprep.subr.mxu1 %v2317_v3 }
 0xcab   :  { %v882_v57 = vpop.permute.xlu1 %881  ;;  %2123 = vmatpush3.msra.mxu1 %v2421_v9 }
 0xcac   :  { %v884_v58 = vadd.f32 %v882_v57, %v874_v56  ;;  %2134 = vmatprep.subr.mxu1 %v2317_v3 }
 0xcae   :  { %2229 = vtanh.f32 %v884_v58  ;;  %v1094_v41 = vrot.slane %v884_v58, 6 }
 0xcbb   :  { %v2230_v59 = vpop.eup %2229 }
 0xcbc   :  { %887 = vrot.lane.b32.xlu0 %v2230_v59, %s2321_s29 }
 0xd2e   :  { %v888_v60 = vpop.permute.xlu0 %887 }
 0xd2f   :  { %v2590_v61 = vmul.f32 %v2228_v51, %v888_v60 }
 0xd31   :  { %v1010_v62 = vrot.slane %v2590_v61, 6 }
 0xd33   :  { %1011 = vrot.lane.b32.xlu1 %v1010_v62, %s2323_s30 }
 0xd68   :  { %v1183_v63 = vpop.f32.mrf.mxu1 }
 0xd69   :  { %v1188_v2 = vrot.slane %v1183_v63, 2 }
 0xd6a   :  { %v2112_v5 = vpop.f32.mrf.mxu1 }
 0xd6b   :  { %1189 = vrot.lane.b32.xlu0 %v1188_v2, %s2319_s0 }
 0xda5   :  { %v1012_v7 = vpop.permute.xlu1 %1011 }
 0xda6   :  { %2104 = vmatmul.mubr.msk.f32.vlgmr.msra.gmra.mxu0 %vm125_vm2, %v1012_v7 }
 0xda7   :  { %2114 = vmatpush3.msra.mxu0 %v2385_v1  ;;  %2117 = vmatprep.mubr.msk.f32.mxu0 %vm2318_vm0, %v2317_v3 }
 0xda8   :  { %2115 = vmatprep.subr.mxu0 %v2317_v3 }
 0xda9   :  { %2116 = vmatpush3.msra.mxu0 %v2394_v4 }
 0xdaa   :  { %2127 = vmatprep.subr.mxu0 %v2317_v3 }
 0xddd   :  { %v1190_v8 = vpop.permute.xlu0 %1189 }
 0xdde   :  { %v1192_v10 = vadd.f32 %v1190_v8, %v2454_v29 }
 0xde0   :  { %2231 = vtanh.f32 %v1192_v10  ;;  %v1965_v12 = vmul.f32 -1.442695, %v1192_v10 }
 0xde2   :  { %2233 = vpow2.f32 %v1965_v12 }
 0xded   :  { %v2232_v11 = vpop.eup %2231 }
 0xdee   :  { %1205 = vrot.lane.b32.xlu1 %v2232_v11, %s2320_s28 }
 0xdef   :  { %v2234_v13 = vpop.eup %2233 }
 0xdf0   :  { %v1196_v14 = vadd.f32 1.0, %v2234_v13 }
 0xdf2   :  { %2235 = vrcp.f32 %v1196_v14 }
 0xdff   :  { %v2236_v15 = vpop.eup %2235 }
 0xe00   :  { %v1203_v27 = vmul.f32 %v2236_v15, %v1201_v26 }
 0xe60   :  { %v1206_v16 = vpop.permute.xlu1 %1205 }
 0xe61   :  { %v1208_v19 = vmul.f32 %v2236_v15, %v1206_v16 }
 0xe63   :  { %1210 = vrot.lane.b32.xlu0 %v1208_v19, %s2321_s29 }
 0xe66   :  { %v1081_v20 = vpop.f32.mrf.mxu0 }
 0xe67   :  { %v1085_v22 = vadd.f32 %v1081_v20, %v2449_v18 }
 0xe68   :  { %v2105_v23 = vpop.f32.mrf.mxu0 }
 0xe69   :  { %2237 = vtanh.f32 %v1085_v22  ;;  %v1963_v25 = vmul.f32 -1.442695, %v1085_v22 }
 0xe6b   :  { %2239 = vpow2.f32 %v1963_v25 }
 0xe76   :  { %v2238_v24 = vpop.eup %2237 }
 0xe77   :  { %1098 = vrot.lane.b32.xlu0 %v2238_v24, %s2320_s28 }
 0xe78   :  { %v2240_v28 = vpop.eup %2239 }
 0xe79   :  { %v1089_v32 = vadd.f32 1.0, %v2240_v28 }
 0xed5   :  { %v1211_v30 = vpop.permute.xlu0 %1210 }
 0xed6   :  { %v2608_v31 = vadd.f32 %v1211_v30, %v1203_v27 }
 0xed8   :  { %2241 = vtanh.f32 %v2608_v31  ;;  %v1422_v20 = vrot.slane %v2608_v31, 2 }
 0xed9   :  { %2243 = vrcp.f32 %v1089_v32 }
 0xee5   :  { %v2242_v33 = vpop.eup %2241 }
 0xee6   :  { %1216 = vrot.lane.b32.xlu1 %v2242_v33, %s2321_s29  ;;  %v2244_v35 = vpop.eup %2243 }
 0xee7   :  { %v1096_v43 = vmul.f32 %v2244_v35, %v1094_v41 }
 0xee9   :  { %v1099_v36 = vpop.permute.xlu0 %1098 }
 0xeea   :  { %v1101_v37 = vmul.f32 %v2244_v35, %v1099_v36 }
 0xeec   :  { %1103 = vrot.lane.b32.xlu0 %v1101_v37, %s2321_s29 }
 0xf58   :  { %v1217_v38 = vpop.permute.xlu1 %1216 }
 0xf59   :  { %v2613_v39 = vmul.f32 %v2236_v15, %v1217_v38 }
 0xf5b   :  { %v1333_v42 = vrot.slane %v2613_v39, 6 }
 0xf5d   :  { %1334 = vrot.lane.b32.xlu1 %v1333_v42, %s2322_s4 }
 0xf5e   :  { %v1104_v44 = vpop.permute.xlu0 %1103 }
 0xf5f   :  { %v2617_v45 = vadd.f32 %v1104_v44, %v1096_v43 }
 0xf61   :  { %2245 = vtanh.f32 %v2617_v45  ;;  %v1314_v26 = vrot.slane %v2617_v45, 6 }
 0xf6e   :  { %v2246_v46 = vpop.eup %2245 }
 0xf6f   :  { %1109 = vrot.lane.b32.xlu1 %v2246_v46, %s2321_s29 }
 0xfcf   :  { %v1335_v47 = vpop.permute.xlu1 %1334 }
 0xfd0   :  { %2125 = vmatmul.mubr.msk.f32.vlgmr.msra.gmra.mxu1 %vm125_vm2, %v1335_v47 }
 0xfd1   :  { %2135 = vmatpush3.msra.mxu1 %v2405_v6  ;;  %2138 = vmatprep.mubr.msk.f32.mxu1 %vm2318_vm0, %v2317_v3 }
 0xfd2   :  { %2136 = vmatprep.subr.mxu1 %v2317_v3 }
 0xfd3   :  { %2137 = vmatpush3.msra.mxu1 %v2421_v9 }
 0xfd4   :  { %2148 = vmatprep.subr.mxu1 %v2317_v3 }
 0xfe1   :  { %v1110_v48 = vpop.permute.xlu1 %1109 }
 0xfe2   :  { %v1112_v49 = vmul.f32 %v2244_v35, %v1110_v48 }
 0xfe4   :  { %1221 = vrot.lane.b32.xlu0 %v1112_v49, %s2323_s30 }
0x1056   :  { %v2629_v51 = vpop.permute.xlu0 %1221 }
0x1057   :  { %2118 = vmatmul.mubr.msk.f32.vlgmr.msra.gmra.mxu0 %vm125_vm2, %v2629_v51 }
0x1058   :  { %2128 = vmatpush3.msra.mxu0 %v2385_v1  ;;  %2131 = vmatprep.mubr.msk.f32.mxu0 %vm2318_vm0, %v2317_v3 }
0x1059   :  { %2129 = vmatprep.subr.mxu0 %v2317_v3 }
0x105a   :  { %2130 = vmatpush3.msra.mxu0 %v2394_v4 }
0x105b   :  { %2141 = vmatprep.subr.mxu0 %v2317_v3 }
0x1090   :  { %v1404_v52 = vpop.f32.mrf.mxu1 }
0x1091   :  { %v1409_v53 = vrot.slane %v1404_v52, 4 }
0x1092   :  { %v2126_v54 = vpop.f32.mrf.mxu1 }
0x1093   :  { %1410 = vrot.lane.b32.xlu1 %v1409_v53, %s2319_s0 }
0x1105   :  { %v1411_v55 = vpop.permute.xlu1 %1410 }
0x1106   :  { %v1413_v56 = vadd.f32 %v1411_v55, %v2454_v29 }
0x1108   :  { %2247 = vtanh.f32 %v1413_v56  ;;  %v1969_v2 = vmul.f32 -1.442695, %v1413_v56 }
0x1115   :  { %v2248_v57 = vpop.eup %2247 }
0x1116   :  { %1426 = vrot.lane.b32.xlu0 %v2248_v57, %s2320_s28 }
0x1117   :  { %v1298_v58 = vpop.f32.mrf.mxu0 }
0x1118   :  { %v1303_v59 = vrot.slane %v1298_v58, 6 }
0x1119   :  { %v2119_v60 = vpop.f32.mrf.mxu0 }
0x111a   :  { %v1305_v62 = vadd.f32 %v1303_v59, %v2449_v18 }
0x111c   :  { %2249 = vtanh.f32 %v1305_v62  ;;  %v1967_v8 = vmul.f32 -1.442695, %v1305_v62 }
0x111d   :  { %2251 = vpow2.f32 %v1969_v2 }
0x1129   :  { %v2250_v63 = vpop.eup %2249 }
0x112a   :  { %1318 = vrot.lane.b32.xlu0 %v2250_v63, %s2320_s28  ;;  %v2252_v5 = vpop.eup %2251 }
0x112b   :  { %v1417_v7 = vadd.f32 1.0, %v2252_v5 }
0x112d   :  { %2253 = vrcp.f32 %v1417_v7 }
0x112e   :  { %2255 = vpow2.f32 %v1967_v8 }
0x113a   :  { %v2254_v10 = vpop.eup %2253 }
0x113b   :  { %v2256_v11 = vpop.eup %2255  ;;  %v1424_v22 = vmul.f32 %v2254_v10, %v1422_v20 }
0x113c   :  { %v1309_v14 = vadd.f32 1.0, %v2256_v11 }
0x113e   :  { %2257 = vrcp.f32 %v1309_v14 }
0x114b   :  { %v2258_v15 = vpop.eup %2257 }
0x114c   :  { %v1316_v27 = vmul.f32 %v2258_v15, %v1314_v26 }
0x1188   :  { %v1427_v12 = vpop.permute.xlu0 %1426 }
0x1189   :  { %v1429_v13 = vmul.f32 %v2254_v10, %v1427_v12 }
0x118b   :  { %1431 = vrot.lane.b32.xlu1 %v1429_v13, %s2321_s29 }
0x119c   :  { %v1319_v16 = vpop.permute.xlu0 %1318 }
0x119d   :  { %v1321_v19 = vmul.f32 %v2258_v15, %v1319_v16 }
0x119f   :  { %1323 = vrot.lane.b32.xlu0 %v1321_v19, %s2321_s29 }
0x11fd   :  { %v1432_v23 = vpop.permute.xlu1 %1431 }
0x11fe   :  { %v2647_v24 = vadd.f32 %v1432_v23, %v1424_v22 }
0x1200   :  { %2259 = vtanh.f32 %v2647_v24  ;;  %v1646_v11 = vrot.slane %v2647_v24, 2 }
0x120d   :  { %v2260_v25 = vpop.eup %2259 }
0x120e   :  { %1437 = vrot.lane.b32.xlu1 %v2260_v25, %s2321_s29 }
0x1211   :  { %v1324_v28 = vpop.permute.xlu0 %1323 }
0x1212   :  { %v1326_v30 = vadd.f32 %v1324_v28, %v1316_v27 }
0x1214   :  { %2261 = vtanh.f32 %v1326_v30  ;;  %v1538_v2 = vrot.slane %v1326_v30, 6 }
0x1221   :  { %v2262_v32 = vpop.eup %2261 }
0x1222   :  { %1329 = vrot.lane.b32.xlu0 %v2262_v32, %s2321_s29 }
0x1280   :  { %v1438_v33 = vpop.permute.xlu1 %1437 }
0x1281   :  { %v2653_v31 = vmul.f32 %v2254_v10, %v1438_v33 }
0x1283   :  { %v1557_v35 = vrot.slane %v2653_v31, 4 }
0x1285   :  { %1558 = vrot.lane.b32.xlu1 %v1557_v35, %s2322_s4 }
0x1294   :  { %v1330_v36 = vpop.permute.xlu0 %1329 }
0x1295   :  { %v2657_v37 = vmul.f32 %v2258_v15, %v1330_v36 }
0x1297   :  { %v1451_v38 = vrot.slane %v2657_v37, 2 }
0x1299   :  { %1452 = vrot.lane.b32.xlu1 %v1451_v38, %s2323_s30 }
0x12f7   :  { %v1559_v41 = vpop.permute.xlu1 %1558 }
0x12f8   :  { %2139 = vmatmul.mubr.msk.f32.vlgmr.msra.gmra.mxu1 %vm125_vm2, %v1559_v41 }
0x12f9   :  { %2149 = vmatpush3.msra.mxu1 %v2405_v6  ;;  %2152 = vmatprep.mubr.msk.f32.mxu1 %vm2318_vm0, %v2317_v3 }
0x12fa   :  { %2150 = vmatprep.subr.mxu1 %v2317_v3 }
0x12fb   :  { %2151 = vmatpush3.msra.mxu1 %v2421_v9 }
0x130b   :  { %v1453_v42 = vpop.permute.xlu1 %1452 }
0x130c   :  { %2132 = vmatmul.mubr.msk.f32.vlgmr.msra.gmra.mxu0 %vm125_vm2, %v1453_v42 }
0x130d   :  { %2142 = vmatpush3.msra.mxu0 %v2385_v1  ;;  %2145 = vmatprep.mubr.msk.f32.mxu0 %vm2318_vm0, %v2317_v3 }
0x130e   :  { %2143 = vmatprep.subr.mxu0 %v2317_v3 }
0x130f   :  { %2144 = vmatpush3.msra.mxu0 %v2394_v4 }
0x13b8   :  { %v1628_v6 = vpop.f32.mrf.mxu1 }
0x13b9   :  { %v1633_v43 = vrot.slane %v1628_v6, 6 }
0x13ba   :  { %v2140_v44 = vpop.f32.mrf.mxu1 }
0x13bb   :  { %1634 = vrot.lane.b32.xlu0 %v1633_v43, %s2319_s0 }
0x13cc   :  { %v1522_v45 = vpop.f32.mrf.mxu0 }
0x13cd   :  { %v1527_v46 = vrot.slane %v1522_v45, 4 }
0x13ce   :  { %v2133_v9 = vpop.f32.mrf.mxu0 }
0x13cf   :  { %v1529_v47 = vadd.f32 %v1527_v46, %v2449_v18 }
0x13d1   :  { %2263 = vtanh.f32 %v1529_v47  ;;  %v1971_v1 = vmul.f32 -1.442695, %v1529_v47 }
0x13d3   :  { %2265 = vpow2.f32 %v1971_v1 }
0x13de   :  { %v2264_v48 = vpop.eup %2263 }
0x13df   :  { %1542 = vrot.lane.b32.xlu0 %v2264_v48, %s2320_s28 }
0x13e0   :  { %v2266_v4 = vpop.eup %2265 }
0x13e1   :  { %v1533_v53 = vadd.f32 1.0, %v2266_v4 }
0x142d   :  { %v1635_v49 = vpop.permute.xlu0 %1634 }
0x142e   :  { %v1637_v3 = vadd.f32 %v1635_v49, %v2454_v29 }
0x1430   :  { %2267 = vtanh.f32 %v1637_v3  ;;  %v1973_v57 = vmul.f32 -1.442695, %v1637_v3 }
0x1431   :  { %2269 = vrcp.f32 %v1533_v53 }
0x1432   :  { %2271 = vpow2.f32 %v1973_v57 }
0x143d   :  { %v2268_v52 = vpop.eup %2267 }
0x143e   :  { %1650 = vrot.lane.b32.xlu1 %v2268_v52, %s2320_s28  ;;  %v2270_v54 = vpop.eup %2269 }
0x143f   :  { %v2272_v58 = vpop.eup %2271  ;;  %v1540_v5 = vmul.f32 %v2270_v54, %v1538_v2 }
0x1440   :  { %v1641_v59 = vadd.f32 1.0, %v2272_v58 }
0x1442   :  { %2273 = vrcp.f32 %v1641_v59 }
0x144f   :  { %v2274_v60 = vpop.eup %2273 }
0x1450   :  { %v1648_v12 = vmul.f32 %v2274_v60, %v1646_v11 }
0x1451   :  { %v1543_v55 = vpop.permute.xlu0 %1542 }
0x1452   :  { %v1545_v56 = vmul.f32 %v2270_v54, %v1543_v55 }
0x1454   :  { %1547 = vrot.lane.b32.xlu0 %v1545_v56, %s2321_s29 }
0x14b0   :  { %v1651_v62 = vpop.permute.xlu1 %1650 }
0x14b1   :  { %v1653_v63 = vmul.f32 %v2274_v60, %v1651_v62 }
0x14b3   :  { %1655 = vrot.lane.b32.xlu1 %v1653_v63, %s2321_s29 }
0x14c6   :  { %v1548_v7 = vpop.permute.xlu0 %1547 }
0x14c7   :  { %v1550_v8 = vadd.f32 %v1548_v7, %v1540_v5 }
0x14c9   :  { %2275 = vtanh.f32 %v1550_v8  ;;  %v1762_v9 = vrot.slane %v1550_v8, 6 }
0x14d6   :  { %v2276_v10 = vpop.eup %2275 }
0x14d7   :  { %1553 = vrot.lane.b32.xlu0 %v2276_v10, %s2321_s29 }
0x1525   :  { %v1656_v13 = vpop.permute.xlu1 %1655 }
0x1526   :  { %v2682_v14 = vadd.f32 %v1656_v13, %v1648_v12 }
0x1528   :  { %2277 = vtanh.f32 %v2682_v14  ;;  %v1869_v58 = vrot.slane %v2682_v14, 2 }
0x1535   :  { %v2278_v15 = vpop.eup %2277 }
0x1536   :  { %1661 = vrot.lane.b32.xlu1 %v2278_v15, %s2321_s29 }
0x1549   :  { %v1554_v16 = vpop.permute.xlu0 %1553 }
0x154a   :  { %v1556_v19 = vmul.f32 %v2270_v54, %v1554_v16 }
0x154c   :  { %v1675_v20 = vrot.slane %v1556_v19, 4 }
0x154e   :  { %1676 = vrot.lane.b32.xlu0 %v1675_v20, %s2323_s30 }
0x15a8   :  { %v1662_v22 = vpop.permute.xlu1 %1661 }
0x15a9   :  { %v2687_v23 = vmul.f32 %v2274_v60, %v1662_v22 }
0x15ab   :  { %v1781_v25 = vrot.slane %v2687_v23, 2 }
0x15ad   :  { %1782 = vrot.lane.b32.xlu1 %v1781_v25, %s2322_s4 }
0x15c0   :  { %v1677_v24 = vpop.permute.xlu0 %1676 }
0x15c1   :  { %2146 = vmatmul.mubr.msk.f32.vlgmr.msra.gmra.mxu0 %vm125_vm2, %v1677_v24 }
0x161f   :  { %v1783_v26 = vpop.permute.xlu1 %1782 }
0x1620   :  { %2153 = vmatmul.mubr.msk.f32.vlgmr.msra.gmra.mxu1 %vm125_vm2, %v1783_v26 }
0x1681   :  { %v1746_v27 = vpop.f32.mrf.mxu0 }
0x1682   :  { %v1751_v28 = vrot.slane %v1746_v27, 2 }
0x1683   :  { %v2147_v30 = vpop.f32.mrf.mxu0 }
0x1684   :  { %v1753_v32 = vadd.f32 %v1751_v28, %v2449_v18 }
0x1686   :  { %2279 = vtanh.f32 %v1753_v32  ;;  %v1975_v36 = vmul.f32 -1.442695, %v1753_v32 }
0x1688   :  { %2281 = vpow2.f32 %v1975_v36 }
0x1693   :  { %v2280_v33 = vpop.eup %2279 }
0x1694   :  { %1766 = vrot.lane.b32.xlu0 %v2280_v33, %s2320_s28 }
0x1695   :  { %v2282_v41 = vpop.eup %2281 }
0x1696   :  { %v1757_v42 = vadd.f32 1.0, %v2282_v41 }
0x1698   :  { %2283 = vrcp.f32 %v1757_v42 }
0x16a5   :  { %v2284_v6 = vpop.eup %2283 }
0x16a6   :  { %v1764_v47 = vmul.f32 %v2284_v6, %v1762_v9 }
0x16e0   :  { %v1852_v35 = vpop.f32.mrf.mxu1 }
0x16e1   :  { %1857 = vrot.lane.b32.xlu1 %v1852_v35, %s2319_s0 }
0x16e2   :  { %v2154_v38 = vpop.f32.mrf.mxu1 }
0x1706   :  { %v1767_v43 = vpop.permute.xlu0 %1766 }
0x1707   :  { %v1769_v44 = vmul.f32 %v2284_v6, %v1767_v43 }
0x1709   :  { %1771 = vrot.lane.b32.xlu0 %v1769_v44, %s2321_s29 }
0x1753   :  { %v1858_v45 = vpop.permute.xlu1 %1857 }
0x1754   :  { %v1860_v18 = vadd.f32 %v1858_v45, %v2454_v29 }
0x1756   :  { %2285 = vtanh.f32 %v1860_v18  ;;  %v1977_v29 = vmul.f32 -1.442695, %v1860_v18 }
0x1763   :  { %v2286_v46 = vpop.eup %2285 }
0x1764   :  { %1873 = vrot.lane.b32.xlu1 %v2286_v46, %s2320_s28 }
0x177b   :  { %v1772_v48 = vpop.permute.xlu0 %1771 }
0x177c   :  { %v1774_v1 = vadd.f32 %v1772_v48, %v1764_v47 }
0x177e   :  { %2287 = vtanh.f32 %v1774_v1 }
0x177f   :  { %2289 = vpow2.f32 %v1977_v29 }
0x178b   :  { %v2288_v49 = vpop.eup %2287 }
0x178c   :  { %1777 = vrot.lane.b32.xlu0 %v2288_v49, %s2321_s29  ;;  %v2290_v3 = vpop.eup %2289 }
0x178d   :  { %v1864_v4 = vadd.f32 1.0, %v2290_v3 }
0x178f   :  { %2291 = vrcp.f32 %v1864_v4 }
0x1790   :  { %331 = vrot.lane.b32.xlu0 %v2462_v40, %s2324_s10 }
0x1794   :  { %554 = vrot.lane.b32.xlu0 %v2498_v21, %s2324_s10 }
0x1798   :  { %780 = vrot.lane.b32.xlu0 %v2537_v0, %s2324_s10 }
0x179c   :  { %1005 = vrot.lane.b32.xlu0 %v2576_v50, %s2324_s10  ;;  %v2292_v40 = vpop.eup %2291 }
0x179d   :  { %v1871_v59 = vmul.f32 %v2292_v40, %v1869_v58 }
0x17a0   :  { %1442 = vrot.lane.b32.xlu0 %v2657_v37, %s2323_s30 }
0x17a4   :  { %1666 = vrot.lane.b32.xlu0 %v1556_v19, %s2323_s30 }
0x17d6   :  { %v1874_v52 = vpop.permute.xlu1 %1873 }
0x17d7   :  { %v1876_v53 = vmul.f32 %v2292_v40, %v1874_v52 }
0x17d9   :  { %1878 = vrot.lane.b32.xlu1 %v1876_v53, %s2321_s29 }
0x17fe   :  { %v1778_v21 = vpop.permute.xlu0 %1777 }
0x17ff   :  { %v1780_v0 = vmul.f32 %v2284_v6, %v1778_v21 }
0x1801   :  { %1889 = vrot.lane.b32.xlu0 %v1780_v0, %s2323_s30 }
0x1802   :  { %v332_v50 = vpop.permute.xlu0 %331 }
0x1803   :  { %335 = vst.msk [vmem:[#allocation2 + $0x8] sm:$0xc0] %vm334_vm4, %v332_v50 }
0x1805   :  { %1900 = vrot.lane.b32.xlu0 %v1774_v1, %s2325_s11 }
0x1806   :  { %v555_v37 = vpop.permute.xlu0 %554 }
0x1807   :  { %558 = vst.msk [vmem:[#allocation2 + $0x8] sm:$0x30] %vm557_vm5, %v555_v37 }
0x180a   :  { %v781_v54 = vpop.permute.xlu0 %780 }
0x180b   :  { %784 = vst.msk [vmem:[#allocation2 + $0x8] sm:$0xc] %vm783_vm6, %v781_v54 }
0x180e   :  { %v1006_v55 = vpop.permute.xlu0 %1005 }
0x180f   :  { %1009 = vst.msk [vmem:[#allocation2 + $0x8] sm:$0x3] %vm1008_vm7, %v1006_v55 }
0x1810   :  { %1224 = vst.msk [vmem:[#allocation2 + $0x8] sm:$0x3] %vm328_vm3, %v2629_v51 }
0x1812   :  { %v1443_v56 = vpop.permute.xlu0 %1442 }
0x1813   :  { %1445 = vst.msk [vmem:[#allocation2 + $0x8] sm:$0xc] %vm551_vm8, %v1443_v56 }
0x1816   :  { %v1667_v57 = vpop.permute.xlu0 %1666 }
0x1817   :  { %1669 = vst.msk [vmem:[#allocation2 + $0x8] sm:$0x30] %vm777_vm9, %v1667_v57 }
0x184b   :  { %v1879_v60 = vpop.permute.xlu1 %1878 }
0x184c   :  { %v1881_v62 = vadd.f32 %v1879_v60, %v1871_v59 }
0x184e   :  { %2293 = vtanh.f32 %v1881_v62  ;;  %1909 = vrot.lane.b32.xlu0 %v1881_v62, %s2324_s10 }
0x185b   :  { %v2294_v63 = vpop.eup %2293 }
0x185c   :  { %1884 = vrot.lane.b32.xlu1 %v2294_v63, %s2321_s29 }
0x1860   :  { %548 = vrot.lane.b32.xlu1 %v2515_v34, %s2323_s30 }
0x1864   :  { %774 = vrot.lane.b32.xlu1 %v2554_v17, %s2323_s30 }
0x1868   :  { %999 = vrot.lane.b32.xlu1 %v2590_v61, %s2323_s30 }
0x186c   :  { %1226 = vrot.lane.b32.xlu1 %v2613_v39, %s2324_s10 }
0x1870   :  { %1447 = vrot.lane.b32.xlu1 %v2653_v31, %s2324_s10 }
0x1873   :  { %v1890_v51 = vpop.permute.xlu0 %1889 }
0x1874   :  { %1892 = vst.msk [vmem:[#allocation2 + $0x8] sm:$0xc0] %vm1002_vm10, %v1890_v51  ;;  %1898 = vst.msk [vmem:[%s2771_s6 - $0x6] sm:$0xc0] %vm1002_vm10, %v1890_v51  ;;  %1671 = vrot.lane.b32.xlu1 %v2687_v23, %s2324_s10  ;;  %s2326_s6 = smov [#allocation2]  }
0x1877   :  { %v1901_v34 = vpop.permute.xlu0 %1900 }
0x1878   :  { %1903 = vst.msk [vmem:[%s2772_s7 - $0x6] sm:$0xc0] %vm1002_vm10, %v1901_v34  ;;  %s1918_s7 = sshll.u32 %s2326_s6, 4  ;;  %s1919_s7 = int_to_ptr.vmem [resolvable:$true] %s1918_s7 }
0x1879   :  { %p2300_p1 = scmp.lt.s32.totalorder %s1919_s7, %s1919_s7 }
0x18c0   :  { %v1910_v17 = vpop.permute.xlu0 %1909 }
0x18c1   :  { %1912 = vst.msk [vmem:[%s2774_s9] sm:$0x3] %vm328_vm3, %v1910_v17  ;;  %s2295_s9 = scalar_lea.vmem %s1919_s7, 256 }
0x18c2   :  { %p2296_p0 = scmp.ne.s32.totalorder %s1919_s7, %s2295_s9  ;;  %p2301_p2 = scmp.lt.s32.totalorder %s2295_s9, %s2295_s9 }
0x18c4   :  { %p2302_p3 = por %p2301_p2, %p2300_p1 }
0x18c6   :  { %p2303_p4 = pnand %p2302_p3, %p2296_p0 }
0x18ce   :  { %v1885_v61 = vpop.permute.xlu1 %1884 }
0x18cf   :  { %v1887_v39 = vmul.f32 %v2292_v40, %v1885_v61 }
0x18d1   :  { %1894 = vrot.lane.b32.xlu1 %v1887_v39, %s2324_s10 }
0x18d2   :  { %v549_v31 = vpop.permute.xlu1 %548 }
0x18d3   :  { %552 = vst.msk [vmem:[#allocation2] sm:$0xc] %vm551_vm8, %v549_v31 }
0x18d5   :  { %1904 = vrot.lane.b32.xlu1 %v1887_v39, %s2322_s4 }
0x18d6   :  { %v775_v2 = vpop.permute.xlu1 %774 }
0x18d7   :  { %778 = vst.msk [vmem:[#allocation2] sm:$0x30] %vm777_vm9, %v775_v2 }
0x18da   :  { %v1000_v5 = vpop.permute.xlu1 %999 }
0x18db   :  { %1003 = vst.msk [vmem:[#allocation2] sm:$0xc0] %vm1002_vm10, %v1000_v5 }
0x18de   :  { %v1227_v7 = vpop.permute.xlu1 %1226 }
0x18df   :  { %1229 = vst.msk [vmem:[#allocation2] sm:$0xc0] %vm334_vm4, %v1227_v7 }
0x18e2   :  { %v1448_v8 = vpop.permute.xlu1 %1447 }
0x18e3   :  { %1450 = vst.msk [vmem:[#allocation2] sm:$0x30] %vm557_vm5, %v1448_v8 }
0x18e6   :  { %v1672_v10 = vpop.permute.xlu1 %1671 }
0x18e7   :  { %1674 = vst.msk [vmem:[#allocation2] sm:$0xc] %vm783_vm6, %v1672_v10 }
0x1943   :  { %v1895_v11 = vpop.permute.xlu1 %1894 }
0x1944   :  { %1897 = vst.msk [vmem:[#allocation2] sm:$0x3] %vm1008_vm7, %v1895_v11 }
0x1945   :  { %2306 = shalt.err (!%p2303_p4)
}
0x1946   :  { %s2327_s18 = smov 128   ;;  %s2328_s19 = smov 8  }
0x1947   :  { %1924 = dma.vmem_to_hbm [thread:$0]  %s1919_s7, 256, %s2770_s5, [#allocation3], %s2327_s18, %s2327_s18, %s2328_s19   ;;  %v1905_v12 = vpop.permute.xlu1 %1904 }
0x1948   :  { %1907 = vst.msk [vmem:[%s2773_s8] sm:$0x3] %vm328_vm3, %v1905_v12 }
0x1949   :  { %2315 = dma.done.wait [#allocation3], 256  }
0x194a   :  { %2316 = vsyncadd [#allocation3], 4294967040 }
0x194b   :  { %1944 = vsyncpa [#allocation3], 1 }

// kernel: model_forward.4
= control target key start
LH: loop header
LB: loop body
LE: loop exit
PB: predicated region body
PF: predicated region fallthrough
CT: control target
= control target key end

     0   :  { %vm36_vm0 = vcmask 130048   ;;  %v2270_v3 = vmov 0.0   ;;  %vm2271_vm1 = vmmov 0   ;;  %s2272_s23 = smov 64   ;;  %s2273_s24 = smov 80   ;;  %vm324_vm2 = vcmask 123904   ;;  %s2756_s1 = inlined_call_operand.vmem [shape: f32[16,128], index: 1, kind: input, shape index: {}]   ;;  %s2757_s0 = inlined_call_operand.vmem [shape: f32[16,16], index: 0, kind: input, shape index: {}]   ;;  %s2758_s2 = inlined_call_operand.vmem [shape: f32[16,64], index: 2, kind: input, shape index: {}]   ;;  %s2759_s3 = inlined_call_operand.vmem [shape: f32[16,64], index: 3, kind: input, shape index: {}]   ;;  %s2760_s4 = inlined_call_operand.vmem [shape: f32[1,128], index: 4, kind: input, shape index: {}]   ;;  %s2761_s5 = inlined_call_operand.vmem [shape: f32[16,32], index: 5, kind: output, shape index: {0}]   ;;  %s2762_s6 = inlined_call_operand.vmem [shape: f32[2,16], index: 6, kind: output, shape index: {1}]   ;;  %s2763_s7 = inlined_call_operand.vmem [shape: f32[2,16], index: 7, kind: output, shape index: {2}]   ;;  %s2764_s9 = inlined_call_operand.vmem [shape: f32[2,16], index: 9, kind: output, shape index: {4}]   ;;  %s2765_s8 = inlined_call_operand.vmem [shape: f32[2,16], index: 8, kind: output, shape index: {3}]  }
   0x1   :  { %v28_v0 = vld [vmem:[%s2756_s1 + $0x8] sm:$0xff]  ;;  %v27_v1 = vld [vmem:[%s2756_s1] sm:$0xff]  ;;  %2021 = vmatprep.subr.mxu1 %v2270_v3  ;;  %2025 = vmatprep.mubr.msk.f32.mxu1 %vm2271_vm1, %v2270_v3  ;;  %s2275_s25 = smov 32   ;;  %s2276_s26 = smov 96   ;;  %vm330_vm3 = vcmask 261254   ;;  %vm553_vm4 = vcmask 259204  }
   0x2   :  { %v25_v2 = vld [vmem:[%s2757_s0] sm:$0xff]  ;;  %2014 = vmatprep.subr.mxu0 %v28_v0  ;;  %v2345_v4 = vld [vmem:[%s2758_s2 + $0x8] sm:$0xff]  ;;  %s2277_s29 = smov 48   ;;  %s2278_s11 = smov 112   ;;  %vm779_vm5 = vcmask 257154   ;;  %vm1004_vm6 = vcmask 255104  }
   0x3   :  { %2018 = vmatprep.mubr.msk.f32.mxu0 %vm36_vm0, %v25_v2  ;;  %2015 = vmatpush3.msra.mxu0 %v28_v0  ;;  %v26_v5 = vld [vmem:[%s2757_s0 + $0x8] sm:$0xff]  ;;  %v2354_v6 = vld [vmem:[%s2758_s2] sm:$0xff]  ;;  %vm547_vm7 = vcmask 125954   ;;  %vm773_vm8 = vcmask 128004   ;;  %vm998_vm9 = vcmask 130054  }
   0x4   :  { %2022 = vmatpush3.msra.mxu1 %v2345_v4  ;;  %2016 = vmatprep.subr.mxu0 %v27_v1  ;;  %v2359_v7 = vld [vmem:[%s2759_s3 + $0x8] sm:$0xff]  ;;  %v2368_v8 = vld [vmem:[%s2759_s3] sm:$0xff] }
   0x5   :  { %2023 = vmatprep.subr.mxu1 %v2270_v3  ;;  %2017 = vmatpush3.msra.mxu0 %v27_v1  ;;  %v1929_v10 = vld [vmem:[%s2760_s4] ss:$0 sm:$0xff]  ;;  %s2274_s4 = smov 16  }
   0x6   :  { %2024 = vmatpush3.msra.mxu1 %v2354_v6  ;;  %2019 = vmatmul.mubr.msk.f32.vlgmr.msra.gmra.mxu0 %vm36_vm0, %v26_v5 }
   0x7   :  { %2028 = vmatprep.subr.mxu0 %v2270_v3  ;;  %2032 = vmatprep.mubr.msk.f32.mxu0 %vm2271_vm1, %v2270_v3 }
   0x8   :  { %2029 = vmatpush3.msra.mxu0 %v2359_v7  ;;  %2026 = vmatmul.mubr.f32.vlgmr.msra.gmra.mxu1 %v2270_v3 }
   0x9   :  { %2030 = vmatprep.subr.mxu0 %v2270_v3  ;;  %2035 = vmatprep.subr.mxu1 %v2270_v3 }
   0xa   :  { %2031 = vmatpush3.msra.mxu0 %v2368_v8  ;;  %2036 = vmatpush3.msra.mxu1 %v2345_v4 }
   0xb   :  { %2033 = vmatmul.mubr.f32.vlgmr.msra.gmra.mxu0 %v2270_v3  ;;  %2042 = vmatprep.subr.mxu0 %v2270_v3 }
   0xc   :  { %2043 = vmatpush3.msra.mxu0 %v2359_v7  ;;  %2046 = vmatprep.mubr.msk.f32.mxu0 %vm2271_vm1, %v2270_v3 }
   0xd   :  { %2044 = vmatprep.subr.mxu0 %v2270_v3  ;;  %2037 = vmatprep.subr.mxu1 %v2270_v3 }
   0xe   :  { %2045 = vmatpush3.msra.mxu0 %v2368_v8  ;;  %2038 = vmatpush3.msra.mxu1 %v2354_v6 }
   0xf   :  { %2039 = vmatprep.mubr.msk.f32.mxu1 %vm2271_vm1, %v2270_v3  ;;  %2056 = vmatprep.subr.mxu0 %v2270_v3 }
  0x10   :  { %2049 = vmatprep.subr.mxu1 %v2270_v3 }
  0xc6   :  { %v2020_v9 = vpop.f32.mrf.mxu0 }
  0xc7   :  { %v2397_v18 = vadd.f32 %v2020_v9, %v1929_v10 }
  0xc8   :  { %v109_v11 = vpop.f32.mrf.mxu0  ;;  %v191_v12 = vpop.f32.mrf.mxu1 }
  0xc9   :  { %v2394_v13 = vadd.f32 %v1929_v10, %v109_v11 }
  0xca   :  { %v2027_v15 = vpop.f32.mrf.mxu1 }
  0xcb   :  { %v286_v14 = vpop.f32.mrf.mxu0  ;;  %v195_v31 = vadd.f32 %v191_v12, %v2394_v13 }
  0xcc   :  { %v291_v16 = vrot.slane %v286_v14, 2 }
  0xcd   :  { %v2034_v17 = vpop.f32.mrf.mxu0  ;;  %v1932_v34 = vmul.f32 -1.442695, %v195_v31 }
  0xce   :  { %292 = vrot.lane.b32.xlu0 %v291_v16, %s2272_s23 }
 0x140   :  { %v293_v19 = vpop.permute.xlu0 %292 }
 0x141   :  { %v295_v20 = vadd.f32 %v293_v19, %v2397_v18 }
 0x143   :  { %2142 = vtanh.f32 %v295_v20  ;;  %v1933_v22 = vmul.f32 -1.442695, %v295_v20 }
 0x145   :  { %2144 = vpow2.f32 %v1933_v22 }
 0x150   :  { %v2143_v21 = vpop.eup %2142 }
 0x151   :  { %305 = vrot.lane.b32.xlu0 %v2143_v21, %s2273_s24 }
 0x152   :  { %v2145_v23 = vpop.eup %2144 }
 0x153   :  { %v299_v24 = vadd.f32 1.0, %v2145_v23 }
 0x155   :  { %2146 = vrcp.f32 %v299_v24 }
 0x162   :  { %v2147_v25 = vpop.eup %2146 }
 0x163   :  { %v303_v28 = vmul.f32 0.0, %v2147_v25 }
 0x1c3   :  { %v306_v26 = vpop.permute.xlu0 %305 }
 0x1c4   :  { %v308_v27 = vmul.f32 %v2147_v25, %v306_v26 }
 0x1c6   :  { %310 = vrot.lane.b32.xlu1 %v308_v27, %s2274_s4 }
 0x238   :  { %v311_v29 = vpop.permute.xlu1 %310 }
 0x239   :  { %v2402_v30 = vadd.f32 %v311_v29, %v303_v28 }
 0x23b   :  { %2148 = vtanh.f32 %v2402_v30  ;;  %v524_v1 = vrot.slane %v2402_v30, 2 }
 0x23c   :  { %2150 = vtanh.f32 %v195_v31 }
 0x23d   :  { %2152 = vpow2.f32 %v1932_v34 }
 0x248   :  { %v2149_v32 = vpop.eup %2148 }
 0x249   :  { %316 = vrot.lane.b32.xlu1 %v2149_v32, %s2274_s4  ;;  %v2151_v33 = vpop.eup %2150 }
 0x24a   :  { %v2153_v35 = vpop.eup %2152 }
 0x24b   :  { %v199_v36 = vadd.f32 1.0, %v2153_v35 }
 0x24d   :  { %205 = vrot.lane.b32.xlu1 %v2151_v33, %s2273_s24  ;;  %2154 = vrcp.f32 %v199_v36 }
 0x25a   :  { %v2155_v40 = vpop.eup %2154 }
 0x25b   :  { %v203_v44 = vmul.f32 0.0, %v2155_v40 }
 0x2bb   :  { %v317_v37 = vpop.permute.xlu1 %316 }
 0x2bc   :  { %v2408_v38 = vmul.f32 %v2147_v25, %v317_v37 }
 0x2be   :  { %v435_v39 = vrot.slane %v2408_v38, 6 }
 0x2bf   :  { %v206_v41 = vpop.permute.xlu1 %205 }
 0x2c0   :  { %v208_v42 = vmul.f32 %v2155_v40, %v206_v41  ;;  %436 = vrot.lane.b32.xlu0 %v435_v39, %s2275_s25 }
 0x2c2   :  { %210 = vrot.lane.b32.xlu1 %v208_v42, %s2274_s4 }
 0x332   :  { %v437_v43 = vpop.permute.xlu0 %436 }
 0x333   :  { %2047 = vmatmul.mubr.msk.f32.vlgmr.msra.gmra.mxu0 %vm36_vm0, %v437_v43 }
 0x334   :  { %v211_v45 = vpop.permute.xlu1 %210  ;;  %2057 = vmatpush3.msra.mxu0 %v2359_v7  ;;  %2060 = vmatprep.mubr.msk.f32.mxu0 %vm2271_vm1, %v2270_v3 }
 0x335   :  { %v2417_v46 = vadd.f32 %v211_v45, %v203_v44  ;;  %2058 = vmatprep.subr.mxu0 %v2270_v3 }
 0x336   :  { %2059 = vmatpush3.msra.mxu0 %v2368_v8 }
 0x337   :  { %2156 = vtanh.f32 %v2417_v46  ;;  %2070 = vmatprep.subr.mxu0 %v2270_v3  ;;  %v416_v26 = vrot.slane %v2417_v46, 6 }
 0x344   :  { %v2157_v47 = vpop.eup %2156 }
 0x345   :  { %216 = vrot.lane.b32.xlu1 %v2157_v47, %s2274_s4 }
 0x3b7   :  { %v217_v48 = vpop.permute.xlu1 %216 }
 0x3b8   :  { %v219_v49 = vmul.f32 %v2155_v40, %v217_v48 }
 0x3ba   :  { %321 = vrot.lane.b32.xlu1 %v219_v49, %s2276_s26 }
 0x3f3   :  { %v506_v50 = vpop.f32.mrf.mxu0 }
 0x3f4   :  { %v511_v51 = vrot.slane %v506_v50, 4 }
 0x3f5   :  { %v2048_v52 = vpop.f32.mrf.mxu0 }
 0x3f6   :  { %512 = vrot.lane.b32.xlu0 %v511_v51, %s2272_s23 }
 0x42c   :  { %v322_v53 = vpop.permute.xlu1 %321 }
 0x42d   :  { %325 = vst.msk [vmem:[%s2761_s5] sm:$0x3] %vm324_vm2, %v322_v53  ;;  %2040 = vmatmul.mubr.msk.f32.vlgmr.msra.gmra.mxu1 %vm36_vm0, %v322_v53 }
 0x42e   :  { %2050 = vmatpush3.msra.mxu1 %v2345_v4  ;;  %2053 = vmatprep.mubr.msk.f32.mxu1 %vm2271_vm1, %v2270_v3 }
 0x42f   :  { %2051 = vmatprep.subr.mxu1 %v2270_v3 }
 0x430   :  { %2052 = vmatpush3.msra.mxu1 %v2354_v6 }
 0x431   :  { %2063 = vmatprep.subr.mxu1 %v2270_v3 }
 0x468   :  { %v513_v54 = vpop.permute.xlu0 %512 }
 0x469   :  { %v515_v55 = vadd.f32 %v513_v54, %v2397_v18 }
 0x46b   :  { %2158 = vtanh.f32 %v515_v55  ;;  %v1937_v57 = vmul.f32 -1.442695, %v515_v55 }
 0x46d   :  { %2160 = vpow2.f32 %v1937_v57 }
 0x478   :  { %v2159_v56 = vpop.eup %2158 }
 0x479   :  { %528 = vrot.lane.b32.xlu0 %v2159_v56, %s2273_s24 }
 0x47a   :  { %v2161_v58 = vpop.eup %2160 }
 0x47b   :  { %v519_v59 = vadd.f32 1.0, %v2161_v58 }
 0x47d   :  { %2162 = vrcp.f32 %v519_v59 }
 0x48a   :  { %v2163_v60 = vpop.eup %2162 }
 0x48b   :  { %v526_v5 = vmul.f32 %v2163_v60, %v524_v1 }
 0x4eb   :  { %v529_v61 = vpop.permute.xlu0 %528 }
 0x4ec   :  { %v531_v62 = vmul.f32 %v2163_v60, %v529_v61 }
 0x4ed   :  { %v400_v63 = vpop.f32.mrf.mxu1 }
 0x4ee   :  { %533 = vrot.lane.b32.xlu0 %v531_v62, %s2274_s4  ;;  %v405_v2 = vrot.slane %v400_v63, 6 }
 0x4ef   :  { %v2041_v0 = vpop.f32.mrf.mxu1 }
 0x4f0   :  { %v407_v11 = vadd.f32 %v405_v2, %v2394_v13 }
 0x4f2   :  { %v1935_v15 = vmul.f32 -1.442695, %v407_v11 }
 0x560   :  { %v534_v9 = vpop.permute.xlu0 %533 }
 0x561   :  { %v2441_v10 = vadd.f32 %v534_v9, %v526_v5 }
 0x563   :  { %2164 = vtanh.f32 %v2441_v10  ;;  %v750_v50 = vrot.slane %v2441_v10, 2 }
 0x564   :  { %2166 = vtanh.f32 %v407_v11 }
 0x565   :  { %2168 = vpow2.f32 %v1935_v15 }
 0x570   :  { %v2165_v12 = vpop.eup %2164 }
 0x571   :  { %539 = vrot.lane.b32.xlu0 %v2165_v12, %s2274_s4  ;;  %v2167_v14 = vpop.eup %2166 }
 0x572   :  { %v2169_v16 = vpop.eup %2168 }
 0x573   :  { %v411_v17 = vadd.f32 1.0, %v2169_v16 }
 0x575   :  { %420 = vrot.lane.b32.xlu0 %v2167_v14, %s2273_s24  ;;  %2170 = vrcp.f32 %v411_v17 }
 0x582   :  { %v2171_v23 = vpop.eup %2170 }
 0x583   :  { %v418_v27 = vmul.f32 %v2171_v23, %v416_v26 }
 0x5e3   :  { %v540_v19 = vpop.permute.xlu0 %539 }
 0x5e4   :  { %v2447_v20 = vmul.f32 %v2163_v60, %v540_v19 }
 0x5e6   :  { %v661_v21 = vrot.slane %v2447_v20, 4 }
 0x5e7   :  { %v421_v22 = vpop.permute.xlu0 %420 }
 0x5e8   :  { %662 = vrot.lane.b32.xlu1 %v661_v21, %s2275_s25  ;;  %v423_v24 = vmul.f32 %v2171_v23, %v421_v22 }
 0x5ec   :  { %425 = vrot.lane.b32.xlu1 %v423_v24, %s2274_s4 }
 0x65a   :  { %v663_v25 = vpop.permute.xlu1 %662 }
 0x65b   :  { %2061 = vmatmul.mubr.msk.f32.vlgmr.msra.gmra.mxu0 %vm36_vm0, %v663_v25 }
 0x65c   :  { %2071 = vmatpush3.msra.mxu0 %v2359_v7  ;;  %2074 = vmatprep.mubr.msk.f32.mxu0 %vm2271_vm1, %v2270_v3 }
 0x65d   :  { %2072 = vmatprep.subr.mxu0 %v2270_v3 }
 0x65e   :  { %v426_v28 = vpop.permute.xlu1 %425  ;;  %2073 = vmatpush3.msra.mxu0 %v2368_v8 }
 0x65f   :  { %v2459_v29 = vadd.f32 %v426_v28, %v418_v27  ;;  %2084 = vmatprep.subr.mxu0 %v2270_v3 }
 0x661   :  { %2172 = vtanh.f32 %v2459_v29  ;;  %v642_v9 = vrot.slane %v2459_v29, 6 }
 0x66e   :  { %v2173_v30 = vpop.eup %2172 }
 0x66f   :  { %431 = vrot.lane.b32.xlu1 %v2173_v30, %s2274_s4 }
 0x6e1   :  { %v432_v31 = vpop.permute.xlu1 %431 }
 0x6e2   :  { %v2464_v32 = vmul.f32 %v2171_v23, %v432_v31 }
 0x6e4   :  { %v555_v33 = vrot.slane %v2464_v32, 2 }
 0x6e6   :  { %556 = vrot.lane.b32.xlu1 %v555_v33, %s2276_s26 }
 0x71b   :  { %v732_v34 = vpop.f32.mrf.mxu0 }
 0x71c   :  { %v737_v35 = vrot.slane %v732_v34, 6 }
 0x71d   :  { %v2062_v36 = vpop.f32.mrf.mxu0 }
 0x71e   :  { %738 = vrot.lane.b32.xlu0 %v737_v35, %s2272_s23 }
 0x758   :  { %v557_v37 = vpop.permute.xlu1 %556 }
 0x759   :  { %2054 = vmatmul.mubr.msk.f32.vlgmr.msra.gmra.mxu1 %vm36_vm0, %v557_v37 }
 0x75a   :  { %2064 = vmatpush3.msra.mxu1 %v2345_v4  ;;  %2067 = vmatprep.mubr.msk.f32.mxu1 %vm2271_vm1, %v2270_v3 }
 0x75b   :  { %2065 = vmatprep.subr.mxu1 %v2270_v3 }
 0x75c   :  { %2066 = vmatpush3.msra.mxu1 %v2354_v6 }
 0x75d   :  { %2077 = vmatprep.subr.mxu1 %v2270_v3 }
 0x790   :  { %v739_v39 = vpop.permute.xlu0 %738 }
 0x791   :  { %v741_v40 = vadd.f32 %v739_v39, %v2397_v18 }
 0x793   :  { %2174 = vtanh.f32 %v741_v40  ;;  %v1941_v42 = vmul.f32 -1.442695, %v741_v40 }
 0x795   :  { %2176 = vpow2.f32 %v1941_v42 }
 0x7a0   :  { %v2175_v41 = vpop.eup %2174 }
 0x7a1   :  { %754 = vrot.lane.b32.xlu0 %v2175_v41, %s2273_s24 }
 0x7a2   :  { %v2177_v43 = vpop.eup %2176 }
 0x7a3   :  { %v745_v44 = vadd.f32 1.0, %v2177_v43 }
 0x7a5   :  { %2178 = vrcp.f32 %v745_v44 }
 0x7b2   :  { %v2179_v45 = vpop.eup %2178 }
 0x7b3   :  { %v752_v52 = vmul.f32 %v2179_v45, %v750_v50 }
 0x813   :  { %v755_v46 = vpop.permute.xlu0 %754 }
 0x814   :  { %v757_v47 = vmul.f32 %v2179_v45, %v755_v46 }
 0x816   :  { %759 = vrot.lane.b32.xlu0 %v757_v47, %s2274_s4 }
 0x819   :  { %v626_v48 = vpop.f32.mrf.mxu1 }
 0x81a   :  { %v631_v51 = vrot.slane %v626_v48, 4 }
 0x81b   :  { %v2055_v49 = vpop.f32.mrf.mxu1 }
 0x81c   :  { %v633_v55 = vadd.f32 %v631_v51, %v2394_v13 }
 0x81e   :  { %v1939_v58 = vmul.f32 -1.442695, %v633_v55 }
 0x888   :  { %v760_v53 = vpop.permute.xlu0 %759 }
 0x889   :  { %v2480_v54 = vadd.f32 %v760_v53, %v752_v52 }
 0x88b   :  { %2180 = vtanh.f32 %v2480_v54  ;;  %v975_v35 = vrot.slane %v2480_v54, 2 }
 0x88c   :  { %2182 = vtanh.f32 %v633_v55 }
 0x88d   :  { %2184 = vpow2.f32 %v1939_v58 }
 0x898   :  { %v2181_v56 = vpop.eup %2180 }
 0x899   :  { %765 = vrot.lane.b32.xlu1 %v2181_v56, %s2274_s4  ;;  %v2183_v57 = vpop.eup %2182 }
 0x89a   :  { %v2185_v59 = vpop.eup %2184 }
 0x89b   :  { %v637_v60 = vadd.f32 1.0, %v2185_v59 }
 0x89d   :  { %646 = vrot.lane.b32.xlu1 %v2183_v57, %s2273_s24  ;;  %2186 = vrcp.f32 %v637_v60 }
 0x8aa   :  { %v2187_v1 = vpop.eup %2186 }
 0x8ab   :  { %v644_v10 = vmul.f32 %v2187_v1, %v642_v9 }
 0x90b   :  { %v766_v61 = vpop.permute.xlu1 %765 }
 0x90c   :  { %v2486_v62 = vmul.f32 %v2179_v45, %v766_v61 }
 0x90e   :  { %v887_v63 = vrot.slane %v2486_v62, 2 }
 0x90f   :  { %v647_v0 = vpop.permute.xlu1 %646 }
 0x910   :  { %888 = vrot.lane.b32.xlu0 %v887_v63, %s2275_s25  ;;  %v649_v2 = vmul.f32 %v2187_v1, %v647_v0 }
 0x914   :  { %651 = vrot.lane.b32.xlu0 %v649_v2, %s2274_s4 }
 0x982   :  { %v889_v5 = vpop.permute.xlu0 %888 }
 0x983   :  { %2075 = vmatmul.mubr.msk.f32.vlgmr.msra.gmra.mxu0 %vm36_vm0, %v889_v5 }
 0x984   :  { %2085 = vmatpush3.msra.mxu0 %v2359_v7  ;;  %2088 = vmatprep.mubr.msk.f32.mxu0 %vm2271_vm1, %v2270_v3 }
 0x985   :  { %2086 = vmatprep.subr.mxu0 %v2270_v3 }
 0x986   :  { %v652_v11 = vpop.permute.xlu0 %651  ;;  %2087 = vmatpush3.msra.mxu0 %v2368_v8 }
 0x987   :  { %v2498_v12 = vadd.f32 %v652_v11, %v644_v10  ;;  %2098 = vmatprep.subr.mxu0 %v2270_v3 }
 0x989   :  { %2188 = vtanh.f32 %v2498_v12  ;;  %v868_v53 = vrot.slane %v2498_v12, 6 }
 0x996   :  { %v2189_v14 = vpop.eup %2188 }
 0x997   :  { %657 = vrot.lane.b32.xlu1 %v2189_v14, %s2274_s4 }
 0xa09   :  { %v658_v15 = vpop.permute.xlu1 %657 }
 0xa0a   :  { %v2503_v16 = vmul.f32 %v2187_v1, %v658_v15 }
 0xa0c   :  { %v781_v17 = vrot.slane %v2503_v16, 4 }
 0xa0e   :  { %782 = vrot.lane.b32.xlu1 %v781_v17, %s2276_s26 }
 0xa43   :  { %v958_v19 = vpop.f32.mrf.mxu0 }
 0xa44   :  { %963 = vrot.lane.b32.xlu0 %v958_v19, %s2272_s23 }
 0xa45   :  { %v2076_v21 = vpop.f32.mrf.mxu0 }
 0xa80   :  { %v783_v22 = vpop.permute.xlu1 %782 }
 0xa81   :  { %2068 = vmatmul.mubr.msk.f32.vlgmr.msra.gmra.mxu1 %vm36_vm0, %v783_v22 }
 0xa82   :  { %2078 = vmatpush3.msra.mxu1 %v2345_v4  ;;  %2081 = vmatprep.mubr.msk.f32.mxu1 %vm2271_vm1, %v2270_v3 }
 0xa83   :  { %2079 = vmatprep.subr.mxu1 %v2270_v3 }
 0xa84   :  { %2080 = vmatpush3.msra.mxu1 %v2354_v6 }
 0xa85   :  { %2091 = vmatprep.subr.mxu1 %v2270_v3 }
 0xab6   :  { %v964_v23 = vpop.permute.xlu0 %963 }
 0xab7   :  { %v966_v24 = vadd.f32 %v964_v23, %v2397_v18 }
 0xab9   :  { %2190 = vtanh.f32 %v966_v24  ;;  %v1945_v26 = vmul.f32 -1.442695, %v966_v24 }
 0xabb   :  { %2192 = vpow2.f32 %v1945_v26 }
 0xac6   :  { %v2191_v25 = vpop.eup %2190 }
 0xac7   :  { %979 = vrot.lane.b32.xlu0 %v2191_v25, %s2273_s24 }
 0xac8   :  { %v2193_v27 = vpop.eup %2192 }
 0xac9   :  { %v970_v28 = vadd.f32 1.0, %v2193_v27 }
 0xacb   :  { %2194 = vrcp.f32 %v970_v28 }
 0xad8   :  { %v2195_v29 = vpop.eup %2194 }
 0xad9   :  { %v977_v37 = vmul.f32 %v2195_v29, %v975_v35 }
 0xb39   :  { %v980_v30 = vpop.permute.xlu0 %979 }
 0xb3a   :  { %v982_v31 = vmul.f32 %v2195_v29, %v980_v30 }
 0xb3c   :  { %984 = vrot.lane.b32.xlu1 %v982_v31, %s2274_s4 }
 0xb41   :  { %v852_v33 = vpop.f32.mrf.mxu1 }
 0xb42   :  { %v857_v36 = vrot.slane %v852_v33, 2 }
 0xb43   :  { %v2069_v34 = vpop.f32.mrf.mxu1 }
 0xb44   :  { %v859_v41 = vadd.f32 %v857_v36, %v2394_v13 }
 0xb46   :  { %v1943_v44 = vmul.f32 -1.442695, %v859_v41 }
 0xbae   :  { %v985_v39 = vpop.permute.xlu1 %984 }
 0xbaf   :  { %v2519_v40 = vadd.f32 %v985_v39, %v977_v37 }
 0xbb1   :  { %2196 = vtanh.f32 %v2519_v40  ;;  %v1197_v25 = vrot.slane %v2519_v40, 2 }
 0xbb2   :  { %2198 = vtanh.f32 %v859_v41 }
 0xbb3   :  { %2200 = vpow2.f32 %v1943_v44 }
 0xbbe   :  { %v2197_v42 = vpop.eup %2196 }
 0xbbf   :  { %990 = vrot.lane.b32.xlu0 %v2197_v42, %s2274_s4  ;;  %v2199_v43 = vpop.eup %2198 }
 0xbc0   :  { %v2201_v45 = vpop.eup %2200 }
 0xbc1   :  { %v863_v46 = vadd.f32 1.0, %v2201_v45 }
 0xbc3   :  { %872 = vrot.lane.b32.xlu0 %v2199_v43, %s2273_s24  ;;  %2202 = vrcp.f32 %v863_v46 }
 0xbd0   :  { %v2203_v49 = vpop.eup %2202 }
 0xbd1   :  { %v870_v54 = vmul.f32 %v2203_v49, %v868_v53 }
 0xc31   :  { %v991_v47 = vpop.permute.xlu0 %990 }
 0xc32   :  { %v2525_v48 = vmul.f32 %v2195_v29, %v991_v47 }
 0xc34   :  { %1109 = vrot.lane.b32.xlu1 %v2525_v48, %s2275_s25 }
 0xc35   :  { %v873_v50 = vpop.permute.xlu0 %872 }
 0xc36   :  { %v875_v51 = vmul.f32 %v2203_v49, %v873_v50 }
 0xc38   :  { %877 = vrot.lane.b32.xlu1 %v875_v51, %s2274_s4 }
 0xca6   :  { %v1110_v52 = vpop.permute.xlu1 %1109 }
 0xca7   :  { %2089 = vmatmul.mubr.msk.f32.vlgmr.msra.gmra.mxu0 %vm36_vm0, %v1110_v52 }
 0xca8   :  { %2099 = vmatpush3.msra.mxu0 %v2359_v7  ;;  %2102 = vmatprep.mubr.msk.f32.mxu0 %vm2271_vm1, %v2270_v3 }
 0xca9   :  { %2100 = vmatprep.subr.mxu0 %v2270_v3 }
 0xcaa   :  { %v878_v55 = vpop.permute.xlu1 %877  ;;  %2101 = vmatpush3.msra.mxu0 %v2368_v8 }
 0xcab   :  { %v880_v56 = vadd.f32 %v878_v55, %v870_v54  ;;  %2112 = vmatprep.subr.mxu0 %v2270_v3 }
 0xcad   :  { %2204 = vtanh.f32 %v880_v56  ;;  %v1090_v39 = vrot.slane %v880_v56, 6 }
 0xcba   :  { %v2205_v57 = vpop.eup %2204 }
 0xcbb   :  { %883 = vrot.lane.b32.xlu0 %v2205_v57, %s2274_s4 }
 0xd2d   :  { %v884_v58 = vpop.permute.xlu0 %883 }
 0xd2e   :  { %v2539_v59 = vmul.f32 %v2203_v49, %v884_v58 }
 0xd30   :  { %v1006_v60 = vrot.slane %v2539_v59, 6 }
 0xd32   :  { %1007 = vrot.lane.b32.xlu1 %v1006_v60, %s2276_s26 }
 0xd67   :  { %v1179_v61 = vpop.f32.mrf.mxu0 }
 0xd68   :  { %v1184_v63 = vrot.slane %v1179_v61, 2 }
 0xd69   :  { %v2090_v0 = vpop.f32.mrf.mxu0 }
 0xd6a   :  { %1185 = vrot.lane.b32.xlu0 %v1184_v63, %s2272_s23 }
 0xda4   :  { %v1008_v1 = vpop.permute.xlu1 %1007 }
 0xda5   :  { %2082 = vmatmul.mubr.msk.f32.vlgmr.msra.gmra.mxu1 %vm36_vm0, %v1008_v1 }
 0xda6   :  { %2092 = vmatpush3.msra.mxu1 %v2345_v4  ;;  %2095 = vmatprep.mubr.msk.f32.mxu1 %vm2271_vm1, %v2270_v3 }
 0xda7   :  { %2093 = vmatprep.subr.mxu1 %v2270_v3 }
 0xda8   :  { %2094 = vmatpush3.msra.mxu1 %v2354_v6 }
 0xda9   :  { %2105 = vmatprep.subr.mxu1 %v2270_v3 }
 0xddc   :  { %v1186_v2 = vpop.permute.xlu0 %1185 }
 0xddd   :  { %v1188_v5 = vadd.f32 %v1186_v2, %v2394_v13 }
 0xddf   :  { %2206 = vtanh.f32 %v1188_v5  ;;  %v1949_v10 = vmul.f32 -1.442695, %v1188_v5 }
 0xde1   :  { %2208 = vpow2.f32 %v1949_v10 }
 0xdec   :  { %v2207_v9 = vpop.eup %2206 }
 0xded   :  { %1201 = vrot.lane.b32.xlu1 %v2207_v9, %s2273_s24 }
 0xdee   :  { %v2209_v11 = vpop.eup %2208 }
 0xdef   :  { %v1192_v12 = vadd.f32 1.0, %v2209_v11 }
 0xdf1   :  { %2210 = vrcp.f32 %v1192_v12 }
 0xdfe   :  { %v2211_v14 = vpop.eup %2210 }
 0xdff   :  { %v1199_v26 = vmul.f32 %v2211_v14, %v1197_v25 }
 0xe5f   :  { %v1202_v15 = vpop.permute.xlu1 %1201 }
 0xe60   :  { %v1204_v17 = vmul.f32 %v2211_v14, %v1202_v15 }
 0xe62   :  { %1206 = vrot.lane.b32.xlu0 %v1204_v17, %s2274_s4 }
 0xe65   :  { %v1077_v19 = vpop.f32.mrf.mxu1 }
 0xe66   :  { %v1081_v21 = vadd.f32 %v1077_v19, %v2397_v18 }
 0xe67   :  { %v2083_v22 = vpop.f32.mrf.mxu1 }
 0xe68   :  { %2212 = vtanh.f32 %v1081_v21  ;;  %v1947_v24 = vmul.f32 -1.442695, %v1081_v21 }
 0xe6a   :  { %2214 = vpow2.f32 %v1947_v24 }
 0xe75   :  { %v2213_v23 = vpop.eup %2212 }
 0xe76   :  { %1094 = vrot.lane.b32.xlu0 %v2213_v23, %s2273_s24 }
 0xe77   :  { %v2215_v27 = vpop.eup %2214 }
 0xe78   :  { %v1085_v30 = vadd.f32 1.0, %v2215_v27 }
 0xed4   :  { %v1207_v28 = vpop.permute.xlu0 %1206 }
 0xed5   :  { %v2557_v29 = vadd.f32 %v1207_v28, %v1199_v26 }
 0xed7   :  { %2216 = vtanh.f32 %v2557_v29  ;;  %v1418_v19 = vrot.slane %v2557_v29, 2 }
 0xed8   :  { %2218 = vrcp.f32 %v1085_v30 }
 0xee4   :  { %v2217_v31 = vpop.eup %2216 }
 0xee5   :  { %1212 = vrot.lane.b32.xlu1 %v2217_v31, %s2274_s4  ;;  %v2219_v33 = vpop.eup %2218 }
 0xee6   :  { %v1092_v41 = vmul.f32 %v2219_v33, %v1090_v39 }
 0xee8   :  { %v1095_v34 = vpop.permute.xlu0 %1094 }
 0xee9   :  { %v1097_v35 = vmul.f32 %v2219_v33, %v1095_v34 }
 0xeeb   :  { %1099 = vrot.lane.b32.xlu0 %v1097_v35, %s2274_s4 }
 0xf57   :  { %v1213_v36 = vpop.permute.xlu1 %1212 }
 0xf58   :  { %v2562_v37 = vmul.f32 %v2211_v14, %v1213_v36 }
 0xf5a   :  { %v1329_v40 = vrot.slane %v2562_v37, 6 }
 0xf5c   :  { %1330 = vrot.lane.b32.xlu1 %v1329_v40, %s2275_s25 }
 0xf5d   :  { %v1100_v42 = vpop.permute.xlu0 %1099 }
 0xf5e   :  { %v2566_v43 = vadd.f32 %v1100_v42, %v1092_v41 }
 0xf60   :  { %2220 = vtanh.f32 %v2566_v43  ;;  %v1310_v25 = vrot.slane %v2566_v43, 6 }
 0xf6d   :  { %v2221_v44 = vpop.eup %2220 }
 0xf6e   :  { %1105 = vrot.lane.b32.xlu1 %v2221_v44, %s2274_s4 }
 0xfce   :  { %v1331_v45 = vpop.permute.xlu1 %1330 }
 0xfcf   :  { %2103 = vmatmul.mubr.msk.f32.vlgmr.msra.gmra.mxu0 %vm36_vm0, %v1331_v45 }
 0xfd0   :  { %2113 = vmatpush3.msra.mxu0 %v2359_v7  ;;  %2116 = vmatprep.mubr.msk.f32.mxu0 %vm2271_vm1, %v2270_v3 }
 0xfd1   :  { %2114 = vmatprep.subr.mxu0 %v2270_v3 }
 0xfd2   :  { %2115 = vmatpush3.msra.mxu0 %v2368_v8 }
 0xfd3   :  { %2126 = vmatprep.subr.mxu0 %v2270_v3 }
 0xfe0   :  { %v1106_v46 = vpop.permute.xlu1 %1105 }
 0xfe1   :  { %v1108_v47 = vmul.f32 %v2219_v33, %v1106_v46 }
 0xfe3   :  { %1217 = vrot.lane.b32.xlu0 %v1108_v47, %s2276_s26 }
0x1055   :  { %v2578_v49 = vpop.permute.xlu0 %1217 }
0x1056   :  { %2096 = vmatmul.mubr.msk.f32.vlgmr.msra.gmra.mxu1 %vm36_vm0, %v2578_v49 }
0x1057   :  { %2106 = vmatpush3.msra.mxu1 %v2345_v4  ;;  %2109 = vmatprep.mubr.msk.f32.mxu1 %vm2271_vm1, %v2270_v3 }
0x1058   :  { %2107 = vmatprep.subr.mxu1 %v2270_v3 }
0x1059   :  { %2108 = vmatpush3.msra.mxu1 %v2354_v6 }
0x105a   :  { %2119 = vmatprep.subr.mxu1 %v2270_v3 }
0x108f   :  { %v1400_v50 = vpop.f32.mrf.mxu0 }
0x1090   :  { %v1405_v51 = vrot.slane %v1400_v50, 4 }
0x1091   :  { %v2104_v52 = vpop.f32.mrf.mxu0 }
0x1092   :  { %1406 = vrot.lane.b32.xlu1 %v1405_v51, %s2272_s23 }
0x1104   :  { %v1407_v53 = vpop.permute.xlu1 %1406 }
0x1105   :  { %v1409_v54 = vadd.f32 %v1407_v53, %v2394_v13 }
0x1107   :  { %2222 = vtanh.f32 %v1409_v54  ;;  %v1953_v63 = vmul.f32 -1.442695, %v1409_v54 }
0x1114   :  { %v2223_v55 = vpop.eup %2222 }
0x1115   :  { %1422 = vrot.lane.b32.xlu0 %v2223_v55, %s2273_s24 }
0x1116   :  { %v1294_v56 = vpop.f32.mrf.mxu1 }
0x1117   :  { %v1299_v57 = vrot.slane %v1294_v56, 6 }
0x1118   :  { %v2097_v58 = vpop.f32.mrf.mxu1 }
0x1119   :  { %v1301_v60 = vadd.f32 %v1299_v57, %v2397_v18 }
0x111b   :  { %2224 = vtanh.f32 %v1301_v60  ;;  %v1951_v2 = vmul.f32 -1.442695, %v1301_v60 }
0x111c   :  { %2226 = vpow2.f32 %v1953_v63 }
0x1128   :  { %v2225_v61 = vpop.eup %2224 }
0x1129   :  { %1314 = vrot.lane.b32.xlu0 %v2225_v61, %s2273_s24  ;;  %v2227_v0 = vpop.eup %2226 }
0x112a   :  { %v1413_v1 = vadd.f32 1.0, %v2227_v0 }
0x112c   :  { %2228 = vrcp.f32 %v1413_v1 }
0x112d   :  { %2230 = vpow2.f32 %v1951_v2 }
0x1139   :  { %v2229_v5 = vpop.eup %2228 }
0x113a   :  { %v2231_v9 = vpop.eup %2230  ;;  %v1420_v21 = vmul.f32 %v2229_v5, %v1418_v19 }
0x113b   :  { %v1305_v12 = vadd.f32 1.0, %v2231_v9 }
0x113d   :  { %2232 = vrcp.f32 %v1305_v12 }
0x114a   :  { %v2233_v14 = vpop.eup %2232 }
0x114b   :  { %v1312_v26 = vmul.f32 %v2233_v14, %v1310_v25 }
0x1187   :  { %v1423_v10 = vpop.permute.xlu0 %1422 }
0x1188   :  { %v1425_v11 = vmul.f32 %v2229_v5, %v1423_v10 }
0x118a   :  { %1427 = vrot.lane.b32.xlu1 %v1425_v11, %s2274_s4 }
0x119b   :  { %v1315_v15 = vpop.permute.xlu0 %1314 }
0x119c   :  { %v1317_v17 = vmul.f32 %v2233_v14, %v1315_v15 }
0x119e   :  { %1319 = vrot.lane.b32.xlu0 %v1317_v17, %s2274_s4 }
0x11fc   :  { %v1428_v22 = vpop.permute.xlu1 %1427 }
0x11fd   :  { %v2596_v23 = vadd.f32 %v1428_v22, %v1420_v21 }
0x11ff   :  { %2234 = vtanh.f32 %v2596_v23  ;;  %v1642_v9 = vrot.slane %v2596_v23, 2 }
0x120c   :  { %v2235_v24 = vpop.eup %2234 }
0x120d   :  { %1433 = vrot.lane.b32.xlu1 %v2235_v24, %s2274_s4 }
0x1210   :  { %v1320_v27 = vpop.permute.xlu0 %1319 }
0x1211   :  { %v1322_v28 = vadd.f32 %v1320_v27, %v1312_v26 }
0x1213   :  { %2236 = vtanh.f32 %v1322_v28  ;;  %v1534_v63 = vrot.slane %v1322_v28, 6 }
0x1220   :  { %v2237_v30 = vpop.eup %2236 }
0x1221   :  { %1325 = vrot.lane.b32.xlu0 %v2237_v30, %s2274_s4 }
0x127f   :  { %v1434_v31 = vpop.permute.xlu1 %1433 }
0x1280   :  { %v2602_v29 = vmul.f32 %v2229_v5, %v1434_v31 }
0x1282   :  { %v1553_v33 = vrot.slane %v2602_v29, 4 }
0x1284   :  { %1554 = vrot.lane.b32.xlu1 %v1553_v33, %s2275_s25 }
0x1293   :  { %v1326_v34 = vpop.permute.xlu0 %1325 }
0x1294   :  { %v2606_v35 = vmul.f32 %v2233_v14, %v1326_v34 }
0x1296   :  { %v1447_v36 = vrot.slane %v2606_v35, 2 }
0x1298   :  { %1448 = vrot.lane.b32.xlu1 %v1447_v36, %s2276_s26 }
0x12f6   :  { %v1555_v39 = vpop.permute.xlu1 %1554 }
0x12f7   :  { %2117 = vmatmul.mubr.msk.f32.vlgmr.msra.gmra.mxu0 %vm36_vm0, %v1555_v39 }
0x12f8   :  { %2127 = vmatpush3.msra.mxu0 %v2359_v7  ;;  %2130 = vmatprep.mubr.msk.f32.mxu0 %vm2271_vm1, %v2270_v3 }
0x12f9   :  { %2128 = vmatprep.subr.mxu0 %v2270_v3 }
0x12fa   :  { %2129 = vmatpush3.msra.mxu0 %v2368_v8 }
0x130a   :  { %v1449_v40 = vpop.permute.xlu1 %1448 }
0x130b   :  { %2110 = vmatmul.mubr.msk.f32.vlgmr.msra.gmra.mxu1 %vm36_vm0, %v1449_v40 }
0x130c   :  { %2120 = vmatpush3.msra.mxu1 %v2345_v4  ;;  %2123 = vmatprep.mubr.msk.f32.mxu1 %vm2271_vm1, %v2270_v3 }
0x130d   :  { %2121 = vmatprep.subr.mxu1 %v2270_v3 }
0x130e   :  { %2122 = vmatpush3.msra.mxu1 %v2354_v6 }
0x13b7   :  { %v1624_v7 = vpop.f32.mrf.mxu0 }
0x13b8   :  { %v1629_v41 = vrot.slane %v1624_v7, 6 }
0x13b9   :  { %v2118_v42 = vpop.f32.mrf.mxu0 }
0x13ba   :  { %1630 = vrot.lane.b32.xlu0 %v1629_v41, %s2272_s23 }
0x13cb   :  { %v1518_v43 = vpop.f32.mrf.mxu1 }
0x13cc   :  { %v1523_v44 = vrot.slane %v1518_v43, 4 }
0x13cd   :  { %v2111_v8 = vpop.f32.mrf.mxu1 }
0x13ce   :  { %v1525_v45 = vadd.f32 %v1523_v44, %v2397_v18 }
0x13d0   :  { %2238 = vtanh.f32 %v1525_v45  ;;  %v1955_v4 = vmul.f32 -1.442695, %v1525_v45 }
0x13d2   :  { %2240 = vpow2.f32 %v1955_v4 }
0x13dd   :  { %v2239_v46 = vpop.eup %2238 }
0x13de   :  { %1538 = vrot.lane.b32.xlu0 %v2239_v46, %s2273_s24 }
0x13df   :  { %v2241_v6 = vpop.eup %2240 }
0x13e0   :  { %v1529_v51 = vadd.f32 1.0, %v2241_v6 }
0x142c   :  { %v1631_v47 = vpop.permute.xlu0 %1630 }
0x142d   :  { %v1633_v3 = vadd.f32 %v1631_v47, %v2394_v13 }
0x142f   :  { %2242 = vtanh.f32 %v1633_v3  ;;  %v1957_v55 = vmul.f32 -1.442695, %v1633_v3 }
0x1430   :  { %2244 = vrcp.f32 %v1529_v51 }
0x1431   :  { %2246 = vpow2.f32 %v1957_v55 }
0x143c   :  { %v2243_v50 = vpop.eup %2242 }
0x143d   :  { %1646 = vrot.lane.b32.xlu1 %v2243_v50, %s2273_s24  ;;  %v2245_v52 = vpop.eup %2244 }
0x143e   :  { %v2247_v56 = vpop.eup %2246  ;;  %v1536_v0 = vmul.f32 %v2245_v52, %v1534_v63 }
0x143f   :  { %v1637_v57 = vadd.f32 1.0, %v2247_v56 }
0x1441   :  { %2248 = vrcp.f32 %v1637_v57 }
0x144e   :  { %v2249_v58 = vpop.eup %2248 }
0x144f   :  { %v1644_v10 = vmul.f32 %v2249_v58, %v1642_v9 }
0x1450   :  { %v1539_v53 = vpop.permute.xlu0 %1538 }
0x1451   :  { %v1541_v54 = vmul.f32 %v2245_v52, %v1539_v53 }
0x1453   :  { %1543 = vrot.lane.b32.xlu0 %v1541_v54, %s2274_s4 }
0x14af   :  { %v1647_v60 = vpop.permute.xlu1 %1646 }
0x14b0   :  { %v1649_v61 = vmul.f32 %v2249_v58, %v1647_v60 }
0x14b2   :  { %1651 = vrot.lane.b32.xlu1 %v1649_v61, %s2274_s4 }
0x14c5   :  { %v1544_v1 = vpop.permute.xlu0 %1543 }
0x14c6   :  { %v1546_v2 = vadd.f32 %v1544_v1, %v1536_v0 }
0x14c8   :  { %2250 = vtanh.f32 %v1546_v2  ;;  %v1758_v8 = vrot.slane %v1546_v2, 6 }
0x14d5   :  { %v2251_v5 = vpop.eup %2250 }
0x14d6   :  { %1549 = vrot.lane.b32.xlu0 %v2251_v5, %s2274_s4 }
0x1524   :  { %v1652_v11 = vpop.permute.xlu1 %1651 }
0x1525   :  { %v2631_v12 = vadd.f32 %v1652_v11, %v1644_v10 }
0x1527   :  { %2252 = vtanh.f32 %v2631_v12  ;;  %v1865_v56 = vrot.slane %v2631_v12, 2 }
0x1534   :  { %v2253_v14 = vpop.eup %2252 }
0x1535   :  { %1657 = vrot.lane.b32.xlu1 %v2253_v14, %s2274_s4 }
0x1548   :  { %v1550_v15 = vpop.permute.xlu0 %1549 }
0x1549   :  { %v1552_v17 = vmul.f32 %v2245_v52, %v1550_v15 }
0x154b   :  { %v1671_v19 = vrot.slane %v1552_v17, 4 }
0x154d   :  { %1672 = vrot.lane.b32.xlu0 %v1671_v19, %s2276_s26 }
0x15a7   :  { %v1658_v21 = vpop.permute.xlu1 %1657 }
0x15a8   :  { %v2636_v22 = vmul.f32 %v2249_v58, %v1658_v21 }
0x15aa   :  { %v1777_v24 = vrot.slane %v2636_v22, 2 }
0x15ac   :  { %1778 = vrot.lane.b32.xlu1 %v1777_v24, %s2275_s25 }
0x15bf   :  { %v1673_v23 = vpop.permute.xlu0 %1672 }
0x15c0   :  { %2124 = vmatmul.mubr.msk.f32.vlgmr.msra.gmra.mxu1 %vm36_vm0, %v1673_v23 }
0x161e   :  { %v1779_v25 = vpop.permute.xlu1 %1778 }
0x161f   :  { %2131 = vmatmul.mubr.msk.f32.vlgmr.msra.gmra.mxu0 %vm36_vm0, %v1779_v25 }
0x1680   :  { %v1742_v26 = vpop.f32.mrf.mxu1 }
0x1681   :  { %v1747_v27 = vrot.slane %v1742_v26, 2 }
0x1682   :  { %v2125_v28 = vpop.f32.mrf.mxu1 }
0x1683   :  { %v1749_v30 = vadd.f32 %v1747_v27, %v2397_v18 }
0x1685   :  { %2254 = vtanh.f32 %v1749_v30  ;;  %v1959_v34 = vmul.f32 -1.442695, %v1749_v30 }
0x1687   :  { %2256 = vpow2.f32 %v1959_v34 }
0x1692   :  { %v2255_v31 = vpop.eup %2254 }
0x1693   :  { %1762 = vrot.lane.b32.xlu0 %v2255_v31, %s2273_s24 }
0x1694   :  { %v2257_v39 = vpop.eup %2256 }
0x1695   :  { %v1753_v40 = vadd.f32 1.0, %v2257_v39 }
0x1697   :  { %2258 = vrcp.f32 %v1753_v40 }
0x16a4   :  { %v2259_v7 = vpop.eup %2258 }
0x16a5   :  { %v1760_v45 = vmul.f32 %v2259_v7, %v1758_v8 }
0x16df   :  { %v1848_v33 = vpop.f32.mrf.mxu0 }
0x16e0   :  { %1853 = vrot.lane.b32.xlu1 %v1848_v33, %s2272_s23 }
0x16e1   :  { %v2132_v36 = vpop.f32.mrf.mxu0 }
0x1705   :  { %v1763_v41 = vpop.permute.xlu0 %1762 }
0x1706   :  { %v1765_v42 = vmul.f32 %v2259_v7, %v1763_v41 }
0x1708   :  { %1767 = vrot.lane.b32.xlu0 %v1765_v42, %s2274_s4 }
0x1752   :  { %v1854_v43 = vpop.permute.xlu1 %1853 }
0x1753   :  { %v1856_v18 = vadd.f32 %v1854_v43, %v2394_v13 }
0x1755   :  { %2260 = vtanh.f32 %v1856_v18  ;;  %v1961_v13 = vmul.f32 -1.442695, %v1856_v18 }
0x1762   :  { %v2261_v44 = vpop.eup %2260 }
0x1763   :  { %1869 = vrot.lane.b32.xlu1 %v2261_v44, %s2273_s24 }
0x177a   :  { %v1768_v46 = vpop.permute.xlu0 %1767 }
0x177b   :  { %v1770_v4 = vadd.f32 %v1768_v46, %v1760_v45 }
0x177d   :  { %2262 = vtanh.f32 %v1770_v4 }
0x177e   :  { %2264 = vpow2.f32 %v1961_v13 }
0x178a   :  { %v2263_v47 = vpop.eup %2262 }
0x178b   :  { %1773 = vrot.lane.b32.xlu0 %v2263_v47, %s2274_s4  ;;  %v2265_v3 = vpop.eup %2264 }
0x178c   :  { %v1860_v6 = vadd.f32 1.0, %v2265_v3 }
0x178e   :  { %2266 = vrcp.f32 %v1860_v6 }
0x178f   :  { %327 = vrot.lane.b32.xlu0 %v2408_v38, %s2277_s29 }
0x1793   :  { %550 = vrot.lane.b32.xlu0 %v2447_v20, %s2277_s29 }
0x1797   :  { %776 = vrot.lane.b32.xlu0 %v2486_v62, %s2277_s29 }
0x179b   :  { %1001 = vrot.lane.b32.xlu0 %v2525_v48, %s2277_s29  ;;  %v2267_v38 = vpop.eup %2266 }
0x179c   :  { %v1867_v57 = vmul.f32 %v2267_v38, %v1865_v56 }
0x179f   :  { %1438 = vrot.lane.b32.xlu0 %v2606_v35, %s2276_s26 }
0x17a3   :  { %1662 = vrot.lane.b32.xlu0 %v1552_v17, %s2276_s26 }
0x17d5   :  { %v1870_v50 = vpop.permute.xlu1 %1869 }
0x17d6   :  { %v1872_v51 = vmul.f32 %v2267_v38, %v1870_v50 }
0x17d8   :  { %1874 = vrot.lane.b32.xlu1 %v1872_v51, %s2274_s4 }
0x17fd   :  { %v1774_v20 = vpop.permute.xlu0 %1773 }
0x17fe   :  { %v1776_v62 = vmul.f32 %v2259_v7, %v1774_v20 }
0x1800   :  { %1885 = vrot.lane.b32.xlu0 %v1776_v62, %s2276_s26 }
0x1801   :  { %v328_v48 = vpop.permute.xlu0 %327 }
0x1802   :  { %331 = vst.msk [vmem:[%s2761_s5 + $0x8] sm:$0xc0] %vm330_vm3, %v328_v48 }
0x1804   :  { %1896 = vrot.lane.b32.xlu0 %v1770_v4, %s2278_s11 }
0x1805   :  { %v551_v35 = vpop.permute.xlu0 %550 }
0x1806   :  { %554 = vst.msk [vmem:[%s2761_s5 + $0x8] sm:$0x30] %vm553_vm4, %v551_v35 }
0x1809   :  { %v777_v52 = vpop.permute.xlu0 %776 }
0x180a   :  { %780 = vst.msk [vmem:[%s2761_s5 + $0x8] sm:$0xc] %vm779_vm5, %v777_v52 }
0x180d   :  { %v1002_v53 = vpop.permute.xlu0 %1001 }
0x180e   :  { %1005 = vst.msk [vmem:[%s2761_s5 + $0x8] sm:$0x3] %vm1004_vm6, %v1002_v53 }
0x180f   :  { %1220 = vst.msk [vmem:[%s2761_s5 + $0x8] sm:$0x3] %vm324_vm2, %v2578_v49 }
0x1811   :  { %v1439_v54 = vpop.permute.xlu0 %1438 }
0x1812   :  { %1441 = vst.msk [vmem:[%s2761_s5 + $0x8] sm:$0xc] %vm547_vm7, %v1439_v54 }
0x1815   :  { %v1663_v55 = vpop.permute.xlu0 %1662 }
0x1816   :  { %1665 = vst.msk [vmem:[%s2761_s5 + $0x8] sm:$0x30] %vm773_vm8, %v1663_v55 }
0x184a   :  { %v1875_v58 = vpop.permute.xlu1 %1874 }
0x184b   :  { %v1877_v60 = vadd.f32 %v1875_v58, %v1867_v57 }
0x184d   :  { %2268 = vtanh.f32 %v1877_v60  ;;  %1905 = vrot.lane.b32.xlu0 %v1877_v60, %s2277_s29 }
0x185a   :  { %v2269_v49 = vpop.eup %2268 }
0x185b   :  { %1880 = vrot.lane.b32.xlu1 %v2269_v49, %s2274_s4 }
0x185f   :  { %544 = vrot.lane.b32.xlu1 %v2464_v32, %s2276_s26 }
0x1863   :  { %770 = vrot.lane.b32.xlu1 %v2503_v16, %s2276_s26 }
0x1867   :  { %995 = vrot.lane.b32.xlu1 %v2539_v59, %s2276_s26 }
0x186b   :  { %1222 = vrot.lane.b32.xlu1 %v2562_v37, %s2277_s29 }
0x186f   :  { %1443 = vrot.lane.b32.xlu1 %v2602_v29, %s2277_s29 }
0x1872   :  { %v1886_v61 = vpop.permute.xlu0 %1885 }
0x1873   :  { %1888 = vst.msk [vmem:[%s2761_s5 + $0x8] sm:$0xc0] %vm998_vm9, %v1886_v61  ;;  %1894 = vst.msk [vmem:[%s2762_s6 - $0x6] sm:$0xc0] %vm998_vm9, %v1886_v61  ;;  %1667 = vrot.lane.b32.xlu1 %v2636_v22, %s2277_s29 }
0x1876   :  { %v1897_v32 = vpop.permute.xlu0 %1896 }
0x1877   :  { %1899 = vst.msk [vmem:[%s2763_s7 - $0x6] sm:$0xc0] %vm998_vm9, %v1897_v32 }
0x18bf   :  { %v1906_v16 = vpop.permute.xlu0 %1905 }
0x18c0   :  { %1908 = vst.msk [vmem:[%s2764_s9] sm:$0x3] %vm324_vm2, %v1906_v16 }
0x18cd   :  { %v1881_v59 = vpop.permute.xlu1 %1880 }
0x18ce   :  { %v1883_v37 = vmul.f32 %v2267_v38, %v1881_v59 }
0x18d0   :  { %1890 = vrot.lane.b32.xlu1 %v1883_v37, %s2277_s29 }
0x18d1   :  { %v545_v29 = vpop.permute.xlu1 %544 }
0x18d2   :  { %548 = vst.msk [vmem:[%s2761_s5] sm:$0xc] %vm547_vm7, %v545_v29 }
0x18d4   :  { %1900 = vrot.lane.b32.xlu1 %v1883_v37, %s2275_s25 }
0x18d5   :  { %v771_v63 = vpop.permute.xlu1 %770 }
0x18d6   :  { %774 = vst.msk [vmem:[%s2761_s5] sm:$0x30] %vm773_vm8, %v771_v63 }
0x18d9   :  { %v996_v0 = vpop.permute.xlu1 %995 }
0x18da   :  { %999 = vst.msk [vmem:[%s2761_s5] sm:$0xc0] %vm998_vm9, %v996_v0 }
0x18dd   :  { %v1223_v1 = vpop.permute.xlu1 %1222 }
0x18de   :  { %1225 = vst.msk [vmem:[%s2761_s5] sm:$0xc0] %vm330_vm3, %v1223_v1 }
0x18e1   :  { %v1444_v2 = vpop.permute.xlu1 %1443 }
0x18e2   :  { %1446 = vst.msk [vmem:[%s2761_s5] sm:$0x30] %vm553_vm4, %v1444_v2 }
0x18e5   :  { %v1668_v5 = vpop.permute.xlu1 %1667 }
0x18e6   :  { %1670 = vst.msk [vmem:[%s2761_s5] sm:$0xc] %vm779_vm5, %v1668_v5 }
0x1942   :  { %v1891_v9 = vpop.permute.xlu1 %1890 }
0x1943   :  { %1893 = vst.msk [vmem:[%s2761_s5] sm:$0x3] %vm1004_vm6, %v1891_v9 }
0x1946   :  { %v1901_v10 = vpop.permute.xlu1 %1900 }
0x1947   :  { %1903 = vst.msk [vmem:[%s2765_s8] sm:$0x3] %vm324_vm2, %v1901_v10 }

// kernel: model_forward.7
= control target key start
LH: loop header
LB: loop body
LE: loop exit
PB: predicated region body
PF: predicated region fallthrough
CT: control target
= control target key end

     0   :  { %vm51_vm0 = vcmask 1043456   ;;  %v2578_v1 = vmov 0.0   ;;  %vm2579_vm1 = vmmov 0   ;;  %vm44_vm2 = vcmask 162816   ;;  %s2580_s28 = smov 32   ;;  %s2581_s23 = smov 64   ;;  %s3209_s1 = inlined_call_operand.vmem [shape: f32[20,128], index: 1, kind: input, shape index: {}]   ;;  %s3210_s2 = inlined_call_operand.vmem [shape: f32[32,128], index: 2, kind: input, shape index: {}]   ;;  %s3211_s0 = inlined_call_operand.vmem [shape: f32[16,20], index: 0, kind: input, shape index: {}]   ;;  %s3212_s6 = inlined_call_operand.vmem [shape: f32[2,64], index: 6, kind: input, shape index: {}]   ;;  %s3213_s3 = inlined_call_operand.vmem [shape: f32[1,128], index: 3, kind: input, shape index: {}]   ;;  %s3214_s4 = inlined_call_operand.vmem [shape: f32[64,128], index: 4, kind: input, shape index: {}]   ;;  %s3215_s5 = inlined_call_operand.vmem [shape: f32[1,128], index: 5, kind: input, shape index: {}]   ;;  %s3216_s7 = inlined_call_operand.vmem [shape: f32[32,24], index: 7, kind: input, shape index: {}]   ;;  %s3217_s8 = inlined_call_operand.vmem [shape: f32[1,24], index: 8, kind: input, shape index: {}]   ;;  %s3218_s9 = inlined_call_operand.vmem [shape: f32[16,24], index: 9, kind: output, shape index: {}]  }
   0x1   :  { %v36_v0 = vld [vmem:[%s3209_s1 + $0x10] sm:$0xf]  ;;  %2173 = vmatprep.subr.mxu1 %v2578_v1  ;;  %v2640_v2 = vld [vmem:[%s3210_s2 + $0x18] sm:$0xff]  ;;  %v35_v3 = vld [vmem:[%s3209_s1 + $0x8] sm:$0xff]  ;;  %2181 = vmatprep.mubr.msk.f32.mxu1 %vm2579_vm1, %v2578_v1  ;;  %vm144_vm3 = vcmask 261120   ;;  %vm257_vm4 = vcmask 523264  }
   0x2   :  { %2164 = vmatprep.subr.msk.mxu0 %vm51_vm0, %v36_v0  ;;  %2174 = vmatpush3.msra.mxu1 %v2640_v2  ;;  %v2651_v4 = vld [vmem:[%s3210_s2 + $0x10] sm:$0xff]  ;;  %v34_v5 = vld [vmem:[%s3209_s1] sm:$0xff]  ;;  %v2664_v7 = vld [vmem:[%s3210_s2 + $0x8] sm:$0xff]  ;;  %s2582_s25 = smov 96   ;;  %vm359_vm5 = vcmask 254976   ;;  %vm1970_vm6 = vcmask 195584  }
   0x3   :  { %2165 = vmatpush3.msk.msra.mxu0 %vm51_vm0, %v36_v0  ;;  %2175 = vmatprep.subr.mxu1 %v2578_v1  ;;  %v32_v6 = vld [vmem:[%s3211_s0] sm:$0xff]  ;;  %v33_v8 = vld [vmem:[%s3211_s0 + $0x8] sm:$0xff]  ;;  %v2718_v29 = vld [vmem:[%s3214_s4 + $0x38] sm:$0xff] }
   0x4   :  { %2166 = vmatprep.subr.mxu0 %v35_v3  ;;  %2176 = vmatpush3.msra.mxu1 %v2651_v4  ;;  %v2673_v9 = vld [vmem:[%s3210_s2] sm:$0xff]  ;;  %v2723_v30 = vld [vmem:[%s3214_s4 + $0x30] sm:$0xff]  ;;  %v2730_v31 = vld [vmem:[%s3214_s4 + $0x28] sm:$0xff] }
   0x5   :  { %2167 = vmatpush3.msra.mxu0 %v35_v3  ;;  %2177 = vmatprep.subr.mxu1 %v2578_v1  ;;  %v2679_v10 = vld [vmem:[%s3212_s6] sm:$0x3]  ;;  %v2744_v33 = vld [vmem:[%s3214_s4 + $0x18] sm:$0xff]  ;;  %v2751_v34 = vld [vmem:[%s3214_s4 + $0x10] sm:$0xff] }
   0x6   :  { %2168 = vmatprep.subr.mxu0 %v34_v5  ;;  %2170 = vmatprep.mubr.msk.f32.mxu0 %vm44_vm2, %v32_v6  ;;  %v2001_v11 = vld [vmem:[%s3213_s3] ss:$0 sm:$0xff]  ;;  %v2759_v36 = vld [vmem:[%s3214_s4 + $0x8] sm:$0xff] }
   0x7   :  { %2169 = vmatpush3.msra.mxu0 %v34_v5  ;;  %2178 = vmatpush3.msra.mxu1 %v2664_v7  ;;  %v2737_v32 = vld [vmem:[%s3214_s4 + $0x20] sm:$0xff] }
   0x8   :  { %2171 = vmatmul.mubr.msk.f32.vlgmr.msra.gmra.mxu0 %vm44_vm2, %v33_v8  ;;  %2179 = vmatprep.subr.mxu1 %v2578_v1  ;;  %v2768_v37 = vld [vmem:[%s3214_s4] sm:$0xff] }
   0x9   :  { %2180 = vmatpush3.msra.mxu1 %v2673_v9  ;;  %2184 = vmatprep.subr.mxu0 %v2578_v1  ;;  %v2807_v43 = vld [vmem:[%s3215_s5] ss:$0 sm:$0xff] }
   0xa   :  { %2182 = vmatmul.mubr.msk.f32.vlgmr.msra.gmra.mxu1 %vm144_vm3, %v2679_v10  ;;  %2203 = vmatprep.subr.mxu1 %v2578_v1 }
   0xb   :  { %2204 = vmatpush3.msra.mxu1 %v2640_v2  ;;  %2211 = vmatprep.mubr.msk.f32.mxu1 %vm2579_vm1, %v2578_v1 }
   0xc   :  { %2205 = vmatprep.subr.mxu1 %v2578_v1  ;;  %2200 = vmatprep.mubr.msk.f32.mxu0 %vm2579_vm1, %v2578_v1 }
   0xd   :  { %2206 = vmatpush3.msra.mxu1 %v2651_v4  ;;  %2185 = vmatpush3.msra.mxu0 %v2718_v29 }
   0xe   :  { %2207 = vmatprep.subr.mxu1 %v2578_v1  ;;  %2186 = vmatprep.subr.mxu0 %v2578_v1 }
   0xf   :  { %2208 = vmatpush3.msra.mxu1 %v2664_v7  ;;  %2187 = vmatpush3.msra.mxu0 %v2723_v30 }
  0x10   :  { %2209 = vmatprep.subr.mxu1 %v2578_v1  ;;  %2188 = vmatprep.subr.mxu0 %v2578_v1 }
  0x11   :  { %2210 = vmatpush3.msra.mxu1 %v2673_v9  ;;  %2189 = vmatpush3.msra.mxu0 %v2730_v31 }
  0x12   :  { %2214 = vmatprep.subr.mxu1 %v2578_v1  ;;  %2190 = vmatprep.subr.mxu0 %v2578_v1 }
  0x13   :  { %2191 = vmatpush3.msra.mxu0 %v2737_v32 }
  0x14   :  { %2192 = vmatprep.subr.mxu0 %v2578_v1 }
  0x15   :  { %2193 = vmatpush3.msra.mxu0 %v2744_v33 }
  0x16   :  { %2194 = vmatprep.subr.mxu0 %v2578_v1 }
  0x17   :  { %2195 = vmatpush3.msra.mxu0 %v2751_v34 }
  0x18   :  { %2196 = vmatprep.subr.mxu0 %v2578_v1 }
  0x19   :  { %2197 = vmatpush3.msra.mxu0 %v2759_v36 }
  0x1a   :  { %2198 = vmatprep.subr.mxu0 %v2578_v1 }
  0x1b   :  { %2199 = vmatpush3.msra.mxu0 %v2768_v37 }
  0x1c   :  { %2233 = vmatprep.subr.mxu0 %v2578_v1 }
  0xc8   :  { %v2172_v12 = vpop.f32.mrf.mxu0 }
  0xc9   :  { %v2702_v13 = vadd.f32 %v2172_v12, %v2001_v11 }
  0xca   :  { %v121_v14 = vpop.f32.mrf.mxu0  ;;  %v214_v15 = vpop.f32.mrf.mxu1 }
  0xcb   :  { %v2704_v16 = vadd.f32 %v2001_v11, %v121_v14 }
  0xcc   :  { %v2183_v17 = vpop.f32.mrf.mxu1 }
  0xcd   :  { %v218_v18 = vadd.f32 %v214_v15, %v2704_v16 }
  0xcf   :  { %2429 = vtanh.f32 %v218_v18  ;;  %v2006_v20 = vmul.f32 -1.442695, %v218_v18 }
  0xd1   :  { %2431 = vpow2.f32 %v2006_v20 }
  0xdc   :  { %v2430_v19 = vpop.eup %2429 }
  0xdd   :  { %228 = vrot.lane.b32.xlu0 %v2430_v19, %s2580_s28 }
  0xde   :  { %v2432_v21 = vpop.eup %2431 }
  0xdf   :  { %v222_v22 = vadd.f32 1.0, %v2432_v21 }
  0xe1   :  { %2433 = vrcp.f32 %v222_v22 }
  0xee   :  { %v2434_v23 = vpop.eup %2433 }
  0xef   :  { %v226_v26 = vmul.f32 %v2434_v23, %v2679_v10 }
 0x14f   :  { %v229_v24 = vpop.permute.xlu0 %228 }
 0x150   :  { %v231_v25 = vmul.f32 %v2434_v23, %v229_v24 }
 0x152   :  { %233 = vrot.lane.b32.xlu0 %v231_v25, %s2580_s28 }
 0x156   :  { %247 = vrot.lane.b32.xlu0 %v2679_v10, %s2580_s28 }
 0x1c4   :  { %v234_v27 = vpop.permute.xlu0 %233 }
 0x1c5   :  { %v2712_v28 = vadd.f32 %v234_v27, %v226_v26 }
 0x1c7   :  { %2435 = vtanh.f32 %v2712_v28  ;;  %v445_v3 = vrot.slane %v2712_v28, 6 }
 0x1c8   :  { %v248_v40 = vpop.permute.xlu0 %247 }
 0x1d4   :  { %v2436_v35 = vpop.eup %2435 }
 0x1d5   :  { %239 = vrot.lane.b32.xlu1 %v2436_v35, %s2580_s28 }
 0x247   :  { %v240_v38 = vpop.permute.xlu1 %239 }
 0x248   :  { %v242_v39 = vmul.f32 %v2434_v23, %v240_v38 }
 0x24a   :  { %244 = vrot.lane.b32.xlu1 %v242_v39, %s2581_s23 }
 0x2bc   :  { %v245_v41 = vpop.permute.xlu1 %244 }
 0x2bd   :  { %v250_v42 = vsel %vm144_vm3, %v245_v41, %v248_v40  ;;  %2212 = vmatmul.mubr.msk.f32.vlgmr.msra.gmra.mxu1 %vm144_vm3, %v245_v41 }
 0x2be   :  { %2201 = vmatmul.mubr.msk.f32.vlgmr.msra.gmra.mxu0 %vm257_vm4, %v250_v42  ;;  %2215 = vmatpush3.msra.mxu1 %v2718_v29 }
 0x2bf   :  { %2216 = vmatprep.subr.mxu1 %v2578_v1  ;;  %2234 = vmatpush3.msra.mxu0 %v2640_v2 }
 0x2c0   :  { %2217 = vmatpush3.msra.mxu1 %v2723_v30  ;;  %2235 = vmatprep.subr.mxu0 %v2578_v1 }
 0x2c1   :  { %2218 = vmatprep.subr.mxu1 %v2578_v1  ;;  %2236 = vmatpush3.msra.mxu0 %v2651_v4 }
 0x2c2   :  { %2219 = vmatpush3.msra.mxu1 %v2730_v31  ;;  %2237 = vmatprep.subr.mxu0 %v2578_v1 }
 0x2c3   :  { %2220 = vmatprep.subr.mxu1 %v2578_v1  ;;  %2238 = vmatpush3.msra.mxu0 %v2664_v7 }
 0x2c4   :  { %2221 = vmatpush3.msra.mxu1 %v2737_v32  ;;  %2239 = vmatprep.subr.mxu0 %v2578_v1 }
 0x2c5   :  { %2222 = vmatprep.subr.mxu1 %v2578_v1  ;;  %2230 = vmatprep.mubr.msk.f32.mxu1 %vm2579_vm1, %v2578_v1 }
 0x2c6   :  { %2223 = vmatpush3.msra.mxu1 %v2744_v33  ;;  %2240 = vmatpush3.msra.mxu0 %v2673_v9 }
 0x2c7   :  { %2224 = vmatprep.subr.mxu1 %v2578_v1  ;;  %2241 = vmatprep.mubr.msk.f32.mxu0 %vm2579_vm1, %v2578_v1 }
 0x2c8   :  { %2225 = vmatpush3.msra.mxu1 %v2751_v34  ;;  %2244 = vmatprep.subr.mxu0 %v2578_v1 }
 0x2c9   :  { %2226 = vmatprep.subr.mxu1 %v2578_v1 }
 0x2ca   :  { %2227 = vmatpush3.msra.mxu1 %v2759_v36 }
 0x2cb   :  { %2228 = vmatprep.subr.mxu1 %v2578_v1 }
 0x2cc   :  { %2229 = vmatpush3.msra.mxu1 %v2768_v37 }
 0x2cd   :  { %2263 = vmatprep.subr.mxu1 %v2578_v1 }
 0x37d   :  { %v429_v44 = vpop.f32.mrf.mxu1 }
 0x37e   :  { %v434_v45 = vrot.slane %v429_v44, 6  ;;  %v327_v46 = vpop.f32.mrf.mxu0 }
 0x37f   :  { %v328_v47 = vadd.f32 %v2807_v43, %v327_v46  ;;  %v2213_v48 = vpop.f32.mrf.mxu1 }
 0x380   :  { %v436_v49 = vadd.f32 %v434_v45, %v2704_v16  ;;  %v2202_v50 = vpop.f32.mrf.mxu0 }
 0x381   :  { %2437 = vtanh.f32 %v328_v47  ;;  %v2009_v53 = vmul.f32 -1.442695, %v328_v47 }
 0x382   :  { %2439 = vtanh.f32 %v436_v49  ;;  %v2011_v54 = vmul.f32 -1.442695, %v436_v49 }
 0x383   :  { %2441 = vpow2.f32 %v2009_v53 }
 0x384   :  { %2443 = vpow2.f32 %v2011_v54 }
 0x38e   :  { %v2438_v51 = vpop.eup %2437 }
 0x38f   :  { %v2440_v52 = vpop.eup %2439  ;;  %340 = vrot.lane.b32.xlu1 %v2438_v51, %s2580_s28 }
 0x390   :  { %449 = vrot.lane.b32.xlu0 %v2440_v52, %s2580_s28  ;;  %v2442_v55 = vpop.eup %2441 }
 0x391   :  { %v2444_v56 = vpop.eup %2443  ;;  %v334_v57 = vadd.f32 1.0, %v2442_v55 }
 0x392   :  { %v440_v58 = vadd.f32 1.0, %v2444_v56 }
 0x393   :  { %2445 = vrcp.f32 %v334_v57 }
 0x394   :  { %2447 = vrcp.f32 %v440_v58 }
 0x3a0   :  { %v2446_v59 = vpop.eup %2445 }
 0x3a1   :  { %v2448_v61 = vpop.eup %2447  ;;  %v338_v5 = vmul.f32 %v2446_v59, %v2679_v10 }
 0x3a2   :  { %v447_v8 = vmul.f32 %v2448_v61, %v445_v3 }
 0x401   :  { %v341_v60 = vpop.permute.xlu1 %340 }
 0x402   :  { %v343_v62 = vmul.f32 %v2446_v59, %v341_v60  ;;  %v450_v63 = vpop.permute.xlu0 %449 }
 0x403   :  { %v452_v0 = vmul.f32 %v2448_v61, %v450_v63 }
 0x404   :  { %345 = vrot.lane.b32.xlu1 %v343_v62, %s2580_s28 }
 0x405   :  { %454 = vrot.lane.b32.xlu0 %v452_v0, %s2580_s28 }
 0x476   :  { %v346_v6 = vpop.permute.xlu1 %345 }
 0x477   :  { %v2817_v11 = vadd.f32 %v346_v6, %v338_v5  ;;  %v455_v12 = vpop.permute.xlu0 %454 }
 0x478   :  { %v2819_v14 = vadd.f32 %v455_v12, %v447_v8 }
 0x479   :  { %2449 = vtanh.f32 %v2817_v11 }
 0x47a   :  { %2451 = vtanh.f32 %v2819_v14 }
 0x486   :  { %v2450_v15 = vpop.eup %2449 }
 0x487   :  { %v2452_v17 = vpop.eup %2451  ;;  %351 = vrot.lane.b32.xlu1 %v2450_v15, %s2580_s28 }
 0x488   :  { %460 = vrot.lane.b32.xlu0 %v2452_v17, %s2580_s28 }
 0x4f9   :  { %v352_v18 = vpop.permute.xlu1 %351 }
 0x4fa   :  { %v2825_v19 = vmul.f32 %v2446_v59, %v352_v18  ;;  %v461_v10 = vpop.permute.xlu0 %460  ;;  %v663_v59 = vrot.slane %v2819_v14, 6 }
 0x4fb   :  { %v463_v20 = vmul.f32 %v2448_v61, %v461_v10 }
 0x4fc   :  { %v468_v21 = vrot.slane %v2825_v19, 6 }
 0x4fd   :  { %465 = vrot.lane.b32.xlu1 %v463_v20, %s2581_s23  ;;  %v576_v22 = vrot.slane %v463_v20, 2 }
 0x4fe   :  { %469 = vrot.lane.b32.xlu0 %v468_v21, %s2582_s25 }
 0x501   :  { %577 = vrot.lane.b32.xlu1 %v576_v22, %s2581_s23 }
 0x56f   :  { %v466_v23 = vpop.permute.xlu1 %465 }
 0x570   :  { %v470_v24 = vpop.permute.xlu0 %469 }
 0x571   :  { %v472_v25 = vsel %vm144_vm3, %v466_v23, %v470_v24 }
 0x572   :  { %v474_v26 = vrot.slane %v472_v25, 2 }
 0x573   :  { %v578_v27 = vpop.permute.xlu1 %577 }
 0x574   :  { %2231 = vmatmul.mubr.msk.f32.vlgmr.msra.gmra.mxu1 %vm257_vm4, %v474_v26  ;;  %2242 = vmatmul.mubr.msk.f32.vlgmr.msra.gmra.mxu0 %vm144_vm3, %v578_v27 }
 0x575   :  { %2245 = vmatpush3.msra.mxu0 %v2718_v29  ;;  %2264 = vmatpush3.msra.mxu1 %v2640_v2 }
 0x576   :  { %2246 = vmatprep.subr.mxu0 %v2578_v1  ;;  %2265 = vmatprep.subr.mxu1 %v2578_v1 }
 0x577   :  { %2247 = vmatpush3.msra.mxu0 %v2723_v30  ;;  %2266 = vmatpush3.msra.mxu1 %v2651_v4 }
 0x578   :  { %2248 = vmatprep.subr.mxu0 %v2578_v1  ;;  %2267 = vmatprep.subr.mxu1 %v2578_v1 }
 0x579   :  { %2249 = vmatpush3.msra.mxu0 %v2730_v31  ;;  %2268 = vmatpush3.msra.mxu1 %v2664_v7 }
 0x57a   :  { %2250 = vmatprep.subr.mxu0 %v2578_v1  ;;  %2260 = vmatprep.mubr.msk.f32.mxu0 %vm2579_vm1, %v2578_v1 }
 0x57b   :  { %2251 = vmatpush3.msra.mxu0 %v2737_v32  ;;  %2269 = vmatprep.subr.mxu1 %v2578_v1 }
 0x57c   :  { %2252 = vmatprep.subr.mxu0 %v2578_v1  ;;  %2270 = vmatpush3.msra.mxu1 %v2673_v9 }
 0x57d   :  { %2253 = vmatpush3.msra.mxu0 %v2744_v33  ;;  %2271 = vmatprep.mubr.msk.f32.mxu1 %vm2579_vm1, %v2578_v1 }
 0x57e   :  { %2254 = vmatprep.subr.mxu0 %v2578_v1  ;;  %2274 = vmatprep.subr.mxu1 %v2578_v1 }
 0x57f   :  { %2255 = vmatpush3.msra.mxu0 %v2751_v34 }
 0x580   :  { %2256 = vmatprep.subr.mxu0 %v2578_v1 }
 0x581   :  { %2257 = vmatpush3.msra.mxu0 %v2759_v36 }
 0x582   :  { %2258 = vmatprep.subr.mxu0 %v2578_v1 }
 0x583   :  { %2259 = vmatpush3.msra.mxu0 %v2768_v37 }
 0x584   :  { %2293 = vmatprep.subr.mxu0 %v2578_v1 }
 0x634   :  { %v543_v28 = vpop.f32.mrf.mxu1  ;;  %v647_v35 = vpop.f32.mrf.mxu0 }
 0x635   :  { %v544_v38 = vadd.f32 %v2807_v43, %v543_v28  ;;  %v652_v39 = vrot.slane %v647_v35, 4 }
 0x636   :  { %v2232_v40 = vpop.f32.mrf.mxu1  ;;  %v2243_v41 = vpop.f32.mrf.mxu0 }
 0x637   :  { %2453 = vtanh.f32 %v544_v38  ;;  %v654_v42 = vadd.f32 %v652_v39, %v2704_v16  ;;  %v2013_v46 = vmul.f32 -1.442695, %v544_v38 }
 0x639   :  { %2455 = vtanh.f32 %v654_v42  ;;  %v2015_v47 = vmul.f32 -1.442695, %v654_v42 }
 0x63a   :  { %2457 = vpow2.f32 %v2013_v46 }
 0x63b   :  { %2459 = vpow2.f32 %v2015_v47 }
 0x644   :  { %v2454_v44 = vpop.eup %2453 }
 0x645   :  { %556 = vrot.lane.b32.xlu0 %v2454_v44, %s2580_s28 }
 0x646   :  { %v2456_v45 = vpop.eup %2455 }
 0x647   :  { %667 = vrot.lane.b32.xlu1 %v2456_v45, %s2580_s28  ;;  %v2458_v48 = vpop.eup %2457 }
 0x648   :  { %v2460_v49 = vpop.eup %2459  ;;  %v550_v50 = vadd.f32 1.0, %v2458_v48 }
 0x649   :  { %v658_v51 = vadd.f32 1.0, %v2460_v49 }
 0x64a   :  { %2461 = vrcp.f32 %v550_v50 }
 0x64b   :  { %2463 = vrcp.f32 %v658_v51 }
 0x657   :  { %v2462_v52 = vpop.eup %2461 }
 0x658   :  { %v2464_v55 = vpop.eup %2463  ;;  %v554_v58 = vmul.f32 %v2462_v52, %v2817_v11 }
 0x659   :  { %v665_v62 = vmul.f32 %v2464_v55, %v663_v59 }
 0x6b7   :  { %v557_v53 = vpop.permute.xlu0 %556 }
 0x6b8   :  { %v559_v54 = vmul.f32 %v2462_v52, %v557_v53 }
 0x6b9   :  { %v668_v56 = vpop.permute.xlu1 %667 }
 0x6ba   :  { %561 = vrot.lane.b32.xlu0 %v559_v54, %s2580_s28  ;;  %v670_v57 = vmul.f32 %v2464_v55, %v668_v56 }
 0x6bc   :  { %672 = vrot.lane.b32.xlu1 %v670_v57, %s2580_s28 }
 0x72c   :  { %v562_v60 = vpop.permute.xlu0 %561 }
 0x72d   :  { %v2870_v61 = vadd.f32 %v562_v60, %v554_v58 }
 0x72e   :  { %v673_v63 = vpop.permute.xlu1 %672 }
 0x72f   :  { %2465 = vtanh.f32 %v2870_v61  ;;  %v2873_v0 = vadd.f32 %v673_v63, %v665_v62 }
 0x731   :  { %2467 = vtanh.f32 %v2873_v0 }
 0x73c   :  { %v2466_v3 = vpop.eup %2465 }
 0x73d   :  { %567 = vrot.lane.b32.xlu0 %v2466_v3, %s2580_s28 }
 0x73e   :  { %v2468_v5 = vpop.eup %2467 }
 0x73f   :  { %678 = vrot.lane.b32.xlu1 %v2468_v5, %s2580_s28 }
 0x7af   :  { %v568_v6 = vpop.permute.xlu0 %567 }
 0x7b0   :  { %v2878_v8 = vmul.f32 %v2462_v52, %v568_v6  ;;  %v881_v52 = vrot.slane %v2873_v0, 6 }
 0x7b1   :  { %v679_v12 = vpop.permute.xlu1 %678 }
 0x7b2   :  { %v686_v11 = vrot.slane %v2878_v8, 4  ;;  %v681_v14 = vmul.f32 %v2464_v55, %v679_v12 }
 0x7b4   :  { %687 = vrot.lane.b32.xlu1 %v686_v11, %s2582_s25  ;;  %683 = vrot.lane.b32.xlu0 %v681_v14, %s2581_s23  ;;  %v794_v15 = vrot.slane %v681_v14, 4 }
 0x7b8   :  { %795 = vrot.lane.b32.xlu0 %v794_v15, %s2581_s23 }
 0x826   :  { %v688_v17 = vpop.permute.xlu1 %687  ;;  %v684_v18 = vpop.permute.xlu0 %683 }
 0x827   :  { %v690_v10 = vsel %vm144_vm3, %v684_v18, %v688_v17 }
 0x828   :  { %v692_v20 = vrot.slane %v690_v10, 4 }
 0x82a   :  { %v796_v21 = vpop.permute.xlu0 %795  ;;  %2261 = vmatmul.mubr.msk.f32.vlgmr.msra.gmra.mxu0 %vm257_vm4, %v692_v20 }
 0x82b   :  { %2272 = vmatmul.mubr.msk.f32.vlgmr.msra.gmra.mxu1 %vm144_vm3, %v796_v21  ;;  %2294 = vmatpush3.msra.mxu0 %v2640_v2 }
 0x82c   :  { %2275 = vmatpush3.msra.mxu1 %v2718_v29  ;;  %2295 = vmatprep.subr.mxu0 %v2578_v1 }
 0x82d   :  { %2276 = vmatprep.subr.mxu1 %v2578_v1  ;;  %2296 = vmatpush3.msra.mxu0 %v2651_v4 }
 0x82e   :  { %2277 = vmatpush3.msra.mxu1 %v2723_v30  ;;  %2297 = vmatprep.subr.mxu0 %v2578_v1 }
 0x82f   :  { %2278 = vmatprep.subr.mxu1 %v2578_v1  ;;  %2298 = vmatpush3.msra.mxu0 %v2664_v7 }
 0x830   :  { %2279 = vmatpush3.msra.mxu1 %v2730_v31  ;;  %2290 = vmatprep.mubr.msk.f32.mxu1 %vm2579_vm1, %v2578_v1 }
 0x831   :  { %2280 = vmatprep.subr.mxu1 %v2578_v1  ;;  %2299 = vmatprep.subr.mxu0 %v2578_v1 }
 0x832   :  { %2281 = vmatpush3.msra.mxu1 %v2737_v32  ;;  %2300 = vmatpush3.msra.mxu0 %v2673_v9 }
 0x833   :  { %2282 = vmatprep.subr.mxu1 %v2578_v1  ;;  %2301 = vmatprep.mubr.msk.f32.mxu0 %vm2579_vm1, %v2578_v1 }
 0x834   :  { %2283 = vmatpush3.msra.mxu1 %v2744_v33  ;;  %2304 = vmatprep.subr.mxu0 %v2578_v1 }
 0x835   :  { %2284 = vmatprep.subr.mxu1 %v2578_v1 }
 0x836   :  { %2285 = vmatpush3.msra.mxu1 %v2751_v34 }
 0x837   :  { %2286 = vmatprep.subr.mxu1 %v2578_v1 }
 0x838   :  { %2287 = vmatpush3.msra.mxu1 %v2759_v36 }
 0x839   :  { %2288 = vmatprep.subr.mxu1 %v2578_v1 }
 0x83a   :  { %2289 = vmatpush3.msra.mxu1 %v2768_v37 }
 0x83b   :  { %2323 = vmatprep.subr.mxu1 %v2578_v1 }
 0x8ea   :  { %v761_v22 = vpop.f32.mrf.mxu0 }
 0x8eb   :  { %v762_v23 = vadd.f32 %v2807_v43, %v761_v22  ;;  %v865_v24 = vpop.f32.mrf.mxu1 }
 0x8ec   :  { %v870_v25 = vrot.slane %v865_v24, 2  ;;  %v2262_v26 = vpop.f32.mrf.mxu0 }
 0x8ed   :  { %2469 = vtanh.f32 %v762_v23  ;;  %v2273_v27 = vpop.f32.mrf.mxu1  ;;  %v2017_v39 = vmul.f32 -1.442695, %v762_v23 }
 0x8ee   :  { %v872_v28 = vadd.f32 %v870_v25, %v2704_v16 }
 0x8f0   :  { %2471 = vtanh.f32 %v872_v28  ;;  %v2019_v40 = vmul.f32 -1.442695, %v872_v28 }
 0x8f1   :  { %2473 = vpow2.f32 %v2017_v39 }
 0x8f2   :  { %2475 = vpow2.f32 %v2019_v40 }
 0x8fa   :  { %v2470_v35 = vpop.eup %2469 }
 0x8fb   :  { %774 = vrot.lane.b32.xlu1 %v2470_v35, %s2580_s28 }
 0x8fd   :  { %v2472_v38 = vpop.eup %2471 }
 0x8fe   :  { %885 = vrot.lane.b32.xlu0 %v2472_v38, %s2580_s28  ;;  %v2474_v41 = vpop.eup %2473 }
 0x8ff   :  { %v2476_v42 = vpop.eup %2475  ;;  %v768_v44 = vadd.f32 1.0, %v2474_v41 }
 0x900   :  { %v876_v45 = vadd.f32 1.0, %v2476_v42 }
 0x901   :  { %2477 = vrcp.f32 %v768_v44 }
 0x902   :  { %2479 = vrcp.f32 %v876_v45 }
 0x90e   :  { %v2478_v46 = vpop.eup %2477 }
 0x90f   :  { %v2480_v48 = vpop.eup %2479  ;;  %v772_v51 = vmul.f32 %v2478_v46, %v2870_v61 }
 0x910   :  { %v883_v55 = vmul.f32 %v2480_v48, %v881_v52 }
 0x96d   :  { %v775_v47 = vpop.permute.xlu1 %774 }
 0x96e   :  { %v777_v16 = vmul.f32 %v2478_v46, %v775_v47 }
 0x970   :  { %v886_v49 = vpop.permute.xlu0 %885  ;;  %779 = vrot.lane.b32.xlu1 %v777_v16, %s2580_s28 }
 0x971   :  { %v888_v50 = vmul.f32 %v2480_v48, %v886_v49 }
 0x973   :  { %890 = vrot.lane.b32.xlu0 %v888_v50, %s2580_s28 }
 0x9e2   :  { %v780_v53 = vpop.permute.xlu1 %779 }
 0x9e3   :  { %v2923_v54 = vadd.f32 %v780_v53, %v772_v51 }
 0x9e5   :  { %2481 = vtanh.f32 %v2923_v54  ;;  %v891_v56 = vpop.permute.xlu0 %890 }
 0x9e6   :  { %v2926_v57 = vadd.f32 %v891_v56, %v883_v55 }
 0x9e8   :  { %2483 = vtanh.f32 %v2926_v57  ;;  %v1096_v45 = vrot.slane %v2926_v57, 6 }
 0x9f2   :  { %v2482_v58 = vpop.eup %2481 }
 0x9f3   :  { %785 = vrot.lane.b32.xlu1 %v2482_v58, %s2580_s28 }
 0x9f5   :  { %v2484_v59 = vpop.eup %2483 }
 0x9f6   :  { %896 = vrot.lane.b32.xlu0 %v2484_v59, %s2580_s28 }
 0xa65   :  { %v786_v60 = vpop.permute.xlu1 %785 }
 0xa66   :  { %v2931_v61 = vmul.f32 %v2478_v46, %v786_v60 }
 0xa68   :  { %v904_v62 = vrot.slane %v2931_v61, 2  ;;  %v897_v63 = vpop.permute.xlu0 %896 }
 0xa69   :  { %v899_v0 = vmul.f32 %v2480_v48, %v897_v63 }
 0xa6a   :  { %905 = vrot.lane.b32.xlu0 %v904_v62, %s2582_s25 }
 0xa6b   :  { %901 = vrot.lane.b32.xlu1 %v899_v0, %s2581_s23  ;;  %v1012_v3 = vrot.slane %v899_v0, 6 }
 0xa6f   :  { %1013 = vrot.lane.b32.xlu1 %v1012_v3, %s2581_s23 }
 0xadc   :  { %v906_v5 = vpop.permute.xlu0 %905 }
 0xadd   :  { %v902_v6 = vpop.permute.xlu1 %901 }
 0xade   :  { %v908_v11 = vsel %vm144_vm3, %v902_v6, %v906_v5 }
 0xadf   :  { %v910_v12 = vrot.slane %v908_v11, 6 }
 0xae1   :  { %2291 = vmatmul.mubr.msk.f32.vlgmr.msra.gmra.mxu1 %vm257_vm4, %v910_v12  ;;  %v1014_v14 = vpop.permute.xlu1 %1013 }
 0xae2   :  { %2302 = vmatmul.mubr.msk.f32.vlgmr.msra.gmra.mxu0 %vm144_vm3, %v1014_v14  ;;  %2324 = vmatpush3.msra.mxu1 %v2640_v2 }
 0xae3   :  { %2305 = vmatpush3.msra.mxu0 %v2718_v29  ;;  %2325 = vmatprep.subr.mxu1 %v2578_v1 }
 0xae4   :  { %2306 = vmatprep.subr.mxu0 %v2578_v1  ;;  %2326 = vmatpush3.msra.mxu1 %v2651_v4 }
 0xae5   :  { %2307 = vmatpush3.msra.mxu0 %v2723_v30  ;;  %2327 = vmatprep.subr.mxu1 %v2578_v1 }
 0xae6   :  { %2308 = vmatprep.subr.mxu0 %v2578_v1  ;;  %2328 = vmatpush3.msra.mxu1 %v2664_v7 }
 0xae7   :  { %2309 = vmatpush3.msra.mxu0 %v2730_v31  ;;  %2329 = vmatprep.subr.mxu1 %v2578_v1 }
 0xae8   :  { %2310 = vmatprep.subr.mxu0 %v2578_v1  ;;  %2330 = vmatpush3.msra.mxu1 %v2673_v9 }
 0xae9   :  { %2311 = vmatpush3.msra.mxu0 %v2737_v32  ;;  %2331 = vmatprep.mubr.msk.f32.mxu1 %vm2579_vm1, %v2578_v1 }
 0xaea   :  { %2312 = vmatprep.subr.mxu0 %v2578_v1  ;;  %2320 = vmatprep.mubr.msk.f32.mxu0 %vm2579_vm1, %v2578_v1 }
 0xaeb   :  { %2313 = vmatpush3.msra.mxu0 %v2744_v33  ;;  %2334 = vmatprep.subr.mxu1 %v2578_v1 }
 0xaec   :  { %2314 = vmatprep.subr.mxu0 %v2578_v1 }
 0xaed   :  { %2315 = vmatpush3.msra.mxu0 %v2751_v34 }
 0xaee   :  { %2316 = vmatprep.subr.mxu0 %v2578_v1 }
 0xaef   :  { %2317 = vmatpush3.msra.mxu0 %v2759_v36 }
 0xaf0   :  { %2318 = vmatprep.subr.mxu0 %v2578_v1 }
 0xaf1   :  { %2319 = vmatpush3.msra.mxu0 %v2768_v37 }
 0xaf2   :  { %2353 = vmatprep.subr.mxu0 %v2578_v1 }
 0xba1   :  { %v979_v15 = vpop.f32.mrf.mxu1 }
 0xba2   :  { %v980_v17 = vadd.f32 %v2807_v43, %v979_v15  ;;  %v1083_v18 = vpop.f32.mrf.mxu0 }
 0xba3   :  { %v1087_v10 = vadd.f32 %v1083_v18, %v2702_v13  ;;  %v2292_v20 = vpop.f32.mrf.mxu1 }
 0xba4   :  { %2485 = vtanh.f32 %v980_v17  ;;  %v2303_v21 = vpop.f32.mrf.mxu0  ;;  %v2021_v24 = vmul.f32 -1.442695, %v980_v17 }
 0xba5   :  { %2487 = vtanh.f32 %v1087_v10  ;;  %v2023_v25 = vmul.f32 -1.442695, %v1087_v10 }
 0xba6   :  { %2489 = vpow2.f32 %v2021_v24 }
 0xba7   :  { %2491 = vpow2.f32 %v2023_v25 }
 0xbb1   :  { %v2486_v22 = vpop.eup %2485 }
 0xbb2   :  { %v2488_v23 = vpop.eup %2487  ;;  %992 = vrot.lane.b32.xlu0 %v2486_v22, %s2580_s28 }
 0xbb3   :  { %1100 = vrot.lane.b32.xlu1 %v2488_v23, %s2580_s28  ;;  %v2490_v26 = vpop.eup %2489 }
 0xbb4   :  { %v2492_v27 = vpop.eup %2491  ;;  %v986_v28 = vadd.f32 1.0, %v2490_v26 }
 0xbb5   :  { %v1091_v35 = vadd.f32 1.0, %v2492_v27 }
 0xbb6   :  { %2493 = vrcp.f32 %v986_v28 }
 0xbb7   :  { %2495 = vrcp.f32 %v1091_v35 }
 0xbc3   :  { %v2494_v38 = vpop.eup %2493 }
 0xbc4   :  { %v2496_v40 = vpop.eup %2495  ;;  %v990_v46 = vmul.f32 %v2494_v38, %v2923_v54 }
 0xbc5   :  { %v1098_v16 = vmul.f32 %v2496_v40, %v1096_v45 }
 0xc24   :  { %v993_v39 = vpop.permute.xlu0 %992 }
 0xc25   :  { %v995_v41 = vmul.f32 %v2494_v38, %v993_v39  ;;  %v1101_v42 = vpop.permute.xlu1 %1100 }
 0xc26   :  { %v1103_v44 = vmul.f32 %v2496_v40, %v1101_v42 }
 0xc27   :  { %997 = vrot.lane.b32.xlu0 %v995_v41, %s2580_s28 }
 0xc28   :  { %1105 = vrot.lane.b32.xlu1 %v1103_v44, %s2580_s28 }
 0xc99   :  { %v998_v47 = vpop.permute.xlu0 %997 }
 0xc9a   :  { %v2976_v48 = vadd.f32 %v998_v47, %v990_v46  ;;  %v1106_v49 = vpop.permute.xlu1 %1105 }
 0xc9b   :  { %v2978_v50 = vadd.f32 %v1106_v49, %v1098_v16 }
 0xc9c   :  { %2497 = vtanh.f32 %v2976_v48 }
 0xc9d   :  { %2499 = vtanh.f32 %v2978_v50  ;;  %v1309_v23 = vrot.slane %v2978_v50, 6 }
 0xca9   :  { %v2498_v51 = vpop.eup %2497 }
 0xcaa   :  { %v2500_v52 = vpop.eup %2499  ;;  %1003 = vrot.lane.b32.xlu0 %v2498_v51, %s2580_s28  ;;  %v2565_v51 = vld [vmem:[%s3210_s2 + $0x18] sm:$0xff] }
 0xcab   :  { %1111 = vrot.lane.b32.xlu1 %v2500_v52, %s2580_s28  ;;  %v2566_v52 = vld [vmem:[%s3210_s2 + $0x10] sm:$0xff] }
 0xd1c   :  { %v1004_v53 = vpop.permute.xlu0 %1003 }
 0xd1d   :  { %v2984_v55 = vmul.f32 %v2494_v38, %v1004_v53  ;;  %v1112_v54 = vpop.permute.xlu1 %1111 }
 0xd1e   :  { %v1114_v56 = vmul.f32 %v2496_v40, %v1112_v54 }
 0xd1f   :  { %1119 = vrot.lane.b32.xlu1 %v2984_v55, %s2582_s25 }
 0xd20   :  { %1116 = vrot.lane.b32.xlu0 %v1114_v56, %s2581_s23 }
 0xd91   :  { %v1120_v57 = vpop.permute.xlu1 %1119 }
 0xd92   :  { %v1117_v58 = vpop.permute.xlu0 %1116 }
 0xd93   :  { %v1122_v59 = vsel %vm144_vm3, %v1117_v58, %v1120_v57  ;;  %2332 = vmatmul.mubr.msk.f32.vlgmr.msra.gmra.mxu1 %vm144_vm3, %v1117_v58 }
 0xd94   :  { %2321 = vmatmul.mubr.msk.f32.vlgmr.msra.gmra.mxu0 %vm257_vm4, %v1122_v59  ;;  %2335 = vmatpush3.msra.mxu1 %v2718_v29 }
 0xd95   :  { %2336 = vmatprep.subr.mxu1 %v2578_v1  ;;  %2354 = vmatpush3.msra.mxu0 %v2640_v2 }
 0xd96   :  { %2337 = vmatpush3.msra.mxu1 %v2723_v30  ;;  %2355 = vmatprep.subr.mxu0 %v2578_v1 }
 0xd97   :  { %2338 = vmatprep.subr.mxu1 %v2578_v1  ;;  %2356 = vmatpush3.msra.mxu0 %v2651_v4 }
 0xd98   :  { %2339 = vmatpush3.msra.mxu1 %v2730_v31  ;;  %2357 = vmatprep.subr.mxu0 %v2578_v1 }
 0xd99   :  { %2340 = vmatprep.subr.mxu1 %v2578_v1  ;;  %2358 = vmatpush3.msra.mxu0 %v2664_v7 }
 0xd9a   :  { %2341 = vmatpush3.msra.mxu1 %v2737_v32  ;;  %2359 = vmatprep.subr.mxu0 %v2578_v1 }
 0xd9b   :  { %2342 = vmatprep.subr.mxu1 %v2578_v1  ;;  %2350 = vmatprep.mubr.msk.f32.mxu1 %vm2579_vm1, %v2578_v1 }
 0xd9c   :  { %2343 = vmatpush3.msra.mxu1 %v2744_v33  ;;  %2360 = vmatpush3.msra.mxu0 %v2673_v9 }
 0xd9d   :  { %2344 = vmatprep.subr.mxu1 %v2578_v1  ;;  %2361 = vmatprep.mubr.msk.f32.mxu0 %vm2579_vm1, %v2578_v1 }
 0xd9e   :  { %2345 = vmatpush3.msra.mxu1 %v2751_v34  ;;  %2364 = vmatprep.subr.mxu0 %v2578_v1 }
 0xd9f   :  { %2346 = vmatprep.subr.mxu1 %v2578_v1 }
 0xda0   :  { %2347 = vmatpush3.msra.mxu1 %v2759_v36 }
 0xda1   :  { %2348 = vmatprep.subr.mxu1 %v2578_v1 }
 0xda2   :  { %2349 = vmatpush3.msra.mxu1 %v2768_v37 }
 0xda3   :  { %2383 = vmatprep.subr.mxu1 %v2578_v1 }
 0xe53   :  { %v1293_v2 = vpop.f32.mrf.mxu1 }
 0xe54   :  { %v1298_v4 = vrot.slane %v1293_v2, 6  ;;  %v1192_v7 = vpop.f32.mrf.mxu0 }
 0xe55   :  { %v1193_v9 = vadd.f32 %v2807_v43, %v1192_v7  ;;  %v2333_v60 = vpop.f32.mrf.mxu1 }
 0xe56   :  { %v1300_v62 = vadd.f32 %v1298_v4, %v2702_v13  ;;  %v2322_v63 = vpop.f32.mrf.mxu0 }
 0xe57   :  { %2501 = vtanh.f32 %v1193_v9  ;;  %v2025_v5 = vmul.f32 -1.442695, %v1193_v9 }
 0xe58   :  { %2503 = vtanh.f32 %v1300_v62  ;;  %v2027_v6 = vmul.f32 -1.442695, %v1300_v62 }
 0xe59   :  { %2505 = vpow2.f32 %v2025_v5 }
 0xe5a   :  { %2507 = vpow2.f32 %v2027_v6 }
 0xe64   :  { %v2502_v0 = vpop.eup %2501 }
 0xe65   :  { %v2504_v3 = vpop.eup %2503  ;;  %1205 = vrot.lane.b32.xlu0 %v2502_v0, %s2580_s28 }
 0xe66   :  { %1313 = vrot.lane.b32.xlu1 %v2504_v3, %s2580_s28  ;;  %v2506_v11 = vpop.eup %2505 }
 0xe67   :  { %v2508_v12 = vpop.eup %2507  ;;  %v1199_v14 = vadd.f32 1.0, %v2506_v11 }
 0xe68   :  { %v1304_v15 = vadd.f32 1.0, %v2508_v12 }
 0xe69   :  { %2509 = vrcp.f32 %v1199_v14 }
 0xe6a   :  { %2511 = vrcp.f32 %v1304_v15 }
 0xe76   :  { %v2510_v17 = vpop.eup %2509 }
 0xe77   :  { %v2512_v10 = vpop.eup %2511  ;;  %v1203_v24 = vmul.f32 %v2510_v17, %v2976_v48 }
 0xe78   :  { %v1311_v26 = vmul.f32 %v2512_v10, %v1309_v23 }
 0xed7   :  { %v1206_v18 = vpop.permute.xlu0 %1205 }
 0xed8   :  { %v1208_v20 = vmul.f32 %v2510_v17, %v1206_v18  ;;  %v1314_v21 = vpop.permute.xlu1 %1313 }
 0xed9   :  { %v1316_v22 = vmul.f32 %v2512_v10, %v1314_v21 }
 0xeda   :  { %1210 = vrot.lane.b32.xlu0 %v1208_v20, %s2580_s28 }
 0xedb   :  { %1318 = vrot.lane.b32.xlu1 %v1316_v22, %s2580_s28 }
 0xf4c   :  { %v1211_v25 = vpop.permute.xlu0 %1210 }
 0xf4d   :  { %v3028_v27 = vadd.f32 %v1211_v25, %v1203_v24  ;;  %v1319_v28 = vpop.permute.xlu1 %1318 }
 0xf4e   :  { %v3030_v35 = vadd.f32 %v1319_v28, %v1311_v26 }
 0xf4f   :  { %2513 = vtanh.f32 %v3028_v27 }
 0xf50   :  { %2515 = vtanh.f32 %v3030_v35  ;;  %v1527_v6 = vrot.slane %v3030_v35, 6 }
 0xf5c   :  { %v2514_v38 = vpop.eup %2513 }
 0xf5d   :  { %v2516_v39 = vpop.eup %2515  ;;  %1216 = vrot.lane.b32.xlu0 %v2514_v38, %s2580_s28 }
 0xf5e   :  { %1324 = vrot.lane.b32.xlu1 %v2516_v39, %s2580_s28  ;;  %v2569_v39 = vld [vmem:[%s3214_s4 + $0x38] sm:$0xff] }
 0xfcf   :  { %v1217_v40 = vpop.permute.xlu0 %1216 }
 0xfd0   :  { %v3036_v41 = vmul.f32 %v2510_v17, %v1217_v40  ;;  %v1325_v42 = vpop.permute.xlu1 %1324  ;;  %v2570_v40 = vld [vmem:[%s3214_s4 + $0x30] sm:$0xff] }
 0xfd1   :  { %v1327_v44 = vmul.f32 %v2512_v10, %v1325_v42  ;;  %v2571_v42 = vld [vmem:[%s3214_s4 + $0x28] sm:$0xff] }
 0xfd2   :  { %v1332_v45 = vrot.slane %v3036_v41, 6 }
 0xfd3   :  { %1329 = vrot.lane.b32.xlu0 %v1327_v44, %s2581_s23  ;;  %v1440_v46 = vrot.slane %v1327_v44, 2  ;;  %v2572_v44 = vld [vmem:[%s3214_s4 + $0x20] sm:$0xff] }
 0xfd4   :  { %1333 = vrot.lane.b32.xlu1 %v1332_v45, %s2582_s25  ;;  %v2573_v45 = vld [vmem:[%s3214_s4 + $0x18] sm:$0xff] }
 0xfd7   :  { %1441 = vrot.lane.b32.xlu0 %v1440_v46, %s2581_s23  ;;  %v2574_v46 = vld [vmem:[%s3214_s4 + $0x10] sm:$0xff] }
0x1045   :  { %v1330_v47 = vpop.permute.xlu0 %1329 }
0x1046   :  { %v1334_v16 = vpop.permute.xlu1 %1333 }
0x1047   :  { %v1336_v48 = vsel %vm144_vm3, %v1330_v47, %v1334_v16  ;;  %v2575_v47 = vld [vmem:[%s3214_s4 + $0x8] sm:$0xff]  ;;  %v2576_v16 = vld [vmem:[%s3214_s4] sm:$0xff] }
0x1048   :  { %v1338_v49 = vrot.slane %v1336_v48, 2 }
0x1049   :  { %v1442_v50 = vpop.permute.xlu0 %1441 }
0x104a   :  { %2351 = vmatmul.mubr.msk.f32.vlgmr.msra.gmra.mxu1 %vm257_vm4, %v1338_v49  ;;  %2362 = vmatmul.mubr.msk.f32.vlgmr.msra.gmra.mxu0 %vm144_vm3, %v1442_v50 }
0x104b   :  { %2365 = vmatpush3.msra.mxu0 %v2718_v29  ;;  %2384 = vmatpush3.msra.mxu1 %v2565_v51  ;;  %v2567_v29 = vld [vmem:[%s3210_s2 + $0x8] sm:$0xff] }
0x104c   :  { %2366 = vmatprep.subr.mxu0 %v2578_v1  ;;  %2385 = vmatprep.subr.mxu1 %v2578_v1 }
0x104d   :  { %2367 = vmatpush3.msra.mxu0 %v2723_v30  ;;  %2386 = vmatpush3.msra.mxu1 %v2566_v52  ;;  %v2568_v30 = vld [vmem:[%s3210_s2] sm:$0xff] }
0x104e   :  { %2368 = vmatprep.subr.mxu0 %v2578_v1  ;;  %2387 = vmatprep.subr.mxu1 %v2578_v1 }
0x104f   :  { %2369 = vmatpush3.msra.mxu0 %v2730_v31  ;;  %2388 = vmatpush3.msra.mxu1 %v2567_v29 }
0x1050   :  { %2370 = vmatprep.subr.mxu0 %v2578_v1  ;;  %2380 = vmatprep.mubr.msk.f32.mxu0 %vm2579_vm1, %v2578_v1 }
0x1051   :  { %2371 = vmatpush3.msra.mxu0 %v2737_v32  ;;  %2389 = vmatprep.subr.mxu1 %v2578_v1 }
0x1052   :  { %2372 = vmatprep.subr.mxu0 %v2578_v1  ;;  %2390 = vmatpush3.msra.mxu1 %v2568_v30 }
0x1053   :  { %2373 = vmatpush3.msra.mxu0 %v2744_v33  ;;  %2391 = vmatprep.mubr.msk.f32.mxu1 %vm2579_vm1, %v2578_v1 }
0x1054   :  { %2374 = vmatprep.subr.mxu0 %v2578_v1  ;;  %2394 = vmatprep.subr.mxu1 %v2578_v1 }
0x1055   :  { %2375 = vmatpush3.msra.mxu0 %v2751_v34 }
0x1056   :  { %2376 = vmatprep.subr.mxu0 %v2578_v1 }
0x1057   :  { %2377 = vmatpush3.msra.mxu0 %v2759_v36 }
0x1058   :  { %2378 = vmatprep.subr.mxu0 %v2578_v1 }
0x1059   :  { %2379 = vmatpush3.msra.mxu0 %v2768_v37 }
0x110a   :  { %v1407_v31 = vpop.f32.mrf.mxu1  ;;  %v1511_v32 = vpop.f32.mrf.mxu0 }
0x110b   :  { %v1408_v33 = vadd.f32 %v2807_v43, %v1407_v31  ;;  %v1516_v53 = vrot.slane %v1511_v32, 4 }
0x110c   :  { %v2352_v54 = vpop.f32.mrf.mxu1  ;;  %v2363_v56 = vpop.f32.mrf.mxu0 }
0x110d   :  { %2517 = vtanh.f32 %v1408_v33  ;;  %v1518_v57 = vadd.f32 %v1516_v53, %v2702_v13  ;;  %v2029_v36 = vmul.f32 -1.442695, %v1408_v33 }
0x110f   :  { %2519 = vtanh.f32 %v1518_v57  ;;  %v2031_v59 = vmul.f32 -1.442695, %v1518_v57 }
0x1110   :  { %2521 = vpow2.f32 %v2029_v36 }
0x1111   :  { %2523 = vpow2.f32 %v2031_v59 }
0x111a   :  { %v2518_v34 = vpop.eup %2517 }
0x111b   :  { %1420 = vrot.lane.b32.xlu1 %v2518_v34, %s2580_s28 }
0x111c   :  { %v2520_v58 = vpop.eup %2519 }
0x111d   :  { %1531 = vrot.lane.b32.xlu0 %v2520_v58, %s2580_s28  ;;  %v2522_v37 = vpop.eup %2521 }
0x111e   :  { %v2524_v2 = vpop.eup %2523  ;;  %v1414_v4 = vadd.f32 1.0, %v2522_v37 }
0x111f   :  { %v1522_v7 = vadd.f32 1.0, %v2524_v2 }
0x1120   :  { %2525 = vrcp.f32 %v1414_v4 }
0x1121   :  { %2527 = vrcp.f32 %v1522_v7 }
0x112d   :  { %v2526_v9 = vpop.eup %2525 }
0x112e   :  { %v2528_v63 = vpop.eup %2527  ;;  %v1418_v5 = vmul.f32 %v2526_v9, %v3028_v27 }
0x112f   :  { %v1529_v14 = vmul.f32 %v2528_v63, %v1527_v6 }
0x118d   :  { %v1421_v60 = vpop.permute.xlu1 %1420 }
0x118e   :  { %v1423_v62 = vmul.f32 %v2526_v9, %v1421_v60 }
0x118f   :  { %v1532_v0 = vpop.permute.xlu0 %1531 }
0x1190   :  { %1425 = vrot.lane.b32.xlu1 %v1423_v62, %s2580_s28  ;;  %v1534_v3 = vmul.f32 %v2528_v63, %v1532_v0 }
0x1192   :  { %1536 = vrot.lane.b32.xlu0 %v1534_v3, %s2580_s28 }
0x1202   :  { %v1426_v11 = vpop.permute.xlu1 %1425 }
0x1203   :  { %v3088_v12 = vadd.f32 %v1426_v11, %v1418_v5 }
0x1204   :  { %v1537_v15 = vpop.permute.xlu0 %1536 }
0x1205   :  { %2529 = vtanh.f32 %v3088_v12  ;;  %v3091_v17 = vadd.f32 %v1537_v15, %v1529_v14 }
0x1207   :  { %2531 = vtanh.f32 %v3091_v17  ;;  %v1745_v2 = vrot.slane %v3091_v17, 6 }
0x1212   :  { %v2530_v18 = vpop.eup %2529 }
0x1213   :  { %1431 = vrot.lane.b32.xlu1 %v2530_v18, %s2580_s28 }
0x1214   :  { %v2532_v10 = vpop.eup %2531 }
0x1215   :  { %1542 = vrot.lane.b32.xlu0 %v2532_v10, %s2580_s28 }
0x1285   :  { %v1432_v20 = vpop.permute.xlu1 %1431 }
0x1286   :  { %v3096_v21 = vmul.f32 %v2526_v9, %v1432_v20  ;;  %v2577_v20 = vld [vmem:[%s3215_s5] ss:$0 sm:$0xff] }
0x1287   :  { %v1543_v23 = vpop.permute.xlu0 %1542 }
0x1288   :  { %v1550_v22 = vrot.slane %v3096_v21, 4  ;;  %v1545_v24 = vmul.f32 %v2528_v63, %v1543_v23 }
0x128a   :  { %1551 = vrot.lane.b32.xlu0 %v1550_v22, %s2582_s25  ;;  %1547 = vrot.lane.b32.xlu1 %v1545_v24, %s2581_s23  ;;  %v1658_v25 = vrot.slane %v1545_v24, 4 }
0x128e   :  { %1659 = vrot.lane.b32.xlu1 %v1658_v25, %s2581_s23 }
0x12fc   :  { %v1552_v26 = vpop.permute.xlu0 %1551  ;;  %v1548_v27 = vpop.permute.xlu1 %1547 }
0x12fd   :  { %v1554_v28 = vsel %vm144_vm3, %v1548_v27, %v1552_v26 }
0x12fe   :  { %v1556_v35 = vrot.slane %v1554_v28, 4 }
0x1300   :  { %v1660_v38 = vpop.permute.xlu1 %1659  ;;  %2381 = vmatmul.mubr.msk.f32.vlgmr.msra.gmra.mxu0 %vm257_vm4, %v1556_v35 }
0x1301   :  { %2392 = vmatmul.mubr.msk.f32.vlgmr.msra.gmra.mxu1 %vm144_vm3, %v1660_v38 }
0x1302   :  { %2395 = vmatpush3.msra.mxu1 %v2569_v39  ;;  %2410 = vmatprep.mubr.msk.f32.mxu1 %vm2579_vm1, %v2578_v1 }
0x1303   :  { %2396 = vmatprep.subr.mxu1 %v2578_v1 }
0x1304   :  { %2397 = vmatpush3.msra.mxu1 %v2570_v40 }
0x1305   :  { %2398 = vmatprep.subr.mxu1 %v2578_v1 }
0x1306   :  { %2399 = vmatpush3.msra.mxu1 %v2571_v42 }
0x1307   :  { %2400 = vmatprep.subr.mxu1 %v2578_v1 }
0x1308   :  { %2401 = vmatpush3.msra.mxu1 %v2572_v44 }
0x1309   :  { %2402 = vmatprep.subr.mxu1 %v2578_v1 }
0x130a   :  { %2403 = vmatpush3.msra.mxu1 %v2573_v45 }
0x130b   :  { %2404 = vmatprep.subr.mxu1 %v2578_v1 }
0x130c   :  { %2405 = vmatpush3.msra.mxu1 %v2574_v46 }
0x130d   :  { %2406 = vmatprep.subr.mxu1 %v2578_v1 }
0x130e   :  { %2407 = vmatpush3.msra.mxu1 %v2575_v47  ;;  %v1880_v47 = vld [vmem:[%s3216_s7 + $0x10] sm:$0xff] }
0x130f   :  { %2408 = vmatprep.subr.mxu1 %v2578_v1 }
0x1310   :  { %2409 = vmatpush3.msra.mxu1 %v2576_v16 }
0x13c0   :  { %v1625_v48 = vpop.f32.mrf.mxu0 }
0x13c1   :  { %v1626_v49 = vadd.f32 %v2807_v43, %v1625_v48  ;;  %v1729_v50 = vpop.f32.mrf.mxu1 }
0x13c2   :  { %v1734_v51 = vrot.slane %v1729_v50, 2  ;;  %v2382_v52 = vpop.f32.mrf.mxu0 }
0x13c3   :  { %2533 = vtanh.f32 %v1626_v49  ;;  %v2393_v29 = vpop.f32.mrf.mxu1  ;;  %v2033_v32 = vmul.f32 -1.442695, %v1626_v49 }
0x13c4   :  { %v1736_v30 = vadd.f32 %v1734_v51, %v2702_v13 }
0x13c6   :  { %2535 = vtanh.f32 %v1736_v30  ;;  %v2035_v33 = vmul.f32 -1.442695, %v1736_v30  ;;  %v2038_v30 = vld [vmem:[%s3217_s8] ss:$0 sm:$0xff] }
0x13c7   :  { %2537 = vpow2.f32 %v2033_v32 }
0x13c8   :  { %2539 = vpow2.f32 %v2035_v33 }
0x13d0   :  { %v2534_v31 = vpop.eup %2533 }
0x13d1   :  { %1638 = vrot.lane.b32.xlu0 %v2534_v31, %s2580_s28 }
0x13d3   :  { %v2536_v1 = vpop.eup %2535 }
0x13d4   :  { %1749 = vrot.lane.b32.xlu1 %v2536_v1, %s2580_s28  ;;  %v2538_v53 = vpop.eup %2537 }
0x13d5   :  { %v2540_v43 = vpop.eup %2539  ;;  %v1632_v54 = vadd.f32 1.0, %v2538_v53 }
0x13d6   :  { %v1740_v56 = vadd.f32 1.0, %v2540_v43 }
0x13d7   :  { %2541 = vrcp.f32 %v1632_v54 }
0x13d8   :  { %2543 = vrcp.f32 %v1740_v56 }
0x13e4   :  { %v2542_v57 = vpop.eup %2541 }
0x13e5   :  { %v2544_v58 = vpop.eup %2543  ;;  %v1636_v37 = vmul.f32 %v2542_v57, %v3088_v12 }
0x13e6   :  { %v1747_v9 = vmul.f32 %v2544_v58, %v1745_v2 }
0x1443   :  { %v1639_v34 = vpop.permute.xlu0 %1638 }
0x1444   :  { %v1641_v13 = vmul.f32 %v2542_v57, %v1639_v34 }
0x1446   :  { %v1750_v36 = vpop.permute.xlu1 %1749  ;;  %1643 = vrot.lane.b32.xlu0 %v1641_v13, %s2580_s28 }
0x1447   :  { %v1752_v59 = vmul.f32 %v2544_v58, %v1750_v36 }
0x1449   :  { %1754 = vrot.lane.b32.xlu1 %v1752_v59, %s2580_s28 }
0x14b8   :  { %v1644_v4 = vpop.permute.xlu0 %1643 }
0x14b9   :  { %v1646_v7 = vadd.f32 %v1644_v4, %v1636_v37 }
0x14bb   :  { %2545 = vtanh.f32 %v1646_v7  ;;  %v1755_v60 = vpop.permute.xlu1 %1754 }
0x14bc   :  { %v1757_v62 = vadd.f32 %v1755_v60, %v1747_v9 }
0x14be   :  { %2547 = vtanh.f32 %v1757_v62 }
0x14c8   :  { %v2546_v63 = vpop.eup %2545 }
0x14c9   :  { %1649 = vrot.lane.b32.xlu0 %v2546_v63, %s2580_s28 }
0x14cb   :  { %v2548_v0 = vpop.eup %2547 }
0x14cc   :  { %1760 = vrot.lane.b32.xlu1 %v2548_v0, %s2580_s28 }
0x153b   :  { %v1650_v3 = vpop.permute.xlu0 %1649 }
0x153c   :  { %v1652_v5 = vmul.f32 %v2542_v57, %v1650_v3 }
0x153e   :  { %v1768_v6 = vrot.slane %v1652_v5, 2  ;;  %v1761_v11 = vpop.permute.xlu1 %1760 }
0x153f   :  { %v1763_v12 = vmul.f32 %v2544_v58, %v1761_v11 }
0x1540   :  { %1769 = vrot.lane.b32.xlu1 %v1768_v6, %s2582_s25 }
0x1541   :  { %1765 = vrot.lane.b32.xlu0 %v1763_v12, %s2581_s23 }
0x15b2   :  { %v1770_v14 = vpop.permute.xlu1 %1769 }
0x15b3   :  { %v1766_v15 = vpop.permute.xlu0 %1765 }
0x15b4   :  { %v1772_v17 = vsel %vm144_vm3, %v1766_v15, %v1770_v14 }
0x15b5   :  { %v1774_v18 = vrot.slane %v1772_v17, 6 }
0x15b7   :  { %2411 = vmatmul.mubr.msk.f32.vlgmr.msra.gmra.mxu1 %vm257_vm4, %v1774_v18 }
0x1677   :  { %v1843_v10 = vpop.f32.mrf.mxu1 }
0x1678   :  { %v1844_v22 = vadd.f32 %v2577_v20, %v1843_v10 }
0x1679   :  { %v2412_v23 = vpop.f32.mrf.mxu1 }
0x167a   :  { %2549 = vtanh.f32 %v1844_v22  ;;  %v2037_v25 = vmul.f32 -1.442695, %v1844_v22 }
0x167c   :  { %2551 = vpow2.f32 %v2037_v25 }
0x1687   :  { %v2550_v24 = vpop.eup %2549 }
0x1688   :  { %1856 = vrot.lane.b32.xlu0 %v2550_v24, %s2580_s28 }
0x1689   :  { %v2552_v26 = vpop.eup %2551 }
0x168a   :  { %v1850_v27 = vadd.f32 1.0, %v2552_v26 }
0x168c   :  { %2553 = vrcp.f32 %v1850_v27 }
0x1699   :  { %v2554_v28 = vpop.eup %2553 }
0x169a   :  { %v1854_v39 = vmul.f32 %v2554_v28, %v1646_v7 }
0x16fa   :  { %v1857_v35 = vpop.permute.xlu0 %1856 }
0x16fb   :  { %v1859_v38 = vmul.f32 %v2554_v28, %v1857_v35 }
0x16fd   :  { %1861 = vrot.lane.b32.xlu1 %v1859_v38, %s2580_s28 }
0x1701   :  { %356 = vrot.lane.b32.xlu1 %v2825_v19, %s2581_s23 }
0x1705   :  { %790 = vrot.lane.b32.xlu1 %v2931_v61, %s2581_s23 }
0x1709   :  { %1221 = vrot.lane.b32.xlu1 %v3036_v41, %s2581_s23  ;;  %v1881_v41 = vld [vmem:[%s3216_s7 + $0x18] sm:$0xff] }
0x170a   :  { %2413 = vmatprep.subr.mxu0 %v1881_v41 }
0x170b   :  { %2414 = vmatpush3.msra.mxu0 %v1881_v41 }
0x170c   :  { %2415 = vmatprep.subr.mxu0 %v1880_v47 }
0x170d   :  { %1654 = vrot.lane.b32.xlu1 %v1652_v5, %s2581_s23  ;;  %2416 = vmatpush3.msra.mxu0 %v1880_v47 }
0x176f   :  { %v1862_v40 = vpop.permute.xlu1 %1861 }
0x1770   :  { %v1864_v42 = vadd.f32 %v1862_v40, %v1854_v39 }
0x1772   :  { %2555 = vtanh.f32 %v1864_v42 }
0x1773   :  { %v357_v44 = vpop.permute.xlu1 %356 }
0x1774   :  { %360 = vst.msk [vmem:[#allocation2] sm:$0x3] %vm359_vm5, %v357_v44 }
0x1777   :  { %v791_v45 = vpop.permute.xlu1 %790 }
0x1778   :  { %793 = vst.msk [vmem:[#allocation2 + $0x4] sm:$0x3] %vm359_vm5, %v791_v45 }
0x177b   :  { %v1222_v19 = vpop.permute.xlu1 %1221 }
0x177c   :  { %1224 = vst.msk [vmem:[#allocation2 + $0x8] sm:$0x3] %vm359_vm5, %v1222_v19 }
0x177f   :  { %v2556_v61 = vpop.eup %2555  ;;  %v1655_v46 = vpop.permute.xlu1 %1654 }
0x1780   :  { %1657 = vst.msk [vmem:[#allocation2 + $0xc] sm:$0x3] %vm359_vm5, %v1655_v46  ;;  %1867 = vrot.lane.b32.xlu0 %v2556_v61, %s2580_s28 }
0x1784   :  { %572 = vrot.lane.b32.xlu0 %v2878_v8, %s2581_s23  ;;  %v1879_v8 = vld [vmem:[%s3216_s7 + $0x8] sm:$0xff] }
0x1785   :  { %2417 = vmatprep.subr.mxu0 %v1879_v8 }
0x1786   :  { %2418 = vmatpush3.msra.mxu0 %v1879_v8 }
0x1788   :  { %1008 = vrot.lane.b32.xlu0 %v2984_v55, %s2581_s23  ;;  %v1878_v55 = vld [vmem:[%s3216_s7] sm:$0xff] }
0x1789   :  { %2419 = vmatprep.subr.mxu0 %v1878_v55 }
0x178a   :  { %2420 = vmatpush3.msra.mxu0 %v1878_v55 }
0x178c   :  { %1436 = vrot.lane.b32.xlu0 %v3096_v21, %s2581_s23 }
0x17f2   :  { %v1868_v21 = vpop.permute.xlu0 %1867 }
0x17f3   :  { %v1870_v16 = vmul.f32 %v2554_v28, %v1868_v21 }
0x17f5   :  { %1872 = vrot.lane.b32.xlu0 %v1870_v16, %s2581_s23 }
0x17f6   :  { %v573_v48 = vpop.permute.xlu0 %572 }
0x17f7   :  { %575 = vst.msk [vmem:[#allocation2 + $0x2] sm:$0x3] %vm359_vm5, %v573_v48 }
0x17fa   :  { %v1009_v49 = vpop.permute.xlu0 %1008 }
0x17fb   :  { %1011 = vst.msk [vmem:[#allocation2 + $0x6] sm:$0x3] %vm359_vm5, %v1009_v49 }
0x17fe   :  { %v1437_v50 = vpop.permute.xlu0 %1436 }
0x17ff   :  { %1439 = vst.msk [vmem:[#allocation2 + $0xa] sm:$0x3] %vm359_vm5, %v1437_v50 }
0x1802   :  { %v1876_v51 = vld [vmem:[#allocation2] sm:$0xff] }
0x1803   :  { %2421 = vmatprep.mubr.msk.f32.mxu0 %vm144_vm3, %v1876_v51 }
0x1867   :  { %v1873_v52 = vpop.permute.xlu0 %1872 }
0x1868   :  { %1875 = vst.msk [vmem:[#allocation2 + $0xe] sm:$0x3] %vm359_vm5, %v1873_v52 }
0x186f   :  { %v1877_v29 = vld [vmem:[#allocation2 + $0x8] sm:$0xff] }
0x1870   :  { %2422 = vmatmul.mubr.msk.f32.vlgmr.msra.gmra.mxu0 %vm144_vm3, %v1877_v29 }
0x1930   :  { %v2423_v31 = vpop.f32.mrf.mxu0 }
0x1931   :  { %v1967_v1 = vadd.f32 %v2423_v31, %v2038_v30 }
0x1932   :  { %v1961_v32 = vpop.f32.mrf.mxu0 }
0x1933   :  { %v1962_v33 = vadd.f32 %v2038_v30, %v1961_v32  ;;  %v1974_v53 = vsel %vm1970_vm6, %v1967_v1, -inf }
0x1934   :  { %1975 = vmax.xlane.f32.xlu0 %v1974_v53 }
0x1935   :  { %v1971_v43 = vsel %vm1970_vm6, %v1962_v33, -inf }
0x1936   :  { %1972 = vmax.xlane.f32.xlu1 %v1971_v43 }
0x19bd   :  { %v1976_v54 = vpop.xlane.xlu0 %1975 }
0x19be   :  { %v1978_v56 = vsub.f32 %v1967_v1, %v1976_v54 }
0x19bf   :  { %v1973_v57 = vpop.xlane.xlu1 %1972 }
0x19c0   :  { %v1981_v34 = vmul.f32 1.442695, %v1978_v56  ;;  %v1977_v13 = vsub.f32 %v1962_v33, %v1973_v57 }
0x19c2   :  { %2557 = vpow2.f32 %v1981_v34  ;;  %v1979_v58 = vmul.f32 1.442695, %v1977_v13 }
0x19c4   :  { %2559 = vpow2.f32 %v1979_v58 }
0x19cf   :  { %v2558_v36 = vpop.eup %2557 }
0x19d0   :  { %v1986_v59 = vsel %vm1970_vm6, %v2558_v36, 0.0 }
0x19d1   :  { %v2560_v37 = vpop.eup %2559  ;;  %1987 = vadd.xlane.f32.xlu1 %v1986_v59 }
0x19d2   :  { %v1983_v2 = vsel %vm1970_vm6, %v2560_v37, 0.0 }
0x19d3   :  { %1984 = vadd.xlane.f32.xlu0 %v1983_v2 }
0x1a5a   :  { %v1988_v4 = vpop.xlane.xlu1 %1987 }
0x1a5b   :  { %2561 = vlog2.f32 %v1988_v4 }
0x1a5c   :  { %v1985_v7 = vpop.xlane.xlu0 %1984 }
0x1a5d   :  { %2563 = vlog2.f32 %v1985_v7 }
0x1a68   :  { %v2562_v9 = vpop.eup %2561 }
0x1a69   :  { %v1992_v60 = vmul.f32 0.6931472, %v2562_v9 }
0x1a6a   :  { %v2564_v62 = vpop.eup %2563 }
0x1a6b   :  { %v1994_v63 = vsub.f32 %v1978_v56, %v1992_v60  ;;  %v1990_v0 = vmul.f32 0.6931472, %v2564_v62 }
0x1a6d   :  { %1996 = vst.msk [vmem:[%s3218_s9 + $0x8] sm:$0xff] %vm1970_vm6, %v1994_v63  ;;  %v1993_v3 = vsub.f32 %v1977_v13, %v1990_v0 }
0x1a6f   :  { %1995 = vst.msk [vmem:[%s3218_s9] sm:$0xff] %vm1970_vm6, %v1993_v3 }

</bundles_post_ra>
